<compile_context>
chip_gen: v7x
topology: tpu7x:2x2x1
jax: 0.10.0
libtpu: 0.0.40
codegen_flags: <defaults>
</compile_context>

<pallas_src>
import functools
import numpy as np

import jax
import jax.numpy as jnp
from jax import lax
from jax.experimental import pallas as pl
from jax.experimental.pallas import tpu as pltpu


def _round_up(n, m):
    return ((n + m - 1) // m) * m


# ----------------------------------------------------------------------------
# Pallas kernel 1: matmul + bias + fused activation (conv / deconv hot path)
# ----------------------------------------------------------------------------
def _mm_bias_act_kernel(a_ref, w_ref, b_ref, o_ref, *, act):
    acc = jnp.dot(a_ref[...], w_ref[...], preferred_element_type=jnp.float32)
    acc = acc + b_ref[...]                      # f32 epilogue (v5e-friendly)
    if act == "relu":
        acc = jnp.maximum(acc, 0.0)
    elif act == "tanh":
        acc = jnp.tanh(acc)
    o_ref[...] = acc


def matmul_bias_act(a_bf16, w_bf16, b_f32, act="none"):
    """a: (M, Kp) bf16, w: (Kp, Np) bf16, b: (1, Np) f32 -> (M, Np) f32.
    Kp, Np are multiples of 128 (lane-dense).  Grid capped at 2 parallel
    M-blocks so both v7x TensorCores get work; v5e/v6e see at most 2 steps."""
    M, Kp = a_bf16.shape
    _, Np = w_bf16.shape
    nblk = 2 if (M >= 16 and M % 16 == 0) else 1
    tm = M // nblk
    return pl.pallas_call(
        functools.partial(_mm_bias_act_kernel, act=act),
        out_shape=jax.ShapeDtypeStruct((M, Np), jnp.float32),
        grid=(nblk,),
        in_specs=[
            pl.BlockSpec((tm, Kp), lambda i: (i, 0)),
            pl.BlockSpec((Kp, Np), lambda i: (0, 0)),
            pl.BlockSpec((1, Np), lambda i: (0, 0)),
        ],
        out_specs=pl.BlockSpec((tm, Np), lambda i: (i, 0)),
        compiler_params=pltpu.CompilerParams(dimension_semantics=("parallel",)),
    )(a_bf16, w_bf16, b_f32)


# ----------------------------------------------------------------------------
# Pallas kernel 2: vector quantization (distances + argmin + gather + sq-err)
# ----------------------------------------------------------------------------
def _vq_kernel(z_ref, e_ref, esq_ref, eq_ref, ind_ref, sq_ref, *, n_codes):
    # z: (N, Dp) f32 rows to quantize; e: (K, Dp) f32 codebook (Dp lane-padded)
    z = z_ref[...]
    e = e_ref[...]

    ones = jnp.ones((1, z.shape[1]), jnp.float32)
    zn = lax.dot_general(ones, z * z, (((1,), (1,)), ((), ())),
                         preferred_element_type=jnp.float32)          # (1, N)
    cross = lax.dot_general(e, z, (((1,), (1,)), ((), ())),
                            preferred_element_type=jnp.float32)       # (K, N)
    # ||e||^2 is hoisted to the wrapper (esq_ref).  f32 throughout -> exact
    # argmin tie-break semantics.
    d = esq_ref[...] - 2.0 * cross + zn                               # (K, N)

    dmin = jnp.min(d, axis=0, keepdims=True)                          # (1, N)
    iota = lax.broadcasted_iota(jnp.int32, d.shape, 0)                # (K, N)
    ind = jnp.min(jnp.where(d == dmin, iota, n_codes),
                  axis=0, keepdims=True)                              # (1, N)

    onehot = (iota == ind).astype(jnp.float32)                        # (K, N)
    eq = lax.dot_general(onehot, e, (((0,), (0,)), ((), ())),
                         preferred_element_type=jnp.float32)          # (N, Dp)

    eq_ref[...] = eq
    ind_ref[...] = ind                                                # lane-dense
    diff = z - eq
    sq_ref[...] = jnp.sum(diff * diff).reshape(1, 1)


def vector_quantize(z_pad, codebook_pad, codebook_sq):
    """z_pad: (N, Dp) f32, codebook_pad: (K, Dp) f32, codebook_sq: (K, 1) f32."""
    # TODO(synk): for large N (bigger batch/resolution) tile the grid over N
    # chunks with a resident codebook block and accumulate sqerr via pl.when;
    # at N=32 a single block is optimal (launch-overhead-bound regime).
    N, Dp = z_pad.shape
    K, _ = codebook_pad.shape
    return pl.pallas_call(
        functools.partial(_vq_kernel, n_codes=K),
        out_shape=(
            jax.ShapeDtypeStruct((N, Dp), jnp.float32),
            jax.ShapeDtypeStruct((1, N), jnp.int32),
            jax.ShapeDtypeStruct((1, 1), jnp.float32),
        ),
        grid=(1,),
        in_specs=[
            pl.BlockSpec((N, Dp), lambda i: (0, 0)),
            pl.BlockSpec((K, Dp), lambda i: (0, 0)),
            pl.BlockSpec((K, 1), lambda i: (0, 0)),
        ],
        out_specs=(
            pl.BlockSpec((N, Dp), lambda i: (0, 0)),
            pl.BlockSpec((1, N), lambda i: (0, 0)),
            pl.BlockSpec((1, 1), lambda i: (0, 0)),
        ),
    )(z_pad, codebook_pad, codebook_sq)


# ----------------------------------------------------------------------------
# Pallas kernel 3: fused PixelCNN stack (A conv -> n * B conv -> 1x1 out)
# Each masked conv on the fixed Hl x Wl grid is pre-converted to an exact
# dense linear operator, so the whole stack is a chain of matmuls living in
# VMEM -- one launch, no intermediate HBM traffic.
# ----------------------------------------------------------------------------
def _pixelcnn_kernel(x_ref, wa_ref, ba_ref, wb_ref, bb_ref, wo_ref, bo_ref,
                     o_ref, *, n_layers):
    h = jnp.dot(x_ref[...], wa_ref[...], preferred_element_type=jnp.float32)
    h = jnp.maximum(h + ba_ref[...], 0.0)
    for i in range(n_layers):                     # static unrolled layer loop
        h = jnp.dot(h.astype(jnp.bfloat16), wb_ref[i],
                    preferred_element_type=jnp.float32)
        h = jnp.maximum(h + bb_ref[i], 0.0)
    out = jnp.dot(h.astype(jnp.bfloat16), wo_ref[...],
                  preferred_element_type=jnp.float32)
    o_ref[...] = out + bo_ref[...]


def pixelcnn_fused(x_flat_bf16, pk, n_layers):
    B, Fin = x_flat_bf16.shape
    Hh = pk["pcnn_wa"].shape[1]
    Fo = pk["pcnn_wo"].shape[1]
    return pl.pallas_call(
        functools.partial(_pixelcnn_kernel, n_layers=n_layers),
        out_shape=jax.ShapeDtypeStruct((B, Fo), jnp.float32),
        grid=(1,),
        in_specs=[
            pl.BlockSpec((B, Fin), lambda i: (0, 0)),
            pl.BlockSpec((Fin, Hh), lambda i: (0, 0)),
            pl.BlockSpec((1, Hh), lambda i: (0, 0)),
            pl.BlockSpec((n_layers, Hh, Hh), lambda i: (0, 0, 0)),
            pl.BlockSpec((n_layers, 1, Hh), lambda i: (0, 0, 0)),
            pl.BlockSpec((Hh, Fo), lambda i: (0, 0)),
            pl.BlockSpec((1, Fo), lambda i: (0, 0)),
        ],
        out_specs=pl.BlockSpec((B, Fo), lambda i: (0, 0)),
    )(x_flat_bf16, pk["pcnn_wa"], pk["pcnn_ba"], pk["pcnn_wb"], pk["pcnn_bb"],
      pk["pcnn_wo"], pk["pcnn_bo"])


# ----------------------------------------------------------------------------
# NHWC im2col + conv / deconv wrappers (thin XLA glue around the kernels)
# ----------------------------------------------------------------------------
def im2col_nhwc(x, k, s, p):
    """x: (B, H, W, C) -> patches (B*Ho*Wo, k*k*C) in (ki, kj, c) order."""
    B, H, W, C = x.shape
    xp = jnp.pad(x, ((0, 0), (p, p), (p, p), (0, 0)))
    Ho = (H + 2 * p - k) // s + 1
    Wo = (W + 2 * p - k) // s + 1
    cols = []
    for di in range(k):
        for dj in range(k):
            cols.append(xp[:, di: di + s * (Ho - 1) + 1: s,
                              dj: dj + s * (Wo - 1) + 1: s, :])
    patches = jnp.concatenate(cols, axis=-1)                 # (B, Ho, Wo, k*k*C)
    return patches.reshape(B * Ho * Wo, k * k * C), Ho, Wo


def _prep_patches(patches, k_pad):
    patches = patches.astype(jnp.bfloat16)
    k_real = patches.shape[1]
    if k_pad > k_real:
        patches = jnp.pad(patches, ((0, 0), (0, k_pad - k_real)))
    return patches


def conv2d_nhwc(x, w_mat, bias, *, k, s, p, n_out, act):
    B = x.shape[0]
    patches, Ho, Wo = im2col_nhwc(x, k, s, p)
    patches = _prep_patches(patches, w_mat.shape[0])
    out = matmul_bias_act(patches, w_mat, bias, act)         # (M, Np) f32
    return out[:, :n_out].reshape(B, Ho, Wo, n_out)


def deconv2x_nhwc(x, w_mat, bias, *, n_out, act):
    """ConvTranspose2d(k=4, s=2, p=1) via sub-pixel decomposition:
    one 3x3/stride-1 im2col + one matmul with 4*C_out columns + pixel shuffle."""
    B, H, W, _ = x.shape
    patches, _, _ = im2col_nhwc(x, 3, 1, 1)                  # (B*H*W, 9*C)
    patches = _prep_patches(patches, w_mat.shape[0])
    out = matmul_bias_act(patches, w_mat, bias, act)         # (B*H*W, Np) f32
    out = out[:, :4 * n_out].reshape(B, H, W, 2, 2, n_out)
    out = out.transpose(0, 1, 3, 2, 4, 5).reshape(B, 2 * H, 2 * W, n_out)
    return out


# ----------------------------------------------------------------------------
# Parameter init (PyTorch conventions) + one-time packing into kernel form
# ----------------------------------------------------------------------------
def make_pixelcnn_mask_np(k, mask_type):
    m = np.ones((k, k), np.float32)
    c = k // 2
    m[c, c + (1 if mask_type == "B" else 0):] = 0.0
    m[c + 1:, :] = 0.0
    return m[None, None]                                     # (1, 1, k, k)


def init_params(key, in_ch, code_dim, code_size, pcnn_hidden, pcnn_layers):
    def conv_w(k_, c_out, c_in, ksz):
        fan_in = c_in * ksz * ksz
        return jax.random.normal(k_, (c_out, c_in, ksz, ksz), jnp.float32) / np.sqrt(fan_in)

    keys = jax.random.split(key, 16 + pcnn_layers)
    p = {}
    # VQ-VAE encoder
    p["enc1_w"] = conv_w(keys[0], code_dim, in_ch, 4)
    p["enc1_b"] = jnp.zeros((code_dim,), jnp.float32)
    p["enc2_w"] = conv_w(keys[1], code_dim, code_dim, 4)
    p["enc2_b"] = jnp.zeros((code_dim,), jnp.float32)
    # codebook
    p["codebook"] = jax.random.normal(keys[2], (code_size, code_dim), jnp.float32) / np.sqrt(code_dim)
    # VQ-VAE decoder (ConvTranspose2d convention: (C_in, C_out, k, k))
    p["dec1_w"] = jax.random.normal(keys[3], (code_dim, code_dim, 4, 4), jnp.float32) / np.sqrt(code_dim * 16)
    p["dec1_b"] = jnp.zeros((code_dim,), jnp.float32)
    p["dec2_w"] = jax.random.normal(keys[4], (code_dim, in_ch, 4, 4), jnp.float32) / np.sqrt(code_dim * 16)
    p["dec2_b"] = jnp.zeros((in_ch,), jnp.float32)
    # PixelCNN (masked convs over the 1-channel index map)
    p["pcnn_a_w"] = conv_w(keys[5], pcnn_hidden, 1, 7)
    p["pcnn_a_b"] = jnp.zeros((pcnn_hidden,), jnp.float32)
    p["pcnn_b_w"] = [conv_w(keys[6 + i], pcnn_hidden, pcnn_hidden, 3) for i in range(pcnn_layers)]
    p["pcnn_b_b"] = [jnp.zeros((pcnn_hidden,), jnp.float32) for _ in range(pcnn_layers)]
    p["pcnn_out_w"] = conv_w(keys[6 + pcnn_layers], code_size, pcnn_hidden, 1)
    p["pcnn_out_b"] = jnp.zeros((code_size,), jnp.float32)
    return p


def pack_params(p, *, code_dim, code_size, pcnn_hidden, pcnn_layers, Hl, Wl):
    """One-time host-side packing: weight matrices in (ki,kj,c) order, K/N
    zero-padded to multiples of 128, cast to bf16; biases padded f32 rows."""
    def pad2(m, rows, cols):
        out = np.zeros((rows, cols), np.float32)
        out[:m.shape[0], :m.shape[1]] = m
        return out

    def conv_pack(w, b):
        w = np.asarray(w, np.float32)                        # (C_out, C_in, k, k)
        c_out, c_in, kh, kw = w.shape
        K, N = kh * kw * c_in, c_out
        Kp, Np = _round_up(K, 128), _round_up(N, 128)
        wm = w.transpose(2, 3, 1, 0).reshape(K, N)           # (ki,kj,c) x C_out
        bias = pad2(np.asarray(b, np.float32).reshape(1, -1), 1, Np)
        return jnp.asarray(pad2(wm, Kp, Np), jnp.bfloat16), jnp.asarray(bias, jnp.float32)

    def deconv_pack(w, b):
        # Sub-pixel decomposition of ConvTranspose2d(k=4, s=2, p=1).
        w = np.asarray(w, np.float32)                        # (C_in, C_out, 4, 4)
        c_in, c_out = w.shape[0], w.shape[1]
        amap = {(0, 0): 3, (0, 1): 1, (1, 1): 2, (1, 2): 0}  # (phase, win_off) -> kernel idx
        W6 = np.zeros((3, 3, c_in, 2, 2, c_out), np.float32)
        for (r, di), a in amap.items():
            for (c, dj), bcol in amap.items():
                W6[di, dj, :, r, c, :] = w[:, :, a, bcol]
        K, N = 9 * c_in, 4 * c_out
        Kp, Np = _round_up(K, 128), _round_up(N, 128)
        wm = pad2(W6.reshape(K, N), Kp, Np)
        bias = pad2(np.tile(np.asarray(b, np.float32), 4).reshape(1, -1), 1, Np)
        return jnp.asarray(wm, jnp.bfloat16), jnp.asarray(bias, jnp.float32)

    def conv_to_dense(w_eff, H, W, pad):
        # Exact dense linear operator of a stride-1 'same' conv on a fixed HxW grid.
        c_out, c_in, k, _ = w_eff.shape
        L = np.zeros((H, W, c_in, H, W, c_out), np.float32)
        for oi in range(H):
            for oj in range(W):
                for ii in range(H):
                    for jj in range(W):
                        a = ii - oi + pad
                        bq = jj - oj + pad
                        if 0 <= a < k and 0 <= bq < k:
                            L[ii, jj, :, oi, oj, :] = w_eff[:, :, a, bq].T
        return L.reshape(H * W * c_in, H * W * c_out)

    pk = {}
    pk["enc1_w"], pk["enc1_b"] = conv_pack(p["enc1_w"], p["enc1_b"])
    pk["enc2_w"], pk["enc2_b"] = conv_pack(p["enc2_w"], p["enc2_b"])

    # codebook: pad D to 128 lanes; hoist ||e||^2 (f32).
    cb = np.asarray(p["codebook"], np.float32)               # (K, D)
    Dp = _round_up(code_dim, 128)
    cbp = np.zeros((code_size, Dp), np.float32)
    cbp[:, :code_dim] = cb
    pk["codebook"] = jnp.asarray(cbp, jnp.float32)
    pk["codebook_sq"] = jnp.asarray(np.sum(cbp * cbp, axis=1, keepdims=True), jnp.float32)

    pk["dec1_w"], pk["dec1_b"] = deconv_pack(p["dec1_w"], p["dec1_b"])
    pk["dec2_w"], pk["dec2_b"] = deconv_pack(p["dec2_w"], p["dec2_b"])

    # PixelCNN: masked convs -> dense operators over the Hl x Wl latent grid.
    mask_a = make_pixelcnn_mask_np(7, "A")
    mask_b = make_pixelcnn_mask_np(3, "B")
    hflat = Hl * Wl * pcnn_hidden
    fin = Hl * Wl * 1
    fin_p = _round_up(fin, 128)
    wa = conv_to_dense(np.asarray(p["pcnn_a_w"], np.float32) * mask_a, Hl, Wl, 3)
    pk["pcnn_wa"] = jnp.asarray(pad2(wa, fin_p, hflat), jnp.bfloat16)
    pk["pcnn_ba"] = jnp.asarray(np.tile(np.asarray(p["pcnn_a_b"], np.float32), Hl * Wl).reshape(1, -1),
                                jnp.float32)
    wbs, bbs = [], []
    for i in range(pcnn_layers):
        wbs.append(conv_to_dense(np.asarray(p["pcnn_b_w"][i], np.float32) * mask_b, Hl, Wl, 1))
        bbs.append(np.tile(np.asarray(p["pcnn_b_b"][i], np.float32), Hl * Wl).reshape(1, -1))
    pk["pcnn_wb"] = jnp.asarray(np.stack(wbs, 0), jnp.bfloat16)          # (L, hflat, hflat)
    pk["pcnn_bb"] = jnp.asarray(np.stack(bbs, 0), jnp.float32)           # (L, 1, hflat)
    wo = conv_to_dense(np.asarray(p["pcnn_out_w"], np.float32), Hl, Wl, 0)
    pk["pcnn_wo"] = jnp.asarray(wo, jnp.bfloat16)                        # (hflat, Hl*Wl*code_size)
    pk["pcnn_bo"] = jnp.asarray(np.tile(np.asarray(p["pcnn_out_b"], np.float32), Hl * Wl).reshape(1, -1),
                                jnp.float32)
    return pk


# ----------------------------------------------------------------------------
# Full forward (NCHW module boundary, NHWC inside)
# ----------------------------------------------------------------------------
def vqvae_pixelcnn_forward(pk, x, *, code_dim, code_size, pcnn_layers):
    B = x.shape[0]
    in_ch = x.shape[1]
    x_nhwc = jnp.transpose(x, (0, 2, 3, 1))

    # ----- encoder: 16x16 -> 8x8 -> 4x4 -----
    h = conv2d_nhwc(x_nhwc, pk["enc1_w"], pk["enc1_b"], k=4, s=2, p=1,
                    n_out=code_dim, act="relu")
    z = conv2d_nhwc(h, pk["enc2_w"], pk["enc2_b"], k=4, s=2, p=1,
                    n_out=code_dim, act="none")
    _, Hl, Wl, D = z.shape

    # ----- codebook (vector quantization) -----
    z_flat = z.reshape(B * Hl * Wl, D)
    Dp = pk["codebook"].shape[1]
    z_pad = jnp.pad(z_flat, ((0, 0), (0, Dp - D)))
    e_q_pad, ind, sq = vector_quantize(z_pad, pk["codebook"], pk["codebook_sq"])
    e_q = e_q_pad[:, :D].reshape(B, Hl, Wl, D)
    e_st = e_q  # straight-through estimator equals e_q numerically in forward
    # spec forward: commitment_loss = 0.15 * mean((z - e_q)**2)
    commitment_loss = 0.15 * sq[0, 0] / jnp.float32(B * Hl * Wl * D)
    e_ind = ind.reshape(B, Hl, Wl)[:, None, :, :]            # (B, 1, Hl, Wl) i32

    # ----- PixelCNN prior on (detached) indices, fully fused kernel -----
    # TODO(synk): reference PixelCNN likely embeds/one-hots the Long indices;
    # here they are fed as a single float channel (detach is a forward no-op).
    fin_p = pk["pcnn_wa"].shape[0]
    px = ind.reshape(B, Hl * Wl).astype(jnp.bfloat16)
    px = jnp.pad(px, ((0, 0), (0, fin_p - Hl * Wl)))
    logits_flat = pixelcnn_fused(px, pk, pcnn_layers)        # (B, Hl*Wl*code_size)
    e_ind_ar = logits_flat.reshape(B, Hl, Wl, code_size).transpose(0, 3, 1, 2)

    # ----- decoder: 4x4 -> 8x8 -> 16x16 (sub-pixel transposed convs) -----
    d1 = deconv2x_nhwc(e_st, pk["dec1_w"], pk["dec1_b"], n_out=code_dim, act="relu")
    xt = deconv2x_nhwc(d1, pk["dec2_w"], pk["dec2_b"], n_out=in_ch, act="tanh")
    x_tilde = jnp.transpose(xt, (0, 3, 1, 2))

    return x_tilde, commitment_loss, e_ind, e_ind_ar


# ----------------------------------------------------------------------------
# Main
# ----------------------------------------------------------------------------
if __name__ == "__main__":
    B, C_in, H, W = 2, 3, 16, 16
    code_dim, code_size = 32, 64
    pcnn_hidden, pcnn_layers = 32, 2
    Hl = Wl = H // 4

    key = jax.random.PRNGKey(0)
    k_x, k_p = jax.random.split(key)
    x = jax.random.normal(k_x, (B, C_in, H, W), jnp.float32)
    params = init_params(k_p, C_in, code_dim, code_size, pcnn_hidden, pcnn_layers)
    packed = pack_params(params, code_dim=code_dim, code_size=code_size,
                         pcnn_hidden=pcnn_hidden, pcnn_layers=pcnn_layers,
                         Hl=Hl, Wl=Wl)

    fwd = jax.jit(functools.partial(vqvae_pixelcnn_forward,
                                    code_dim=code_dim, code_size=code_size,
                                    pcnn_layers=pcnn_layers))
    x_tilde, commitment_loss, e_ind, e_ind_ar = fwd(packed, x)
    jax.block_until_ready((x_tilde, commitment_loss, e_ind, e_ind_ar))

    assert x_tilde.shape == (B, C_in, H, W)
    assert e_ind.shape == (B, 1, Hl, Wl) and e_ind.dtype == jnp.int32
    assert e_ind_ar.shape == (B, code_size, Hl, Wl)
    assert commitment_loss.shape == ()
    print("KERNEL_OK")
</pallas_src>

<mosaic_0001>
module attributes {stable_mosaic.version = 11 : i64} {
  func.func @_mm_bias_act_kernel(%arg0: i32, %arg1: memref<64x128xbf16, #tpu.memory_space<vmem>>, %arg2: memref<128x128xbf16, #tpu.memory_space<vmem>>, %arg3: memref<1x128xf32, #tpu.memory_space<vmem>>, %arg4: memref<64x128xf32, #tpu.memory_space<vmem>>) attributes {dimension_semantics = [#tpu.dimension_semantics<parallel>], iteration_bounds = array<i64: 2>, scalar_prefetch = 0 : i64, scratch_operands = 0 : i64, tpu.core_type = #tpu.core_type<tc>, window_params = [{transform_indices = @transform_0, window_bounds = array<i64: 64, 128>}, {pipeline_mode = #tpu.pipeline_mode<synchronous>, transform_indices = @transform_1, window_bounds = array<i64: 128, 128>}, {pipeline_mode = #tpu.pipeline_mode<synchronous>, transform_indices = @transform_2, window_bounds = array<i64: 1, 128>}, {transform_indices = @transform_3, window_bounds = array<i64: 64, 128>}]} {
    %c0 = arith.constant 0 : index
    %c0_0 = arith.constant 0 : index
    %0 = vector.load %arg1[%c0, %c0_0] : memref<64x128xbf16, #tpu.memory_space<vmem>>, vector<64x128xbf16>
    %c0_1 = arith.constant 0 : index
    %c0_2 = arith.constant 0 : index
    %1 = vector.load %arg2[%c0_1, %c0_2] : memref<128x128xbf16, #tpu.memory_space<vmem>>, vector<128x128xbf16>
    %cst = arith.constant dense<0.000000e+00> : vector<64x128xf32>
    %2 = tpu.matmul %0, %1, %cst {dimension_numbers = #tpu.dot_dimension_numbers<[1], [0], [0], [1], [0, 0, 1, 1], [], []>} : vector<64x128xbf16>, vector<128x128xbf16>, vector<64x128xf32> -> vector<64x128xf32>
    %c0_3 = arith.constant 0 : index
    %c0_4 = arith.constant 0 : index
    %3 = vector.load %arg3[%c0_3, %c0_4] : memref<1x128xf32, #tpu.memory_space<vmem>>, vector<1x128xf32>
    %4 = vector.broadcast %3 : vector<1x128xf32> to vector<64x128xf32>
    %5 = arith.addf %2, %4 : vector<64x128xf32>
    %cst_5 = arith.constant 0.000000e+00 : f32
    %6 = vector.broadcast %cst_5 : f32 to vector<64x128xf32>
    %7 = arith.maximumf %5, %6 : vector<64x128xf32>
    %c0_6 = arith.constant 0 : index
    %c0_7 = arith.constant 0 : index
    %8 = vector.load %arg4[%c0_6, %c0_7] : memref<64x128xf32, #tpu.memory_space<vmem>>, vector<64x128xf32>
    tpu.vector_store %arg4[%c0_6, %c0_7], %7 {strides = array<i32>} : memref<64x128xf32, #tpu.memory_space<vmem>>, vector<64x128xf32>,
    return
  }
  func.func @transform_0(%arg0: i32) -> (i32, i32) {
    %c0_i32 = arith.constant 0 : i32
    %c0_i32_0 = arith.constant 0 : i32
    return %arg0, %c0_i32 : i32, i32
  }
  func.func @transform_1(%arg0: i32) -> (i32, i32) {
    %c0_i32 = arith.constant 0 : i32
    %c0_i32_0 = arith.constant 0 : i32
    %c0_i32_1 = arith.constant 0 : i32
    return %c0_i32, %c0_i32_0 : i32, i32
  }
  func.func @transform_2(%arg0: i32) -> (i32, i32) {
    %c0_i32 = arith.constant 0 : i32
    %c0_i32_0 = arith.constant 0 : i32
    %c0_i32_1 = arith.constant 0 : i32
    return %c0_i32, %c0_i32_0 : i32, i32
  }
  func.func @transform_3(%arg0: i32) -> (i32, i32) {
    %c0_i32 = arith.constant 0 : i32
    %c0_i32_0 = arith.constant 0 : i32
    return %arg0, %c0_i32 : i32, i32
  }
}

module attributes {stable_mosaic.version = 11 : i64} {
  func.func @_mm_bias_act_kernel(%arg0: i32, %arg1: memref<16x512xbf16, #tpu.memory_space<vmem>>, %arg2: memref<512x128xbf16, #tpu.memory_space<vmem>>, %arg3: memref<1x128xf32, #tpu.memory_space<vmem>>, %arg4: memref<16x128xf32, #tpu.memory_space<vmem>>) attributes {dimension_semantics = [#tpu.dimension_semantics<parallel>], iteration_bounds = array<i64: 2>, scalar_prefetch = 0 : i64, scratch_operands = 0 : i64, tpu.core_type = #tpu.core_type<tc>, window_params = [{transform_indices = @transform_0, window_bounds = array<i64: 16, 512>}, {pipeline_mode = #tpu.pipeline_mode<synchronous>, transform_indices = @transform_1, window_bounds = array<i64: 512, 128>}, {pipeline_mode = #tpu.pipeline_mode<synchronous>, transform_indices = @transform_2, window_bounds = array<i64: 1, 128>}, {transform_indices = @transform_3, window_bounds = array<i64: 16, 128>}]} {
    %c0 = arith.constant 0 : index
    %c0_0 = arith.constant 0 : index
    %0 = vector.load %arg1[%c0, %c0_0] : memref<16x512xbf16, #tpu.memory_space<vmem>>, vector<16x512xbf16>
    %c0_1 = arith.constant 0 : index
    %c0_2 = arith.constant 0 : index
    %1 = vector.load %arg2[%c0_1, %c0_2] : memref<512x128xbf16, #tpu.memory_space<vmem>>, vector<512x128xbf16>
    %cst = arith.constant dense<0.000000e+00> : vector<16x128xf32>
    %2 = tpu.matmul %0, %1, %cst {dimension_numbers = #tpu.dot_dimension_numbers<[1], [0], [0], [1], [0, 0, 1, 1], [], []>} : vector<16x512xbf16>, vector<512x128xbf16>, vector<16x128xf32> -> vector<16x128xf32>
    %c0_3 = arith.constant 0 : index
    %c0_4 = arith.constant 0 : index
    %3 = vector.load %arg3[%c0_3, %c0_4] : memref<1x128xf32, #tpu.memory_space<vmem>>, vector<1x128xf32>
    %4 = vector.broadcast %3 : vector<1x128xf32> to vector<16x128xf32>
    %5 = arith.addf %2, %4 : vector<16x128xf32>
    %c0_5 = arith.constant 0 : index
    %c0_6 = arith.constant 0 : index
    %6 = vector.load %arg4[%c0_5, %c0_6] : memref<16x128xf32, #tpu.memory_space<vmem>>, vector<16x128xf32>
    tpu.vector_store %arg4[%c0_5, %c0_6], %5 {strides = array<i32>} : memref<16x128xf32, #tpu.memory_space<vmem>>, vector<16x128xf32>,
    return
  }
  func.func @transform_0(%arg0: i32) -> (i32, i32) {
    %c0_i32 = arith.constant 0 : i32
    %c0_i32_0 = arith.constant 0 : i32
    return %arg0, %c0_i32 : i32, i32
  }
  func.func @transform_1(%arg0: i32) -> (i32, i32) {
    %c0_i32 = arith.constant 0 : i32
    %c0_i32_0 = arith.constant 0 : i32
    %c0_i32_1 = arith.constant 0 : i32
    return %c0_i32, %c0_i32_0 : i32, i32
  }
  func.func @transform_2(%arg0: i32) -> (i32, i32) {
    %c0_i32 = arith.constant 0 : i32
    %c0_i32_0 = arith.constant 0 : i32
    %c0_i32_1 = arith.constant 0 : i32
    return %c0_i32, %c0_i32_0 : i32, i32
  }
  func.func @transform_3(%arg0: i32) -> (i32, i32) {
    %c0_i32 = arith.constant 0 : i32
    %c0_i32_0 = arith.constant 0 : i32
    return %arg0, %c0_i32 : i32, i32
  }
}

module attributes {stable_mosaic.version = 11 : i64} {
  func.func @_vq_kernel(%arg0: i32, %arg1: memref<32x128xf32, #tpu.memory_space<vmem>>, %arg2: memref<64x128xf32, #tpu.memory_space<vmem>>, %arg3: memref<64x1xf32, #tpu.memory_space<vmem>>, %arg4: memref<32x128xf32, #tpu.memory_space<vmem>>, %arg5: memref<1x32xi32, #tpu.memory_space<vmem>>, %arg6: memref<1x1xf32, #tpu.memory_space<vmem>>) attributes {dimension_semantics = [#tpu.dimension_semantics<arbitrary>], iteration_bounds = array<i64: 1>, scalar_prefetch = 0 : i64, scratch_operands = 0 : i64, tpu.core_type = #tpu.core_type<tc>, window_params = [{pipeline_mode = #tpu.pipeline_mode<synchronous>, transform_indices = @transform_0, window_bounds = array<i64: 32, 128>}, {pipeline_mode = #tpu.pipeline_mode<synchronous>, transform_indices = @transform_1, window_bounds = array<i64: 64, 128>}, {pipeline_mode = #tpu.pipeline_mode<synchronous>, transform_indices = @transform_2, window_bounds = array<i64: 64, 1>}, {pipeline_mode = #tpu.pipeline_mode<synchronous>, transform_indices = @transform_3, window_bounds = array<i64: 32, 128>}, {pipeline_mode = #tpu.pipeline_mode<synchronous>, transform_indices = @transform_4, window_bounds = array<i64: 1, 32>}, {pipeline_mode = #tpu.pipeline_mode<synchronous>, transform_indices = @transform_5, window_bounds = array<i64: 1, 1>}]} {
    %c0 = arith.constant 0 : index
    %c0_0 = arith.constant 0 : index
    %0 = vector.load %arg1[%c0, %c0_0] : memref<32x128xf32, #tpu.memory_space<vmem>>, vector<32x128xf32>
    %c0_1 = arith.constant 0 : index
    %c0_2 = arith.constant 0 : index
    %1 = vector.load %arg2[%c0_1, %c0_2] : memref<64x128xf32, #tpu.memory_space<vmem>>, vector<64x128xf32>
    %cst = arith.constant 1.000000e+00 : f32
    %2 = vector.broadcast %cst : f32 to vector<1x128xf32>
    %3 = arith.mulf %0, %0 : vector<32x128xf32>
    %cst_3 = arith.constant dense<0.000000e+00> : vector<1x32xf32>
    %4 = tpu.matmul %2, %3, %cst_3 {dimension_numbers = #tpu.dot_dimension_numbers<[1], [1], [0], [0], [0, 0, 1, 0], [], []>} : vector<1x128xf32>, vector<32x128xf32>, vector<1x32xf32> -> vector<1x32xf32>
    %cst_4 = arith.constant dense<0.000000e+00> : vector<64x32xf32>
    %5 = tpu.matmul %1, %0, %cst_4 {dimension_numbers = #tpu.dot_dimension_numbers<[1], [1], [0], [0], [0, 0, 1, 0], [], []>} : vector<64x128xf32>, vector<32x128xf32>, vector<64x32xf32> -> vector<64x32xf32>
    %c0_5 = arith.constant 0 : index
    %c0_6 = arith.constant 0 : index
    %6 = vector.load %arg3[%c0_5, %c0_6] : memref<64x1xf32, #tpu.memory_space<vmem>>, vector<64x1xf32>
    %cst_7 = arith.constant 2.000000e+00 : f32
    %7 = vector.broadcast %cst_7 : f32 to vector<64x32xf32>
    %8 = arith.mulf %7, %5 : vector<64x32xf32>
    %9 = vector.broadcast %6 : vector<64x1xf32> to vector<64x32xf32>
    %10 = arith.subf %9, %8 : vector<64x32xf32>
    %11 = vector.broadcast %4 : vector<1x32xf32> to vector<64x32xf32>
    %12 = arith.addf %10, %11 : vector<64x32xf32>
    %cst_8 = arith.constant dense<0x7F800000> : vector<32xf32>
    %13 = vector.multi_reduction <minimumf>, %12, %cst_8 [0] : vector<64x32xf32> to vector<32xf32>
    %14 = vector.shape_cast %13 : vector<32xf32> to vector<1x32xf32>
    %15 = tpu.iota {dimensions = array<i32: 0>} : vector<64x32xi32>
    %16 = vector.broadcast %14 : vector<1x32xf32> to vector<64x32xf32>
    %17 = arith.cmpf oeq, %12, %16 : vector<64x32xf32>
    %c64_i32 = arith.constant 64 : i32
    %18 = vector.broadcast %c64_i32 : i32 to vector<64x32xi32>
    %19 = arith.select %17, %15, %18 : vector<64x32xi1>, vector<64x32xi32>
    %cst_9 = arith.constant dense<2147483647> : vector<32xi32>
    %20 = vector.multi_reduction <minsi>, %19, %cst_9 [0] : vector<64x32xi32> to vector<32xi32>
    %21 = vector.shape_cast %20 : vector<32xi32> to vector<1x32xi32>
    %22 = vector.broadcast %21 : vector<1x32xi32> to vector<64x32xi32>
    %23 = arith.cmpi eq, %15, %22 : vector<64x32xi32>
    %24 = arith.extui %23 : vector<64x32xi1> to vector<64x32xi32>
    %25 = arith.sitofp %24 : vector<64x32xi32> to vector<64x32xf32>
    %cst_10 = arith.constant dense<0.000000e+00> : vector<32x128xf32>
    %26 = tpu.matmul %25, %1, %cst_10 {dimension_numbers = #tpu.dot_dimension_numbers<[0], [0], [1], [1], [0, 1, 1, 1], [], []>} : vector<64x32xf32>, vector<64x128xf32>, vector<32x128xf32> -> vector<32x128xf32>
    %c0_11 = arith.constant 0 : index
    %c0_12 = arith.constant 0 : index
    %27 = vector.load %arg4[%c0_11, %c0_12] : memref<32x128xf32, #tpu.memory_space<vmem>>, vector<32x128xf32>
    tpu.vector_store %arg4[%c0_11, %c0_12], %26 {strides = array<i32>} : memref<32x128xf32, #tpu.memory_space<vmem>>, vector<32x128xf32>,
    %c0_13 = arith.constant 0 : index
    %c0_14 = arith.constant 0 : index
    %28 = vector.load %arg5[%c0_13, %c0_14] : memref<1x32xi32, #tpu.memory_space<vmem>>, vector<1x32xi32>
    tpu.vector_store %arg5[%c0_13, %c0_14], %21 {strides = array<i32>} : memref<1x32xi32, #tpu.memory_space<vmem>>, vector<1x32xi32>,
    %29 = arith.subf %0, %26 : vector<32x128xf32>
    %30 = arith.mulf %29, %29 : vector<32x128xf32>
    %31 = vector.shape_cast %30 : vector<32x128xf32> to vector<1x32x128xf32>
    %cst_15 = arith.constant dense<0.000000e+00> : vector<1xf32>
    %32 = vector.multi_reduction <add>, %31, %cst_15 [1, 2] : vector<1x32x128xf32> to vector<1xf32>
    %33 = vector.shape_cast %32 : vector<1xf32> to vector<1x1x1xf32>
    %34 = vector.extract %33[0, 0, 0] : f32 from vector<1x1x1xf32>
    %35 = vector.broadcast %34 : f32 to vector<1x1xf32>
    %c0_16 = arith.constant 0 : index
    %c0_17 = arith.constant 0 : index
    %36 = vector.load %arg6[%c0_16, %c0_17] : memref<1x1xf32, #tpu.memory_space<vmem>>, vector<1x1xf32>
    tpu.vector_store %arg6[%c0_16, %c0_17], %35 {strides = array<i32>} : memref<1x1xf32, #tpu.memory_space<vmem>>, vector<1x1xf32>,
    return
  }
  func.func @transform_0(%arg0: i32) -> (i32, i32) {
    %c0_i32 = arith.constant 0 : i32
    %c0_i32_0 = arith.constant 0 : i32
    %c0_i32_1 = arith.constant 0 : i32
    return %c0_i32, %c0_i32_0 : i32, i32
  }
  func.func @transform_1(%arg0: i32) -> (i32, i32) {
    %c0_i32 = arith.constant 0 : i32
    %c0_i32_0 = arith.constant 0 : i32
    %c0_i32_1 = arith.constant 0 : i32
    return %c0_i32, %c0_i32_0 : i32, i32
  }
  func.func @transform_2(%arg0: i32) -> (i32, i32) {
    %c0_i32 = arith.constant 0 : i32
    %c0_i32_0 = arith.constant 0 : i32
    %c0_i32_1 = arith.constant 0 : i32
    return %c0_i32, %c0_i32_0 : i32, i32
  }
  func.func @transform_3(%arg0: i32) -> (i32, i32) {
    %c0_i32 = arith.constant 0 : i32
    %c0_i32_0 = arith.constant 0 : i32
    %c0_i32_1 = arith.constant 0 : i32
    return %c0_i32, %c0_i32_0 : i32, i32
  }
  func.func @transform_4(%arg0: i32) -> (i32, i32) {
    %c0_i32 = arith.constant 0 : i32
    %c0_i32_0 = arith.constant 0 : i32
    %c0_i32_1 = arith.constant 0 : i32
    return %c0_i32, %c0_i32_0 : i32, i32
  }
  func.func @transform_5(%arg0: i32) -> (i32, i32) {
    %c0_i32 = arith.constant 0 : i32
    %c0_i32_0 = arith.constant 0 : i32
    %c0_i32_1 = arith.constant 0 : i32
    return %c0_i32, %c0_i32_0 : i32, i32
  }
}

module attributes {stable_mosaic.version = 11 : i64} {
  func.func @_mm_bias_act_kernel(%arg0: i32, %arg1: memref<16x384xbf16, #tpu.memory_space<vmem>>, %arg2: memref<384x128xbf16, #tpu.memory_space<vmem>>, %arg3: memref<1x128xf32, #tpu.memory_space<vmem>>, %arg4: memref<16x128xf32, #tpu.memory_space<vmem>>) attributes {dimension_semantics = [#tpu.dimension_semantics<parallel>], iteration_bounds = array<i64: 2>, scalar_prefetch = 0 : i64, scratch_operands = 0 : i64, tpu.core_type = #tpu.core_type<tc>, window_params = [{transform_indices = @transform_0, window_bounds = array<i64: 16, 384>}, {pipeline_mode = #tpu.pipeline_mode<synchronous>, transform_indices = @transform_1, window_bounds = array<i64: 384, 128>}, {pipeline_mode = #tpu.pipeline_mode<synchronous>, transform_indices = @transform_2, window_bounds = array<i64: 1, 128>}, {transform_indices = @transform_3, window_bounds = array<i64: 16, 128>}]} {
    %c0 = arith.constant 0 : index
    %c0_0 = arith.constant 0 : index
    %0 = vector.load %arg1[%c0, %c0_0] : memref<16x384xbf16, #tpu.memory_space<vmem>>, vector<16x384xbf16>
    %c0_1 = arith.constant 0 : index
    %c0_2 = arith.constant 0 : index
    %1 = vector.load %arg2[%c0_1, %c0_2] : memref<384x128xbf16, #tpu.memory_space<vmem>>, vector<384x128xbf16>
    %cst = arith.constant dense<0.000000e+00> : vector<16x128xf32>
    %2 = tpu.matmul %0, %1, %cst {dimension_numbers = #tpu.dot_dimension_numbers<[1], [0], [0], [1], [0, 0, 1, 1], [], []>} : vector<16x384xbf16>, vector<384x128xbf16>, vector<16x128xf32> -> vector<16x128xf32>
    %c0_3 = arith.constant 0 : index
    %c0_4 = arith.constant 0 : index
    %3 = vector.load %arg3[%c0_3, %c0_4] : memref<1x128xf32, #tpu.memory_space<vmem>>, vector<1x128xf32>
    %4 = vector.broadcast %3 : vector<1x128xf32> to vector<16x128xf32>
    %5 = arith.addf %2, %4 : vector<16x128xf32>
    %cst_5 = arith.constant 0.000000e+00 : f32
    %6 = vector.broadcast %cst_5 : f32 to vector<16x128xf32>
    %7 = arith.maximumf %5, %6 : vector<16x128xf32>
    %c0_6 = arith.constant 0 : index
    %c0_7 = arith.constant 0 : index
    %8 = vector.load %arg4[%c0_6, %c0_7] : memref<16x128xf32, #tpu.memory_space<vmem>>, vector<16x128xf32>
    tpu.vector_store %arg4[%c0_6, %c0_7], %7 {strides = array<i32>} : memref<16x128xf32, #tpu.memory_space<vmem>>, vector<16x128xf32>,
    return
  }
  func.func @transform_0(%arg0: i32) -> (i32, i32) {
    %c0_i32 = arith.constant 0 : i32
    %c0_i32_0 = arith.constant 0 : i32
    return %arg0, %c0_i32 : i32, i32
  }
  func.func @transform_1(%arg0: i32) -> (i32, i32) {
    %c0_i32 = arith.constant 0 : i32
    %c0_i32_0 = arith.constant 0 : i32
    %c0_i32_1 = arith.constant 0 : i32
    return %c0_i32, %c0_i32_0 : i32, i32
  }
  func.func @transform_2(%arg0: i32) -> (i32, i32) {
    %c0_i32 = arith.constant 0 : i32
    %c0_i32_0 = arith.constant 0 : i32
    %c0_i32_1 = arith.constant 0 : i32
    return %c0_i32, %c0_i32_0 : i32, i32
  }
  func.func @transform_3(%arg0: i32) -> (i32, i32) {
    %c0_i32 = arith.constant 0 : i32
    %c0_i32_0 = arith.constant 0 : i32
    return %arg0, %c0_i32 : i32, i32
  }
}

module attributes {stable_mosaic.version = 11 : i64} {
  func.func @_mm_bias_act_kernel(%arg0: i32, %arg1: memref<64x384xbf16, #tpu.memory_space<vmem>>, %arg2: memref<384x128xbf16, #tpu.memory_space<vmem>>, %arg3: memref<1x128xf32, #tpu.memory_space<vmem>>, %arg4: memref<64x128xf32, #tpu.memory_space<vmem>>) attributes {dimension_semantics = [#tpu.dimension_semantics<parallel>], iteration_bounds = array<i64: 2>, scalar_prefetch = 0 : i64, scratch_operands = 0 : i64, tpu.core_type = #tpu.core_type<tc>, window_params = [{transform_indices = @transform_0, window_bounds = array<i64: 64, 384>}, {pipeline_mode = #tpu.pipeline_mode<synchronous>, transform_indices = @transform_1, window_bounds = array<i64: 384, 128>}, {pipeline_mode = #tpu.pipeline_mode<synchronous>, transform_indices = @transform_2, window_bounds = array<i64: 1, 128>}, {transform_indices = @transform_3, window_bounds = array<i64: 64, 128>}]} {
    %c0 = arith.constant 0 : index
    %c0_0 = arith.constant 0 : index
    %0 = vector.load %arg1[%c0, %c0_0] : memref<64x384xbf16, #tpu.memory_space<vmem>>, vector<64x384xbf16>
    %c0_1 = arith.constant 0 : index
    %c0_2 = arith.constant 0 : index
    %1 = vector.load %arg2[%c0_1, %c0_2] : memref<384x128xbf16, #tpu.memory_space<vmem>>, vector<384x128xbf16>
    %cst = arith.constant dense<0.000000e+00> : vector<64x128xf32>
    %2 = tpu.matmul %0, %1, %cst {dimension_numbers = #tpu.dot_dimension_numbers<[1], [0], [0], [1], [0, 0, 1, 1], [], []>} : vector<64x384xbf16>, vector<384x128xbf16>, vector<64x128xf32> -> vector<64x128xf32>
    %c0_3 = arith.constant 0 : index
    %c0_4 = arith.constant 0 : index
    %3 = vector.load %arg3[%c0_3, %c0_4] : memref<1x128xf32, #tpu.memory_space<vmem>>, vector<1x128xf32>
    %4 = vector.broadcast %3 : vector<1x128xf32> to vector<64x128xf32>
    %5 = arith.addf %2, %4 : vector<64x128xf32>
    %6 = math.tanh %5 : vector<64x128xf32>
    %c0_5 = arith.constant 0 : index
    %c0_6 = arith.constant 0 : index
    %7 = vector.load %arg4[%c0_5, %c0_6] : memref<64x128xf32, #tpu.memory_space<vmem>>, vector<64x128xf32>
    tpu.vector_store %arg4[%c0_5, %c0_6], %6 {strides = array<i32>} : memref<64x128xf32, #tpu.memory_space<vmem>>, vector<64x128xf32>,
    return
  }
  func.func @transform_0(%arg0: i32) -> (i32, i32) {
    %c0_i32 = arith.constant 0 : i32
    %c0_i32_0 = arith.constant 0 : i32
    return %arg0, %c0_i32 : i32, i32
  }
  func.func @transform_1(%arg0: i32) -> (i32, i32) {
    %c0_i32 = arith.constant 0 : i32
    %c0_i32_0 = arith.constant 0 : i32
    %c0_i32_1 = arith.constant 0 : i32
    return %c0_i32, %c0_i32_0 : i32, i32
  }
  func.func @transform_2(%arg0: i32) -> (i32, i32) {
    %c0_i32 = arith.constant 0 : i32
    %c0_i32_0 = arith.constant 0 : i32
    %c0_i32_1 = arith.constant 0 : i32
    return %c0_i32, %c0_i32_0 : i32, i32
  }
  func.func @transform_3(%arg0: i32) -> (i32, i32) {
    %c0_i32 = arith.constant 0 : i32
    %c0_i32_0 = arith.constant 0 : i32
    return %arg0, %c0_i32 : i32, i32
  }
}

module attributes {stable_mosaic.version = 11 : i64} {
  func.func @_pixelcnn_kernel(%arg0: i32, %arg1: memref<2x128xbf16, #tpu.memory_space<vmem>>, %arg2: memref<128x512xbf16, #tpu.memory_space<vmem>>, %arg3: memref<1x512xf32, #tpu.memory_space<vmem>>, %arg4: memref<2x512x512xbf16, #tpu.memory_space<vmem>>, %arg5: memref<2x1x512xf32, #tpu.memory_space<vmem>>, %arg6: memref<512x1024xbf16, #tpu.memory_space<vmem>>, %arg7: memref<1x1024xf32, #tpu.memory_space<vmem>>, %arg8: memref<2x1024xf32, #tpu.memory_space<vmem>>) attributes {dimension_semantics = [#tpu.dimension_semantics<arbitrary>], iteration_bounds = array<i64: 1>, scalar_prefetch = 0 : i64, scratch_operands = 0 : i64, tpu.core_type = #tpu.core_type<tc>, window_params = [{pipeline_mode = #tpu.pipeline_mode<synchronous>, transform_indices = @transform_0, window_bounds = array<i64: 2, 128>}, {pipeline_mode = #tpu.pipeline_mode<synchronous>, transform_indices = @transform_1, window_bounds = array<i64: 128, 512>}, {pipeline_mode = #tpu.pipeline_mode<synchronous>, transform_indices = @transform_2, window_bounds = array<i64: 1, 512>}, {pipeline_mode = #tpu.pipeline_mode<synchronous>, transform_indices = @transform_3, window_bounds = array<i64: 2, 512, 512>}, {pipeline_mode = #tpu.pipeline_mode<synchronous>, transform_indices = @transform_4, window_bounds = array<i64: 2, 1, 512>}, {pipeline_mode = #tpu.pipeline_mode<synchronous>, transform_indices = @transform_5, window_bounds = array<i64: 512, 1024>}, {pipeline_mode = #tpu.pipeline_mode<synchronous>, transform_indices = @transform_6, window_bounds = array<i64: 1, 1024>}, {pipeline_mode = #tpu.pipeline_mode<synchronous>, transform_indices = @transform_7, window_bounds = array<i64: 2, 1024>}]} {
    %c0 = arith.constant 0 : index
    %c0_0 = arith.constant 0 : index
    %0 = vector.load %arg1[%c0, %c0_0] : memref<2x128xbf16, #tpu.memory_space<vmem>>, vector<2x128xbf16>
    %c0_1 = arith.constant 0 : index
    %c0_2 = arith.constant 0 : index
    %1 = vector.load %arg2[%c0_1, %c0_2] : memref<128x512xbf16, #tpu.memory_space<vmem>>, vector<128x512xbf16>
    %cst = arith.constant dense<0.000000e+00> : vector<2x512xf32>
    %2 = tpu.matmul %0, %1, %cst {dimension_numbers = #tpu.dot_dimension_numbers<[1], [0], [0], [1], [0, 0, 1, 1], [], []>} : vector<2x128xbf16>, vector<128x512xbf16>, vector<2x512xf32> -> vector<2x512xf32>
    %c0_3 = arith.constant 0 : index
    %c0_4 = arith.constant 0 : index
    %3 = vector.load %arg3[%c0_3, %c0_4] : memref<1x512xf32, #tpu.memory_space<vmem>>, vector<1x512xf32>
    %4 = vector.broadcast %3 : vector<1x512xf32> to vector<2x512xf32>
    %5 = arith.addf %2, %4 : vector<2x512xf32>
    %cst_5 = arith.constant 0.000000e+00 : f32
    %6 = vector.broadcast %cst_5 : f32 to vector<2x512xf32>
    %7 = arith.maximumf %5, %6 : vector<2x512xf32>
    %8 = arith.truncf %7 : vector<2x512xf32> to vector<2x512xbf16>
    %c0_6 = arith.constant 0 : index
    %c0_7 = arith.constant 0 : index
    %c0_8 = arith.constant 0 : index
    %9 = vector.load %arg4[%c0_6, %c0_7, %c0_8] : memref<2x512x512xbf16, #tpu.memory_space<vmem>>, vector<1x512x512xbf16>
    %10 = vector.shape_cast %9 : vector<1x512x512xbf16> to vector<512x512xbf16>
    %cst_9 = arith.constant dense<0.000000e+00> : vector<2x512xf32>
    %11 = tpu.matmul %8, %10, %cst_9 {dimension_numbers = #tpu.dot_dimension_numbers<[1], [0], [0], [1], [0, 0, 1, 1], [], []>} : vector<2x512xbf16>, vector<512x512xbf16>, vector<2x512xf32> -> vector<2x512xf32>
    %c0_10 = arith.constant 0 : index
    %c0_11 = arith.constant 0 : index
    %c0_12 = arith.constant 0 : index
    %12 = vector.load %arg5[%c0_10, %c0_11, %c0_12] : memref<2x1x512xf32, #tpu.memory_space<vmem>>, vector<1x1x512xf32>
    %13 = vector.shape_cast %12 : vector<1x1x512xf32> to vector<1x512xf32>
    %14 = vector.broadcast %13 : vector<1x512xf32> to vector<2x512xf32>
    %15 = arith.addf %11, %14 : vector<2x512xf32>
    %cst_13 = arith.constant 0.000000e+00 : f32
    %16 = vector.broadcast %cst_13 : f32 to vector<2x512xf32>
    %17 = arith.maximumf %15, %16 : vector<2x512xf32>
    %18 = arith.truncf %17 : vector<2x512xf32> to vector<2x512xbf16>
    %c1 = arith.constant 1 : index
    %c0_14 = arith.constant 0 : index
    %c0_15 = arith.constant 0 : index
    %19 = vector.load %arg4[%c1, %c0_14, %c0_15] : memref<2x512x512xbf16, #tpu.memory_space<vmem>>, vector<1x512x512xbf16>
    %20 = vector.shape_cast %19 : vector<1x512x512xbf16> to vector<512x512xbf16>
    %cst_16 = arith.constant dense<0.000000e+00> : vector<2x512xf32>
    %21 = tpu.matmul %18, %20, %cst_16 {dimension_numbers = #tpu.dot_dimension_numbers<[1], [0], [0], [1], [0, 0, 1, 1], [], []>} : vector<2x512xbf16>, vector<512x512xbf16>, vector<2x512xf32> -> vector<2x512xf32>
    %c1_17 = arith.constant 1 : index
    %c0_18 = arith.constant 0 : index
    %c0_19 = arith.constant 0 : index
    %22 = vector.load %arg5[%c1_17, %c0_18, %c0_19] : memref<2x1x512xf32, #tpu.memory_space<vmem>>, vector<1x1x512xf32>
    %23 = vector.shape_cast %22 : vector<1x1x512xf32> to vector<1x512xf32>
    %24 = vector.broadcast %23 : vector<1x512xf32> to vector<2x512xf32>
    %25 = arith.addf %21, %24 : vector<2x512xf32>
    %cst_20 = arith.constant 0.000000e+00 : f32
    %26 = vector.broadcast %cst_20 : f32 to vector<2x512xf32>
    %27 = arith.maximumf %25, %26 : vector<2x512xf32>
    %28 = arith.truncf %27 : vector<2x512xf32> to vector<2x512xbf16>
    %c0_21 = arith.constant 0 : index
    %c0_22 = arith.constant 0 : index
    %29 = vector.load %arg6[%c0_21, %c0_22] : memref<512x1024xbf16, #tpu.memory_space<vmem>>, vector<512x1024xbf16>
    %cst_23 = arith.constant dense<0.000000e+00> : vector<2x1024xf32>
    %30 = tpu.matmul %28, %29, %cst_23 {dimension_numbers = #tpu.dot_dimension_numbers<[1], [0], [0], [1], [0, 0, 1, 1], [], []>} : vector<2x512xbf16>, vector<512x1024xbf16>, vector<2x1024xf32> -> vector<2x1024xf32>
    %c0_24 = arith.constant 0 : index
    %c0_25 = arith.constant 0 : index
    %31 = vector.load %arg7[%c0_24, %c0_25] : memref<1x1024xf32, #tpu.memory_space<vmem>>, vector<1x1024xf32>
    %32 = vector.broadcast %31 : vector<1x1024xf32> to vector<2x1024xf32>
    %33 = arith.addf %30, %32 : vector<2x1024xf32>
    %c0_26 = arith.constant 0 : index
    %c0_27 = arith.constant 0 : index
    %34 = vector.load %arg8[%c0_26, %c0_27] : memref<2x1024xf32, #tpu.memory_space<vmem>>, vector<2x1024xf32>
    tpu.vector_store %arg8[%c0_26, %c0_27], %33 {strides = array<i32>} : memref<2x1024xf32, #tpu.memory_space<vmem>>, vector<2x1024xf32>,
    return
  }
  func.func @transform_0(%arg0: i32) -> (i32, i32) {
    %c0_i32 = arith.constant 0 : i32
    %c0_i32_0 = arith.constant 0 : i32
    %c0_i32_1 = arith.constant 0 : i32
    return %c0_i32, %c0_i32_0 : i32, i32
  }
  func.func @transform_1(%arg0: i32) -> (i32, i32) {
    %c0_i32 = arith.constant 0 : i32
    %c0_i32_0 = arith.constant 0 : i32
    %c0_i32_1 = arith.constant 0 : i32
    return %c0_i32, %c0_i32_0 : i32, i32
  }
  func.func @transform_2(%arg0: i32) -> (i32, i32) {
    %c0_i32 = arith.constant 0 : i32
    %c0_i32_0 = arith.constant 0 : i32
    %c0_i32_1 = arith.constant 0 : i32
    return %c0_i32, %c0_i32_0 : i32, i32
  }
  func.func @transform_3(%arg0: i32) -> (i32, i32, i32) {
    %c0_i32 = arith.constant 0 : i32
    %c0_i32_0 = arith.constant 0 : i32
    %c0_i32_1 = arith.constant 0 : i32
    %c0_i32_2 = arith.constant 0 : i32
    return %c0_i32, %c0_i32_0, %c0_i32_1 : i32, i32, i32
  }
  func.func @transform_4(%arg0: i32) -> (i32, i32, i32) {
    %c0_i32 = arith.constant 0 : i32
    %c0_i32_0 = arith.constant 0 : i32
    %c0_i32_1 = arith.constant 0 : i32
    %c0_i32_2 = arith.constant 0 : i32
    return %c0_i32, %c0_i32_0, %c0_i32_1 : i32, i32, i32
  }
  func.func @transform_5(%arg0: i32) -> (i32, i32) {
    %c0_i32 = arith.constant 0 : i32
    %c0_i32_0 = arith.constant 0 : i32
    %c0_i32_1 = arith.constant 0 : i32
    return %c0_i32, %c0_i32_0 : i32, i32
  }
  func.func @transform_6(%arg0: i32) -> (i32, i32) {
    %c0_i32 = arith.constant 0 : i32
    %c0_i32_0 = arith.constant 0 : i32
    %c0_i32_1 = arith.constant 0 : i32
    return %c0_i32, %c0_i32_0 : i32, i32
  }
  func.func @transform_7(%arg0: i32) -> (i32, i32) {
    %c0_i32 = arith.constant 0 : i32
    %c0_i32_0 = arith.constant 0 : i32
    %c0_i32_1 = arith.constant 0 : i32
    return %c0_i32, %c0_i32_0 : i32, i32
  }
}

</mosaic_0001>

<bundles_post_ra>
// kernel: vqvae_pixelcnn_forward.6
= control target key start
LH: loop header
LB: loop body
LE: loop exit
PB: predicated region body
PF: predicated region fallthrough
CT: control target
= control target key end

     0   :  { %s539_s12 = smov 0   ;;  %s593_s0 = inlined_call_operand.vmem [shape: bf16[128,128], index: 0, kind: input, shape index: {}]   ;;  %s594_s1 = inlined_call_operand.vmem [shape: bf16[128,128], index: 1, kind: input, shape index: {}]   ;;  %s595_s2 = inlined_call_operand.vmem [shape: f32[1,128], index: 2, kind: input, shape index: {}]   ;;  %s596_s3 = inlined_call_operand.vmem [shape: f32[128,128], index: 3, kind: output, shape index: {}]  }
   0x1 LB: > { %s415_s13 = sadd.s32 4294967295, %s517_s12   ;;  %p419_p0 = scmp.ge.s32.totalorder %s517_s12, 1  ;;  %s517_s12 = sphi %s539_s12, %s13_s12  }
   0x2   : > { %p138_p1 = scmp.lt.s32.totalorder %s517_s12, 3 }
   0x4   : > { %p139_p2 = pnand %p419_p0, %p138_p1 }
   0x5   : > { %v499_v0 = vld [vmem:[%s594_s1] sm:$0xff] (!%p139_p2)   ;;  %s420_s16 = sshll.u32 (!%p139_p2), %s415_s13, 3  ;;  %v500_v1 = vld [vmem:[%s594_s1 + $0x8] sm:$0xff] (!%p139_p2)   ;;  %v501_v2 = vld [vmem:[%s594_s1 + $0x10] sm:$0xff] (!%p139_p2)  }
   0x6   : > { %142 = sbr.rel (%p139_p2) target bundleno = 258 (0x102), region = 32  ;;  %p163_p3 = scmp.lt.s32.totalorder (!%p139_p2), %s420_s16, 15  ;;  %451 = vmatprep.subr.bf16.mxu0 (!%p139_p2), %v499_v0  ;;  %475 = vmatprep.subr.bf16.mxu1 (!%p139_p2), %v499_v0  ;;  %v502_v3 = vld [vmem:[%s594_s1 + $0x18] sm:$0xff] (!%p139_p2)   ;;  %v503_v6 = vld [vmem:[%s594_s1 + $0x20] sm:$0xff] (!%p139_p2)   ;;  %v504_v7 = vld [vmem:[%s594_s1 + $0x28] sm:$0xff] (!%p139_p2)  }
   0x7   : > { %452 = vmatpush3.bf16.msra.mxu0 (!%p139_p2), %v499_v0  ;;  %483 = vmatpush3.bf16.msra.mxu1 (!%p139_p2), %v499_v0  ;;  %v505_v8 = vld [vmem:[%s594_s1 + $0x30] sm:$0xff] (!%p139_p2)   ;;  %v506_v9 = vld [vmem:[%s594_s1 + $0x38] sm:$0xff] (!%p139_p2)   ;;  %v424_v12 = vld [vmem:[%s595_s2] ss:$0 sm:$0xff] (!%p139_p2) }
   0x8   : > { %453 = vmatprep.subr.bf16.mxu0 (!%p139_p2), %v500_v1  ;;  %476 = vmatprep.subr.bf16.mxu1 (!%p139_p2), %v500_v1 }
   0xb   : > { %454 = vmatpush3.bf16.msra.mxu0 (!%p139_p2), %v500_v1  ;;  %484 = vmatpush3.bf16.msra.mxu1 (!%p139_p2), %v500_v1 }
   0xc   : > { %455 = vmatprep.subr.bf16.mxu0 (!%p139_p2), %v501_v2  ;;  %477 = vmatprep.subr.bf16.mxu1 (!%p139_p2), %v501_v2 }
   0xd   : > { %s598_s16 = smov (!%p163_p3, %s420_s16), 15 }
   0xe   : > { %s421_s21 = sshll.u32 %s598_s16, 2  ;;  %s423_s10 = sshll.u32 %s598_s16, 3 }
   0xf   : > { %s562_s24 = scalar_lea.vmem %s593_s0, %s421_s21  ;;  %456 = vmatpush3.bf16.msra.mxu0 %v501_v2  ;;  %485 = vmatpush3.bf16.msra.mxu1 %v501_v2  ;;  %s172_s14 = scalar_lea.vmem %s596_s3, %s423_s10 }
  0x10   : > { %v507_v4 = vld [vmem:[%s562_s24] sm:$0xff]   ;;  %v508_v5 = vld [vmem:[%s562_s24 + $0x10] sm:$0xff]   ;;  %457 = vmatprep.subr.bf16.mxu0 %v502_v3  ;;  %478 = vmatprep.subr.bf16.mxu1 %v502_v3  ;;  %v509_v10 = vld [vmem:[%s562_s24 + $0x8] sm:$0xff]  }
  0x11   : > { %467 = vmatprep.mubr.bf16.mxu0 %v507_v4  ;;  %471 = vmatprep.mubr.bf16.mxu1 %v508_v5  ;;  %v510_v11 = vld [vmem:[%s562_s24 + $0x18] sm:$0xff]  }
  0x13   : > { %458 = vmatpush3.bf16.msra.mxu0 %v502_v3  ;;  %486 = vmatpush3.bf16.msra.mxu1 %v502_v3 }
  0x14   : > { %459 = vmatprep.subr.bf16.mxu0 %v503_v6  ;;  %479 = vmatprep.subr.bf16.mxu1 %v503_v6 }
  0x17   : > { %460 = vmatpush3.bf16.msra.mxu0 %v503_v6  ;;  %487 = vmatpush3.bf16.msra.mxu1 %v503_v6 }
  0x18   : > { %461 = vmatprep.subr.bf16.mxu0 %v504_v7  ;;  %480 = vmatprep.subr.bf16.mxu1 %v504_v7 }
  0x1b   : > { %462 = vmatpush3.bf16.msra.mxu0 %v504_v7  ;;  %488 = vmatpush3.bf16.msra.mxu1 %v504_v7 }
  0x1c   : > { %463 = vmatprep.subr.bf16.mxu0 %v505_v8  ;;  %481 = vmatprep.subr.bf16.mxu1 %v505_v8 }
  0x1f   : > { %464 = vmatpush3.bf16.msra.mxu0 %v505_v8  ;;  %489 = vmatpush3.bf16.msra.mxu1 %v505_v8 }
  0x20   : > { %465 = vmatprep.subr.bf16.mxu0 %v506_v9  ;;  %482 = vmatprep.subr.bf16.mxu1 %v506_v9 }
  0x23   : > { %466 = vmatpush3.bf16.msra.mxu0 %v506_v9  ;;  %490 = vmatpush3.bf16.msra.mxu1 %v506_v9 }
  0x26   : > { %468 = vmatmul.mubr.bf16.vlgmr.msra.gmra.mrb[0].mxu0 %v509_v10  ;;  %472 = vmatmul.mubr.bf16.vlgmr.msra.gmra.mrb[0].mxu1 %v510_v11 }
  0xf9   : > { %v469_v13 = vpop.f32.mrb[0].mxu0  ;;  %v473_v14 = vpop.f32.mrb[0].mxu1 }
  0xfa   : > { %v321_v15 = vadd.f32 %v469_v13, %v424_v12  ;;  %v337_v16 = vadd.f32 %v473_v14, %v424_v12  ;;  %v312_v17 = vpop.f32.mrb[1].mxu0  ;;  %v328_v18 = vpop.f32.mrb[1].mxu1 }
  0xfb   : > { %v313_v19 = vadd.f32 %v424_v12, %v312_v17  ;;  %v329_v20 = vadd.f32 %v424_v12, %v328_v18  ;;  %v470_v21 = vpop.f32.mrb[2].mxu0  ;;  %v474_v22 = vpop.f32.mrb[2].mxu1 }
  0xfc   : > { %v345_v23 = vmax.f32 %v321_v15, 0.0  ;;  %v349_v24 = vmax.f32 %v337_v16, 0.0  ;;  %v324_v25 = vadd.f32 %v470_v21, %v424_v12  ;;  %v340_v26 = vadd.f32 %v474_v22, %v424_v12  ;;  %v315_v27 = vpop.f32.mrb[3].mxu0  ;;  %v331_v28 = vpop.f32.mrb[3].mxu1 }
  0xfd   : > { %v343_v29 = vmax.f32 %v313_v19, 0.0  ;;  %v347_v30 = vmax.f32 %v329_v20, 0.0  ;;  %v316_v31 = vadd.f32 %v424_v12, %v315_v27  ;;  %v332_v32 = vadd.f32 %v424_v12, %v331_v28 }
  0xfe   : > { %353 = vst [vmem:[%s172_s14 + $0x10] sm:$0xff] %v345_v23  ;;  %357 = vst [vmem:[%s172_s14 + $0x30] sm:$0xff] %v349_v24  ;;  %v346_v33 = vmax.f32 %v324_v25, 0.0  ;;  %v350_v34 = vmax.f32 %v340_v26, 0.0 }
  0xff   : > { %351 = vst [vmem:[%s172_s14] sm:$0xff] %v343_v29  ;;  %355 = vst [vmem:[%s172_s14 + $0x20] sm:$0xff] %v347_v30  ;;  %v344_v35 = vmax.f32 %v316_v31, 0.0  ;;  %v348_v36 = vmax.f32 %v332_v32, 0.0 }
 0x100   : > { %354 = vst [vmem:[%s172_s14 + $0x18] sm:$0xff] %v346_v33  ;;  %358 = vst [vmem:[%s172_s14 + $0x38] sm:$0xff] %v350_v34 }
 0x101   : > { %352 = vst [vmem:[%s172_s14 + $0x8] sm:$0xff] %v344_v35  ;;  %356 = vst [vmem:[%s172_s14 + $0x28] sm:$0xff] %v348_v36 }
 0x102 PF: > { %s13_s12 = sadd.s32 1, %s517_s12  }
 0x103   : > { %p10_p4 = scmp.ge.s32.totalorder %s13_s12, 4  }
 0x105   :  { %12 = sbr.rel (!%p10_p4) target bundleno = 1 (0x1), region = 62 }

// kernel: vqvae_pixelcnn_forward.7
= control target key start
LH: loop header
LB: loop body
LE: loop exit
PB: predicated region body
PF: predicated region fallthrough
CT: control target
= control target key end

     0   :  { %s773_s12 = smov 0   ;;  %s895_s0 = inlined_call_operand.vmem [shape: bf16[32,512], index: 0, kind: input, shape index: {}]   ;;  %s896_s1 = inlined_call_operand.vmem [shape: bf16[512,128], index: 1, kind: input, shape index: {}]   ;;  %s897_s2 = inlined_call_operand.vmem [shape: f32[1,128], index: 2, kind: input, shape index: {}]   ;;  %s898_s3 = inlined_call_operand.vmem [shape: f32[32,128], index: 3, kind: output, shape index: {}]  }
   0x1 LB: > { %s605_s13 = sadd.s32 4294967295, %s751_s12   ;;  %p609_p0 = scmp.ge.s32.totalorder %s751_s12, 1  ;;  %s751_s12 = sphi %s773_s12, %s13_s12  }
   0x2   : > { %p139_p1 = scmp.lt.s32.totalorder %s751_s12, 3 }
   0x4   : > { %p140_p2 = pnand %p609_p0, %p139_p1 }
   0x5   : > { %v707_v0 = vld [vmem:[%s896_s1 + $0x40] sm:$0xff] (!%p140_p2)   ;;  %v711_v4 = vld [vmem:[%s896_s1 + $0x48] sm:$0xff] (!%p140_p2)   ;;  %v715_v8 = vld [vmem:[%s896_s1 + $0x50] sm:$0xff] (!%p140_p2)   ;;  %s610_s21 = sshll.u32 (!%p140_p2), %s605_s13, 1 }
   0x6   : > { %143 = sbr.rel (%p140_p2) target bundleno = 261 (0x105), region = 32  ;;  %v708_v1 = vld [vmem:[%s896_s1 + $0xc0] sm:$0xff] (!%p140_p2)   ;;  %655 = vmatprep.subr.bf16.mxu0 (!%p140_p2), %v707_v0  ;;  %v712_v5 = vld [vmem:[%s896_s1 + $0xc8] sm:$0xff] (!%p140_p2)   ;;  %v716_v9 = vld [vmem:[%s896_s1 + $0xd0] sm:$0xff] (!%p140_p2)   ;;  %p165_p3 = scmp.lt.s32.totalorder (!%p140_p2), %s610_s21, 3 }
   0x7   : > { %v709_v2 = vld [vmem:[%s896_s1] sm:$0xff] (!%p140_p2)   ;;  %677 = vmatprep.subr.bf16.mxu1 (!%p140_p2), %v708_v1  ;;  %v713_v6 = vld [vmem:[%s896_s1 + $0x8] sm:$0xff] (!%p140_p2)   ;;  %v717_v10 = vld [vmem:[%s896_s1 + $0x10] sm:$0xff] (!%p140_p2)  }
   0x8   : > { %v710_v3 = vld [vmem:[%s896_s1 + $0x80] sm:$0xff] (!%p140_p2)   ;;  %656 = vmatpush3.bf16.msra.mxu0 (!%p140_p2), %v709_v2  ;;  %v714_v7 = vld [vmem:[%s896_s1 + $0x88] sm:$0xff] (!%p140_p2)   ;;  %v718_v11 = vld [vmem:[%s896_s1 + $0x90] sm:$0xff] (!%p140_p2)  }
   0x9   : > { %678 = vmatpush3.bf16.msra.mxu1 (!%p140_p2), %v710_v3  ;;  %657 = vmatprep.subr.bf16.mxu0 (!%p140_p2), %v711_v4  ;;  %v719_v12 = vld [vmem:[%s896_s1 + $0x58] sm:$0xff] (!%p140_p2)   ;;  %v723_v16 = vld [vmem:[%s896_s1 + $0x60] sm:$0xff] (!%p140_p2)   ;;  %v727_v20 = vld [vmem:[%s896_s1 + $0x68] sm:$0xff] (!%p140_p2)  }
   0xa   : > { %679 = vmatprep.subr.bf16.mxu1 (!%p140_p2), %v712_v5  ;;  %v720_v13 = vld [vmem:[%s896_s1 + $0xd8] sm:$0xff] (!%p140_p2)   ;;  %v724_v17 = vld [vmem:[%s896_s1 + $0xe0] sm:$0xff] (!%p140_p2)   ;;  %v728_v21 = vld [vmem:[%s896_s1 + $0xe8] sm:$0xff] (!%p140_p2)  }
   0xb   : > { %v721_v14 = vld [vmem:[%s896_s1 + $0x18] sm:$0xff] (!%p140_p2)   ;;  %v725_v18 = vld [vmem:[%s896_s1 + $0x20] sm:$0xff] (!%p140_p2)   ;;  %v729_v22 = vld [vmem:[%s896_s1 + $0x28] sm:$0xff] (!%p140_p2)  }
   0xc   : > { %658 = vmatpush3.bf16.msra.mxu0 (!%p140_p2), %v713_v6  ;;  %v722_v15 = vld [vmem:[%s896_s1 + $0x98] sm:$0xff] (!%p140_p2)   ;;  %v726_v19 = vld [vmem:[%s896_s1 + $0xa0] sm:$0xff] (!%p140_p2)   ;;  %v730_v23 = vld [vmem:[%s896_s1 + $0xa8] sm:$0xff] (!%p140_p2)  }
   0xd   : > { %680 = vmatpush3.bf16.msra.mxu1 %v714_v7  ;;  %659 = vmatprep.subr.bf16.mxu0 %v715_v8  ;;  %s900_s21 = smov (!%p165_p3, %s610_s21), 3  ;;  %v731_v24 = vld [vmem:[%s896_s1 + $0x70] sm:$0xff]   ;;  %v735_v28 = vld [vmem:[%s896_s1 + $0x78] sm:$0xff]   ;;  %v615_v38 = vld [vmem:[%s897_s2] ss:$0 sm:$0xff] }
   0xe   : > { %681 = vmatprep.subr.bf16.mxu1 %v716_v9  ;;  %v732_v25 = vld [vmem:[%s896_s1 + $0xf0] sm:$0xff]   ;;  %s654_s18 = sshll.u32 %s900_s21, 4  ;;  %v736_v29 = vld [vmem:[%s896_s1 + $0xf8] sm:$0xff]   ;;  %s614_s7 = sshll.u32 %s900_s21, 3 }
   0xf   : > { %v733_v26 = vld [vmem:[%s896_s1 + $0x30] sm:$0xff]   ;;  %s169_s28 = scalar_lea.vmem %s895_s0, %s654_s18  ;;  %v737_v30 = vld [vmem:[%s896_s1 + $0x38] sm:$0xff]   ;;  %s175_s10 = scalar_lea.vmem %s898_s3, %s614_s7 }
  0x10   : > { %660 = vmatpush3.bf16.msra.mxu0 %v717_v10  ;;  %v734_v27 = vld [vmem:[%s896_s1 + $0xb0] sm:$0xff]   ;;  %v738_v31 = vld [vmem:[%s896_s1 + $0xb8] sm:$0xff]  }
  0x11   : > { %682 = vmatpush3.bf16.msra.mxu1 %v718_v11  ;;  %661 = vmatprep.subr.bf16.mxu0 %v719_v12  ;;  %v739_v32 = vld [vmem:[%s169_s28] ss:$16 sps:$4 sm:$0xff]   ;;  %v741_v33 = vld [vmem:[%s169_s28 + $0x4] ss:$16 sps:$4 sm:$0xff]   ;;  %v742_v34 = vld [vmem:[%s169_s28 + $0x8] ss:$16 sps:$4 sm:$0xff]  }
  0x12   : > { %683 = vmatprep.subr.bf16.mxu1 %v720_v13  ;;  %v744_v35 = vld [vmem:[%s169_s28 + $0xc] ss:$16 sps:$4 sm:$0xff]   ;;  %497 = vmatprep.mubr.bf16.mxu0 %v741_v33 }
  0x13   : > { %538 = vmatprep.mubr.bf16.mxu1 %v744_v35 }
  0x14   : > { %662 = vmatpush3.bf16.msra.mxu0 %v721_v14 }
  0x15   : > { %684 = vmatpush3.bf16.msra.mxu1 %v722_v15  ;;  %663 = vmatprep.subr.bf16.mxu0 %v723_v16 }
  0x16   : > { %685 = vmatprep.subr.bf16.mxu1 %v724_v17 }
  0x18   : > { %664 = vmatpush3.bf16.msra.mxu0 %v725_v18 }
  0x19   : > { %686 = vmatpush3.bf16.msra.mxu1 %v726_v19  ;;  %665 = vmatprep.subr.bf16.mxu0 %v727_v20 }
  0x1a   : > { %687 = vmatprep.subr.bf16.mxu1 %v728_v21 }
  0x1c   : > { %666 = vmatpush3.bf16.msra.mxu0 %v729_v22 }
  0x1d   : > { %688 = vmatpush3.bf16.msra.mxu1 %v730_v23  ;;  %667 = vmatprep.subr.bf16.mxu0 %v731_v24 }
  0x1e   : > { %689 = vmatprep.subr.bf16.mxu1 %v732_v25 }
  0x20   : > { %668 = vmatpush3.bf16.msra.mxu0 %v733_v26 }
  0x21   : > { %690 = vmatpush3.bf16.msra.mxu1 %v734_v27  ;;  %669 = vmatprep.subr.bf16.mxu0 %v735_v28 }
  0x22   : > { %691 = vmatprep.subr.bf16.mxu1 %v736_v29 }
  0x24   : > { %670 = vmatpush3.bf16.msra.mxu0 %v737_v30 }
  0x25   : > { %692 = vmatpush3.bf16.msra.mxu1 %v738_v31 }
  0x27   : > { %498 = vmatmul.mubr.bf16.vlgmr.msra.gmra.mrb[0].mxu0 %v739_v32 }
  0x28   : > { %539 = vmatmul.mubr.bf16.vlgmr.msra.gmra.mrb[0].mxu1 %v742_v34 }
  0xfa   : > { %v671_v36 = vpop.f32.mrb[0].mxu0 }
  0xfb   : > { %v693_v37 = vpop.f32.mrb[0].mxu1  ;;  %v672_v39 = vpop.f32.mrb[1].mxu0 }
  0xfc   : > { %v673_v40 = vadd.f32 %v672_v39, %v671_v36  ;;  %v694_v41 = vpop.f32.mrb[1].mxu1  ;;  %v674_v42 = vpop.f32.mrb[2].mxu0 }
  0xfd   : > { %v695_v43 = vadd.f32 %v694_v41, %v693_v37  ;;  %v696_v44 = vpop.f32.mrb[2].mxu1  ;;  %v675_v45 = vpop.f32.mrb[3].mxu0 }
  0xfe   : > { %v500_v46 = vadd.f32 %v673_v40, %v615_v38  ;;  %v676_v47 = vadd.f32 %v675_v45, %v674_v42  ;;  %v697_v48 = vpop.f32.mrb[3].mxu1 }
  0xff   : > { %v698_v49 = vadd.f32 %v697_v48, %v696_v44 }
 0x100   : > { %v541_v50 = vadd.f32 %v695_v43, %v500_v46  ;;  %v503_v51 = vadd.f32 %v676_v47, %v615_v38 }
 0x102   : > { %547 = vst [vmem:[%s175_s10] sm:$0xff] %v541_v50  ;;  %v544_v52 = vadd.f32 %v698_v49, %v503_v51 }
 0x104   : > { %548 = vst [vmem:[%s175_s10 + $0x8] sm:$0xff] %v544_v52 }
 0x105 PF: > { %s13_s12 = sadd.s32 1, %s751_s12  }
 0x106   : > { %p10_p4 = scmp.ge.s32.totalorder %s13_s12, 4  }
 0x108   :  { %12 = sbr.rel (!%p10_p4) target bundleno = 1 (0x1), region = 62 }

// kernel: vqvae_pixelcnn_forward.8
= control target key start
LH: loop header
LB: loop body
LE: loop exit
PB: predicated region body
PF: predicated region fallthrough
CT: control target
= control target key end

     0   :  { %v734_v4 = vmov 0.0|0.0   ;;  %vm735_vm0 = vmmov 0   ;;  %v736_v10 = vmov 0.0   ;;  %v737_v12 = vmov 0   ;;  %s950_s0 = inlined_call_operand.vmem [shape: f32[32,128], index: 0, kind: input, shape index: {}]   ;;  %s951_s1 = inlined_call_operand.vmem [shape: f32[64,128], index: 1, kind: input, shape index: {}]   ;;  %s952_s2 = inlined_call_operand.vmem [shape: f32[64,1], index: 2, kind: input, shape index: {}]   ;;  %s953_s3 = inlined_call_operand.vmem [shape: f32[32,128], index: 3, kind: output, shape index: {0}]   ;;  %s954_s4 = inlined_call_operand.vmem [shape: s32[1,32], index: 4, kind: output, shape index: {1}]   ;;  %s955_s5 = inlined_call_operand.hbm [shape: f32[1,1], index: 5, kind: output, shape index: {2}]  }
   0x1   :  { %v773_v0 = vld [vmem:[%s950_s0] sm:$0xff]  ;;  %v778_v1 = vld [vmem:[%s950_s0 + $0x8] sm:$0xff]  ;;  %v783_v2 = vld [vmem:[%s950_s0 + $0x10] sm:$0xff]  ;;  %662 = vmatprep.subr.bf16.mxu0 %v734_v4  ;;  %617 = vmatprep.mubr.msk.f32.mxu0 %vm735_vm0, %v736_v10 }
   0x2   :  { %v668_v3 = vpack.c.bf16 %v778_v1, %v773_v0  ;;  %v30_v5 = vmul.f32 %v773_v0, %v773_v0  ;;  %v31_v6 = vmul.f32 %v778_v1, %v778_v1  ;;  %v794_v7 = vld [vmem:[%s950_s0 + $0x18] sm:$0xff]  ;;  %v22_v8 = vld [vmem:[%s951_s1] sm:$0xff]  ;;  %709 = vset.pattern.permute.xlu1 %v737_v12  ;;  %v211_v13 = vld [vmem:[%s952_s2 + $0x10] sm:$0xff]  ;;  %v32_v15 = vmul.f32 %v783_v2, %v783_v2 }
   0x3   :  { %v672_v9 = vpack.c.bf16 %v794_v7, %v783_v2  ;;  %628 = vmatprep.mubr.f32.mxu1 %v22_v8  ;;  %v209_v14 = vld [vmem:[%s952_s2] sm:$0xff]  ;;  %v33_v16 = vmul.f32 %v794_v7, %v794_v7  ;;  %708 = vset.pattern.permute.xlu0 %v737_v12 }
   0x4   :  { %669 = vmatprep.subr.bf16.mxu1 %v668_v3  ;;  %v663_v11 = vpack.c.bf16 %v31_v6, %v30_v5 }
   0x5   :  { %671 = vmatpush3.bf16.xpose.msra.mxu1 %v668_v3 }
   0x6   :  { %664 = vmatpush3.bf16.xpose.msra.mxu0 %v663_v11  ;;  %673 = vmatprep.subr.bf16.mxu1 %v672_v9 }
   0x7   :  { %665 = vmatprep.subr.bf16.mxu0 %v734_v4 }
   0x8   :  { %11 = vsyncpa [#allocation3], 0  ;;  %237 = vperm.xlu1 %709, %v211_v13   ;;  %227 = vperm.xlu0 %708, %v209_v14   ;;  %v212_v17 = vld [vmem:[%s952_s2 + $0x18] sm:$0xff]  ;;  %v210_v18 = vld [vmem:[%s952_s2 + $0x8] sm:$0xff]  ;;  %v666_v19 = vpack.c.bf16 %v33_v16, %v32_v15  ;;  %v738_v29 = vmov 1.0   ;;  %v273_v36 = vlaneseq  ;;  %vm285_vm1 = vcmask 261120  }
   0x9   :  { %v23_v20 = vld [vmem:[%s951_s1 + $0x8] sm:$0xff]  ;;  %v213_v23 = vld [vmem:[%s952_s2 + $0x20] sm:$0xff]  ;;  %v216_v24 = vld [vmem:[%s952_s2 + $0x38] sm:$0xff]  ;;  %s739_s13 = smov [#allocation2]  }
   0xa   :  { %v676_v21 = vpack.c.bf16 %v23_v20, %v22_v8  ;;  %v214_v22 = vld [vmem:[%s952_s2 + $0x28] sm:$0xff]  ;;  %v24_v25 = vld [vmem:[%s951_s1 + $0x10] sm:$0xff]  ;;  %v25_v26 = vld [vmem:[%s951_s1 + $0x18] sm:$0xff]  ;;  %v851_v38 = vshrl.u32 %v273_v36, 7  ;;  %s556_s14 = sshll.u32 %s739_s13, 4  ;;  %s557_s14 = int_to_ptr.vmem [resolvable:$true] %s556_s14 }
   0xb   :  { %v680_v27 = vpack.c.bf16 %v25_v26, %v24_v25  ;;  %v215_v28 = vld [vmem:[%s952_s2 + $0x30] sm:$0xff]  ;;  %v26_v30 = vld [vmem:[%s951_s1 + $0x20] sm:$0xff]  ;;  %v27_v31 = vld [vmem:[%s951_s1 + $0x28] sm:$0xff]  ;;  %s714_s16 = scalar_lea.vmem %s557_s14, 32  ;;  %p715_p1 = scmp.lt.s32.totalorder %s557_s14, %s557_s14 }
   0xc   :  { %242 = vperm.xlu1 %709, %v212_v17   ;;  %232 = vperm.xlu0 %708, %v210_v18   ;;  %v684_v32 = vpack.c.bf16 %v27_v31, %v26_v30  ;;  %v28_v33 = vld [vmem:[%s951_s1 + $0x30] sm:$0xff]  ;;  %v29_v34 = vld [vmem:[%s951_s1 + $0x38] sm:$0xff]  ;;  %v275_v40 = vsub.s32 0, %v851_v38 }
   0xd   :  { %675 = vmatpush3.bf16.xpose.msra.mxu1 %v672_v9  ;;  %v688_v35 = vpack.c.bf16 %v29_v34, %v28_v33 }
   0xe   :  { %667 = vmatpush3.bf16.xpose.msra.mxu0 %v666_v19  ;;  %692 = vmatprep.subr.bf16.mxu1 %v676_v21 }
   0xf   :  { %677 = vmatprep.subr.bf16.mxu0 %v676_v21 }
  0x10   :  { %252 = vperm.xlu1 %709, %v214_v22   ;;  %247 = vperm.xlu0 %708, %v213_v23  }
  0x14   :  { %629 = vmatmul.mubr.f32.vlgmr.msra.gmra.mrb[0].mxu1 %v23_v20  ;;  %262 = vperm.xlu1 %709, %v216_v24  }
  0x15   :  { %618 = vmatmul.mubr.f32.vlgmr.msra.gmra.mrb[0].mxu0 %v738_v29  ;;  %631 = vmatprep.mubr.f32.mxu1 %v24_v25 }
  0x16   :  { %257 = vperm.xlu0 %708, %v215_v28   ;;  %679 = vmatpush3.bf16.msra.mxu0 %v676_v21 }
  0x17   :  { %681 = vmatprep.subr.bf16.mxu0 %v680_v27  ;;  %696 = vmatpush3.bf16.msra.mxu1 %v676_v21 }
  0x18   :  { %632 = vmatmul.mubr.f32.gmra.mrb[2].mxu1 %v25_v26  ;;  %693 = vmatprep.subr.bf16.mxu1 %v680_v27 }
  0x19   :  { %634 = vmatprep.mubr.f32.mxu1 %v26_v30 }
  0x1a   :  { %683 = vmatpush3.bf16.msra.mxu0 %v680_v27 }
  0x1b   :  { %685 = vmatprep.subr.bf16.mxu0 %v684_v32  ;;  %697 = vmatpush3.bf16.msra.mxu1 %v680_v27 }
  0x1c   :  { %635 = vmatmul.mubr.f32.gmra.mrb[4].mxu1 %v27_v31  ;;  %694 = vmatprep.subr.bf16.mxu1 %v684_v32 }
  0x1d   :  { %637 = vmatprep.mubr.f32.mxu1 %v28_v33 }
  0x1e   :  { %687 = vmatpush3.bf16.msra.mxu0 %v684_v32 }
  0x1f   :  { %689 = vmatprep.subr.bf16.mxu0 %v688_v35  ;;  %698 = vmatpush3.bf16.msra.mxu1 %v684_v32 }
  0x20   :  { %638 = vmatmul.mubr.f32.gmra.mrb[6].mxu1 %v29_v34  ;;  %695 = vmatprep.subr.bf16.mxu1 %v688_v35 }
  0x22   :  { %691 = vmatpush3.bf16.msra.mxu0 %v688_v35 }
  0x23   :  { %699 = vmatpush3.bf16.msra.mxu1 %v688_v35 }
  0x87   :  { %v238_v37 = vpop.permute.xlu1 %237  ;;  %v228_v39 = vpop.permute.xlu0 %227 }
  0x8b   :  { %v243_v41 = vpop.permute.xlu1 %242  ;;  %v233_v46 = vpop.permute.xlu0 %232 }
  0x8f   :  { %v253_v59 = vpop.permute.xlu1 %252  ;;  %v248_v62 = vpop.permute.xlu0 %247 }
  0x93   :  { %v263_v15 = vpop.permute.xlu1 %262 }
  0x95   :  { %v258_v18 = vpop.permute.xlu0 %257 }
  0xe7   :  { %v630_v42 = vpop.f32.mrb[0].mxu1 }
  0xe8   :  { %v218_v43 = vmul.f32 2.0, %v630_v42  ;;  %v170_v44 = vpop.f32.mrb[1].mxu1  ;;  %v100_v45 = vpop.f32.mrb[0].mxu0 }
  0xe9   :  { %v217_v47 = vmul.f32 2.0, %v170_v44  ;;  %v276_v48 = vrot.slane %v100_v45, %v275_v40  ;;  %v619_v49 = vpop.f32.mrb[1].mxu0  ;;  %v309_v45 = vadd.s32 8, %v851_v38 }
  0xea   :  { %v266_v50 = vsub.f32 %v233_v46, %v218_v43  ;;  %v870_v46 = vadd.s32 16, %v851_v38  ;;  %v879_v49 = vadd.s32 40, %v851_v38 }
  0xeb   :  { %v265_v51 = vsub.f32 %v228_v39, %v217_v47  ;;  %v633_v52 = vpop.f32.mrb[2].mxu1  ;;  %v873_v47 = vadd.s32 24, %v851_v38 }
  0xec   :  { %v220_v53 = vmul.f32 2.0, %v633_v52  ;;  %v180_v54 = vpop.f32.mrb[3].mxu1  ;;  %v854_v55 = vadd.f32 %v276_v48, %v266_v50  ;;  %v882_v50 = vadd.s32 48, %v851_v38 }
  0xed   :  { %v219_v56 = vmul.f32 2.0, %v180_v54  ;;  %v856_v57 = vadd.f32 %v276_v48, %v265_v51  ;;  %v885_v51 = vadd.s32 56, %v851_v38 }
  0xee   :  { %v268_v58 = vsub.f32 %v243_v41, %v220_v53  ;;  %v287_v19 = vsel %vm285_vm1, %v854_v55, inf }
  0xef   :  { %v267_v60 = vsub.f32 %v238_v37, %v219_v56  ;;  %v636_v61 = vpop.f32.mrb[4].mxu1  ;;  %v286_v23 = vsel %vm285_vm1, %v856_v57, inf }
  0xf0   :  { %v280_v63 = vadd.f32 %v276_v48, %v268_v58  ;;  %v222_v3 = vmul.f32 2.0, %v636_v61  ;;  %v190_v4 = vpop.f32.mrb[5].mxu1 }
  0xf1   :  { %v279_v5 = vadd.f32 %v276_v48, %v267_v60  ;;  %v221_v6 = vmul.f32 2.0, %v190_v4 }
  0xf2   :  { %v270_v8 = vsub.f32 %v253_v59, %v222_v3  ;;  %v289_v29 = vsel %vm285_vm1, %v280_v63, inf }
  0xf3   :  { %v269_v9 = vsub.f32 %v248_v62, %v221_v6  ;;  %v639_v11 = vpop.f32.mrb[6].mxu1  ;;  %v288_v32 = vsel %vm285_vm1, %v279_v5, inf }
  0xf4   :  { %v282_v12 = vadd.f32 %v276_v48, %v270_v8  ;;  %v224_v13 = vmul.f32 2.0, %v639_v11  ;;  %v200_v14 = vpop.f32.mrb[7].mxu1 }
  0xf5   :  { %v281_v16 = vadd.f32 %v276_v48, %v269_v9  ;;  %v223_v17 = vmul.f32 2.0, %v200_v14 }
  0xf6   :  { %v292_v20 = vsel %vm285_vm1, %v282_v12, inf  ;;  %v272_v21 = vsub.f32 %v263_v15, %v224_v13 }
  0xf7   :  { %v293_v22 = vmin.f32 %v287_v19, %v292_v20  ;;  %v290_v24 = vsel %vm285_vm1, %v281_v16, inf  ;;  %v271_v25 = vsub.f32 %v258_v18, %v223_v17 }
  0xf8   :  { %v291_v26 = vmin.f32 %v286_v23, %v290_v24  ;;  %v284_v27 = vadd.f32 %v276_v48, %v272_v21 }
  0xf9   :  { %v283_v28 = vadd.f32 %v276_v48, %v271_v25  ;;  %v876_v48 = vadd.s32 32, %v851_v38 }
  0xfa   :  { %v298_v30 = vmin.f32 %v291_v26, %v293_v22  ;;  %v296_v31 = vsel %vm285_vm1, %v284_v27, inf }
  0xfb   :  { %v297_v33 = vmin.f32 %v289_v29, %v296_v31  ;;  %v294_v34 = vsel %vm285_vm1, %v283_v28, inf }
  0xfc   :  { %v295_v35 = vmin.f32 %v288_v32, %v294_v34 }
  0xfe   :  { %v299_v36 = vmin.f32 %v295_v35, %v297_v33 }
 0x100   :  { %v300_v37 = vmin.f32 %v298_v30, %v299_v36 }
 0x102   :  { %v301_v39 = vrot.slane %v300_v37, 4 }
 0x104   :  { %v302_v40 = vmin.f32 %v300_v37, %v301_v39 }
 0x106   :  { %v303_v41 = vrot.slane %v302_v40, 2 }
 0x108   :  { %v304_v42 = vmin.f32 %v302_v40, %v303_v41 }
 0x10a   :  { %v305_v43 = vrot.slane %v304_v42, 1 }
 0x10c   :  { %v306_v44 = vmin.f32 %v304_v42, %v305_v43 }
 0x10e   :  { %vm316_vm2 = vcmp.eq.f32.partialorder %v856_v57, %v306_v44  ;;  %vm317_vm3 = vcmp.eq.f32.partialorder %v854_v55, %v306_v44  ;;  %vm318_vm4 = vcmp.eq.f32.partialorder %v279_v5, %v306_v44  ;;  %vm319_vm5 = vcmp.eq.f32.partialorder %v280_v63, %v306_v44 }
 0x10f   :  { %vm320_vm6 = vcmp.eq.f32.partialorder %v281_v16, %v306_v44  ;;  %vm321_vm7 = vcmp.eq.f32.partialorder %v282_v12, %v306_v44  ;;  %vm322_vm8 = vcmp.eq.f32.partialorder %v283_v28, %v306_v44  ;;  %vm323_vm9 = vcmp.eq.f32.partialorder %v284_v27, %v306_v44 }
 0x110   :  { %v324_v52 = vsel %vm316_vm2, %v851_v38, 64  ;;  %v325_v53 = vsel %vm317_vm3, %v309_v45, 64  ;;  %v326_v54 = vsel %vm318_vm4, %v870_v46, 64  ;;  %v327_v56 = vsel %vm319_vm5, %v873_v47, 64 }
 0x111   :  { %v328_v58 = vsel %vm320_vm6, %v876_v48, 64  ;;  %v329_v59 = vsel %vm321_vm7, %v879_v49, 64  ;;  %v330_v57 = vsel %vm322_vm8, %v882_v50, 64  ;;  %v331_v55 = vsel %vm323_vm9, %v885_v51, 64 }
 0x112   :  { %v332_v60 = vsel %vm285_vm1, %v324_v52, 2147483647  ;;  %v333_v61 = vsel %vm285_vm1, %v325_v53, 2147483647  ;;  %v334_v62 = vsel %vm285_vm1, %v326_v54, 2147483647 }
 0x113   :  { %v335_v63 = vsel %vm285_vm1, %v327_v56, 2147483647  ;;  %v336_v3 = vsel %vm285_vm1, %v328_v58, 2147483647  ;;  %v339_v4 = vsel %vm285_vm1, %v329_v59, 2147483647 }
 0x114   :  { %vm337_vm10 = vcmp.lt.s32.totalorder %v332_v60, %v336_v3  ;;  %vm340_vm11 = vcmp.lt.s32.totalorder %v333_v61, %v339_v4  ;;  %v342_v5 = vsel %vm285_vm1, %v330_v57, 2147483647  ;;  %v345_v6 = vsel %vm285_vm1, %v331_v55, 2147483647 }
 0x115   :  { %v338_v8 = vsel %vm337_vm10, %v332_v60, %v336_v3  ;;  %v341_v9 = vsel %vm340_vm11, %v333_v61, %v339_v4  ;;  %vm343_vm12 = vcmp.lt.s32.totalorder %v334_v62, %v342_v5  ;;  %vm346_vm13 = vcmp.lt.s32.totalorder %v335_v63, %v345_v6 }
 0x116   :  { %v344_v11 = vsel %vm343_vm12, %v334_v62, %v342_v5  ;;  %v347_v12 = vsel %vm346_vm13, %v335_v63, %v345_v6  ;;  %vm348_vm14 = vcmp.lt.s32.totalorder %v338_v8, %v341_v9  ;;  %vm521_vm1 = vcmask 253952  }
 0x117   :  { %v349_v13 = vsel %vm348_vm14, %v338_v8, %v341_v9  ;;  %vm350_vm15 = vcmp.lt.s32.totalorder %v344_v11, %v347_v12  ;;  %vm419_vm13 = vcmask 523264   ;;  %vm544_vm14 = vcmask 0  }
 0x118   :  { %v351_v14 = vsel %vm350_vm15, %v344_v11, %v347_v12 }
 0x119   :  { %vm352_vm0 = vcmp.lt.s32.totalorder %v349_v13, %v351_v14 }
 0x11a   :  { %v353_v15 = vsel %vm352_vm0, %v349_v13, %v351_v14 }
 0x11b   :  { %v354_v16 = vrot.slane %v353_v15, 4 }
 0x11d   :  { %vm355_vm2 = vcmp.lt.s32.totalorder %v353_v15, %v354_v16 }
 0x11e   :  { %v356_v17 = vsel %vm355_vm2, %v353_v15, %v354_v16 }
 0x11f   :  { %v357_v18 = vrot.slane %v356_v17, 2 }
 0x121   :  { %vm358_vm3 = vcmp.lt.s32.totalorder %v356_v17, %v357_v18 }
 0x122   :  { %v359_v19 = vsel %vm358_vm3, %v356_v17, %v357_v18 }
 0x123   :  { %v360_v20 = vrot.slane %v359_v19, 1 }
 0x125   :  { %vm361_vm4 = vcmp.lt.s32.totalorder %v359_v19, %v360_v20 }
 0x126   :  { %v362_v21 = vsel %vm361_vm4, %v359_v19, %v360_v20 }
 0x127   :  { %522 = vst.msk [vmem:[%s954_s4] sm:$0x1] %vm521_vm1, %v362_v21  ;;  %vm363_vm5 = vcmp.eq.s32.totalorder %v851_v38, %v362_v21  ;;  %vm364_vm6 = vcmp.eq.s32.totalorder %v309_v45, %v362_v21  ;;  %vm365_vm7 = vcmp.eq.s32.totalorder %v870_v46, %v362_v21  ;;  %vm366_vm8 = vcmp.eq.s32.totalorder %v873_v47, %v362_v21 }
 0x128   :  { %v568_v22 = vsel %vm363_vm5, 1.0, %v736_v10  ;;  %v569_v23 = vsel %vm364_vm6, 1.0, %v736_v10  ;;  %v570_v24 = vsel %vm365_vm7, 1.0, %v736_v10  ;;  %v571_v25 = vsel %vm366_vm8, 1.0, %v736_v10 }
 0x129   :  { %387 = vxpose.xlu0.b32.start [1/8] (short) (narrow) %v568_v22, 32  ;;  %vm367_vm9 = vcmp.eq.s32.totalorder %v876_v48, %v362_v21  ;;  %vm368_vm10 = vcmp.eq.s32.totalorder %v879_v49, %v362_v21  ;;  %vm369_vm11 = vcmp.eq.s32.totalorder %v882_v50, %v362_v21  ;;  %vm370_vm12 = vcmp.eq.s32.totalorder %v885_v51, %v362_v21 }
 0x12a   :  { %v572_v38 = vsel %vm367_vm9, 1.0, %v736_v10  ;;  %v573_v26 = vsel %vm368_vm10, 1.0, %v736_v10  ;;  %v574_v27 = vsel %vm369_vm11, 1.0, %v736_v10  ;;  %v575_v28 = vsel %vm370_vm12, 1.0, %v736_v10 }
 0x12d   :  { %388 = vxpose.xlu0.b32.cont [2/8] (short) (narrow) %v569_v23, 32 }
 0x131   :  { %389 = vxpose.xlu0.b32.cont [3/8] (short) (narrow) %v570_v24, 32 }
 0x135   :  { %390 = vxpose.xlu0.b32.cont [4/8] (short) (narrow) %v571_v25, 32 }
 0x139   :  { %391 = vxpose.xlu0.b32.cont [5/8] (short) (narrow) %v572_v38, 32 }
 0x13d   :  { %392 = vxpose.xlu0.b32.cont [6/8] (short) (narrow) %v573_v26, 32 }
 0x141   :  { %393 = vxpose.xlu0.b32.cont [7/8] (short) (narrow) %v574_v27, 32 }
 0x145   :  { %394 = vxpose.xlu0.b32.end [8/8] (short) (narrow) %v575_v28, 32 }
 0x1a9   :  { %v403_v29 = vpop.trf.xlu0 }
 0x1aa   :  { %656 = vmatprep.mubr.msk.f32.mxu0 %vm419_vm13, %v403_v29 }
 0x1ad   :  { %v404_v30 = vpop.trf.xlu0 }
 0x1ae   :  { %657 = vmatmul.mubr.msk.f32.vlgmr.msra.gmra.mrb[2].mxu0 %vm419_vm13, %v404_v30 }
 0x1b1   :  { %v405_v31 = vpop.trf.xlu0 }
 0x1b2   :  { %659 = vmatprep.mubr.msk.f32.mxu1 %vm419_vm13, %v405_v31 }
 0x1b5   :  { %v406_v32 = vpop.trf.xlu0 }
 0x1b6   :  { %660 = vmatmul.mubr.msk.f32.vlgmr.msra.gmra.mrb[8].mxu1 %vm419_vm13, %v406_v32 }
 0x281   :  { %v658_v33 = vpop.f32.mrb[2].mxu0 }
 0x282   :  { %518 = vst [vmem:[%s953_s3 + $0x8] sm:$0xff] %v658_v33  ;;  %v524_v34 = vsub.f32 %v778_v1, %v658_v33  ;;  %v498_v35 = vpop.f32.mrb[3].mxu0 }
 0x283   :  { %517 = vst [vmem:[%s953_s3] sm:$0xff] %v498_v35  ;;  %v523_v10 = vsub.f32 %v773_v0, %v498_v35 }
 0x284   :  { %v528_v36 = vmul.f32 %v524_v34, %v524_v34 }
 0x285   :  { %v527_v37 = vmul.f32 %v523_v10, %v523_v10 }
 0x287   :  { %v531_v39 = vadd.f32 %v528_v36, %v527_v37 }
 0x289   :  { %v661_v40 = vpop.f32.mrb[8].mxu1 }
 0x28a   :  { %520 = vst [vmem:[%s953_s3 + $0x18] sm:$0xff] %v661_v40  ;;  %v508_v41 = vpop.f32.mrb[9].mxu1  ;;  %v526_v42 = vsub.f32 %v794_v7, %v661_v40 }
 0x28b   :  { %519 = vst [vmem:[%s953_s3 + $0x10] sm:$0xff] %v508_v41  ;;  %v525_v1 = vsub.f32 %v783_v2, %v508_v41  ;;  %s710_s3 = scalar_lea.vmem %s557_s14, 16 }
 0x28c   :  { %v530_v44 = vmul.f32 %v526_v42, %v526_v42  ;;  %p711_p0 = scmp.ne.s32.totalorder %s557_s14, %s710_s3  ;;  %p716_p2 = scmp.lt.s32.totalorder %s714_s16, %s710_s3 }
 0x28d   :  { %v529_v43 = vmul.f32 %v525_v1, %v525_v1 }
 0x28e   :  { %p717_p3 = por %p716_p2, %p715_p1 }
 0x28f   :  { %v532_v0 = vadd.f32 %v531_v39, %v529_v43 }
 0x290   :  { %p718_p4 = pnand %p717_p3, %p711_p0 }
 0x291   :  { %v533_v45 = vadd.f32 %v532_v0, %v530_v44 }
 0x293   :  { %534 = vadd.xlane.f32.xlu1 %v533_v45 }
 0x320   :  { %v535_v46 = vpop.xlane.xlu1 %534 }
 0x321   :  { %v536_v47 = vrot.slane %v535_v46, 4 }
 0x323   :  { %v537_v48 = vadd.f32 %v536_v47, %v535_v46 }
 0x325   :  { %v538_v49 = vrot.slane %v537_v48, 2 }
 0x327   :  { %v539_v50 = vadd.f32 %v538_v49, %v537_v48 }
 0x329   :  { %v540_v51 = vrot.slane %v539_v50, 1 }
 0x32b   :  { %v541_v52 = vadd.f32 %v540_v51, %v539_v50 }
 0x32d   :  { %700 = vpush %v541_v52 }
 0x35e   :  { %s701_s15 = spop %700 }
 0x35f   :  { %v543_v7 = vstv %s701_s15 }
 0x360   :  { %545 = vst.msk [vmem:[#allocation2] sm:$0x1] %vm544_vm14, %v543_v7 }
 0x361   :  { %721 = shalt.err (!%p718_p4)
}
 0x362   :  { %s722_s19 = scalar_lea.hbm %s955_s5, 16 }
 0x363   :  { %p723_p5 = scmp.ne.s32.totalorder %s955_s5, %s722_s19  ;;  %p726_p6 = scmp.lt.u32.totalorder %s722_s19, %s955_s5 }
 0x365   :  { %p728_p7 = pnand %p726_p6, %p723_p5 }
 0x367   :  { %731 = shalt.err (!%p728_p7)
}
 0x368   :  { %559 = dma.vmem_to_hbm [thread:$0]  %s557_s14, 16, %s955_s5, [#allocation3]  }
 0x369   :  { %732 = dma.done.wait [#allocation3], 16  }
 0x36a   :  { %733 = vsyncadd [#allocation3], 4294967280 }
 0x36b   :  { %567 = vsyncpa [#allocation3], 1 }

// kernel: vqvae_pixelcnn_forward.10
= control target key start
LH: loop header
LB: loop body
LE: loop exit
PB: predicated region body
PF: predicated region fallthrough
CT: control target
= control target key end

     0   :  { %s698_s12 = smov 0   ;;  %s794_s0 = inlined_call_operand.vmem [shape: bf16[32,384], index: 0, kind: input, shape index: {}]   ;;  %s795_s1 = inlined_call_operand.vmem [shape: bf16[384,128], index: 1, kind: input, shape index: {}]   ;;  %s796_s2 = inlined_call_operand.vmem [shape: f32[1,128], index: 2, kind: input, shape index: {}]   ;;  %s797_s3 = inlined_call_operand.vmem [shape: f32[32,128], index: 3, kind: output, shape index: {}]  }
   0x1 LB: > { %s539_s13 = sadd.s32 4294967295, %s674_s12   ;;  %p543_p0 = scmp.ge.s32.totalorder %s674_s12, 1  ;;  %s674_s12 = sphi %s698_s12, %s13_s12  }
   0x2   : > { %p139_p1 = scmp.lt.s32.totalorder %s674_s12, 3 }
   0x4   : > { %p140_p2 = pnand %p543_p0, %p139_p1 }
   0x5   : > { %v640_v0 = vld [vmem:[%s795_s1 + $0x40] sm:$0xff] (!%p140_p2)   ;;  %v676_v2 = vmov (!%p140_p2), 0.0   ;;  %v643_v4 = vld [vmem:[%s795_s1 + $0x48] sm:$0xff] (!%p140_p2)   ;;  %vm677_vm0 = vmmov (!%p140_p2), 0   ;;  %v646_v7 = vld [vmem:[%s795_s1 + $0x50] sm:$0xff] (!%p140_p2)   ;;  %s544_s28 = sshll.u32 (!%p140_p2), %s539_s13, 1 }
   0x6   : > { %143 = sbr.rel (%p140_p2) target bundleno = 262 (0x106), region = 32  ;;  %v641_v1 = vld [vmem:[%s795_s1] sm:$0xff] (!%p140_p2)   ;;  %609 = vmatprep.subr.bf16.mxu1 (!%p140_p2), %v676_v2  ;;  %578 = vmatprep.subr.bf16.mxu0 (!%p140_p2), %v640_v0  ;;  %v644_v5 = vld [vmem:[%s795_s1 + $0x8] sm:$0xff] (!%p140_p2)   ;;  %v647_v8 = vld [vmem:[%s795_s1 + $0x10] sm:$0xff] (!%p140_p2)   ;;  %p165_p3 = scmp.lt.s32.totalorder (!%p140_p2), %s544_s28, 3 }
   0x7   : > { %v642_v3 = vld [vmem:[%s795_s1 + $0x80] sm:$0xff] (!%p140_p2)   ;;  %579 = vmatpush3.bf16.msra.mxu0 (!%p140_p2), %v641_v1  ;;  %625 = vmatprep.mubr.msk.bf16.mxu1 (!%p140_p2), %vm677_vm0, %v676_v2  ;;  %v645_v6 = vld [vmem:[%s795_s1 + $0x88] sm:$0xff] (!%p140_p2)   ;;  %v648_v9 = vld [vmem:[%s795_s1 + $0x90] sm:$0xff] (!%p140_p2)  }
   0x8   : > { %610 = vmatpush3.bf16.msra.mxu1 (!%p140_p2), %v642_v3  ;;  %580 = vmatprep.subr.bf16.mxu0 (!%p140_p2), %v643_v4  ;;  %v649_v10 = vld [vmem:[%s795_s1 + $0x58] sm:$0xff] (!%p140_p2)   ;;  %v652_v13 = vld [vmem:[%s795_s1 + $0x60] sm:$0xff] (!%p140_p2)   ;;  %v655_v16 = vld [vmem:[%s795_s1 + $0x68] sm:$0xff] (!%p140_p2)  }
   0x9   : > { %611 = vmatprep.subr.bf16.mxu1 (!%p140_p2), %v676_v2  ;;  %v650_v11 = vld [vmem:[%s795_s1 + $0x18] sm:$0xff] (!%p140_p2)   ;;  %v653_v14 = vld [vmem:[%s795_s1 + $0x20] sm:$0xff] (!%p140_p2)   ;;  %v656_v17 = vld [vmem:[%s795_s1 + $0x28] sm:$0xff] (!%p140_p2)  }
   0xa   : > { %v651_v12 = vld [vmem:[%s795_s1 + $0x98] sm:$0xff] (!%p140_p2)   ;;  %v654_v15 = vld [vmem:[%s795_s1 + $0xa0] sm:$0xff] (!%p140_p2)   ;;  %v657_v18 = vld [vmem:[%s795_s1 + $0xa8] sm:$0xff] (!%p140_p2)  }
   0xb   : > { %581 = vmatpush3.bf16.msra.mxu0 (!%p140_p2), %v644_v5  ;;  %v658_v19 = vld [vmem:[%s795_s1 + $0x70] sm:$0xff] (!%p140_p2)   ;;  %v661_v22 = vld [vmem:[%s795_s1 + $0x78] sm:$0xff] (!%p140_p2)   ;;  %v548_v30 = vld [vmem:[%s796_s2] ss:$0 sm:$0xff] (!%p140_p2) }
   0xc   : > { %612 = vmatpush3.bf16.msra.mxu1 (!%p140_p2), %v645_v6  ;;  %582 = vmatprep.subr.bf16.mxu0 (!%p140_p2), %v646_v7  ;;  %v659_v20 = vld [vmem:[%s795_s1 + $0x30] sm:$0xff] (!%p140_p2)   ;;  %v662_v24 = vld [vmem:[%s795_s1 + $0x38] sm:$0xff] (!%p140_p2)  }
   0xd   : > { %613 = vmatprep.subr.bf16.mxu1 %v676_v2  ;;  %s799_s28 = smov (!%p165_p3, %s544_s28), 3  ;;  %v660_v21 = vld [vmem:[%s795_s1 + $0xb0] sm:$0xff]   ;;  %v666_v25 = vld [vmem:[%s795_s1 + $0xb8] sm:$0xff]  }
   0xe   : > { %s629_s21 = smul.u32 12, %s799_s28  ;;  %s547_s18 = sshll.u32 %s799_s28, 3 }
   0xf   : > { %583 = vmatpush3.bf16.msra.mxu0 %v647_v8 }
  0x10   : > { %614 = vmatpush3.bf16.msra.mxu1 %v648_v9  ;;  %584 = vmatprep.subr.bf16.mxu0 %v649_v10  ;;  %s169_s6 = scalar_lea.vmem %s794_s0, %s629_s21  ;;  %s175_s21 = scalar_lea.vmem %s797_s3, %s547_s18 }
  0x11   : > { %615 = vmatprep.subr.bf16.mxu1 %v676_v2  ;;  %v665_v23 = vld [vmem:[%s169_s6 + $0x4] ss:$12 sps:$4 sm:$0xff]   ;;  %v663_v26 = vld [vmem:[%s169_s6] ss:$12 sps:$4 sm:$0xff]   ;;  %v667_v27 = vld [vmem:[%s169_s6 + $0x8] ss:$12 sps:$4 sm:$0xff]  }
  0x12   : > { %429 = vmatprep.mubr.bf16.mxu0 %v665_v23 }
  0x13   : > { %585 = vmatpush3.bf16.msra.mxu0 %v650_v11 }
  0x14   : > { %616 = vmatpush3.bf16.msra.mxu1 %v651_v12  ;;  %586 = vmatprep.subr.bf16.mxu0 %v652_v13 }
  0x15   : > { %617 = vmatprep.subr.bf16.mxu1 %v676_v2 }
  0x17   : > { %587 = vmatpush3.bf16.msra.mxu0 %v653_v14 }
  0x18   : > { %618 = vmatpush3.bf16.msra.mxu1 %v654_v15  ;;  %588 = vmatprep.subr.bf16.mxu0 %v655_v16 }
  0x19   : > { %619 = vmatprep.subr.bf16.mxu1 %v676_v2 }
  0x1b   : > { %589 = vmatpush3.bf16.msra.mxu0 %v656_v17 }
  0x1c   : > { %620 = vmatpush3.bf16.msra.mxu1 %v657_v18  ;;  %590 = vmatprep.subr.bf16.mxu0 %v658_v19 }
  0x1d   : > { %621 = vmatprep.subr.bf16.mxu1 %v676_v2 }
  0x1f   : > { %591 = vmatpush3.bf16.msra.mxu0 %v659_v20 }
  0x20   : > { %622 = vmatpush3.bf16.msra.mxu1 %v660_v21  ;;  %592 = vmatprep.subr.bf16.mxu0 %v661_v22 }
  0x21   : > { %623 = vmatprep.subr.bf16.mxu1 %v676_v2 }
  0x23   : > { %593 = vmatpush3.bf16.msra.mxu0 %v662_v24 }
  0x24   : > { %624 = vmatpush3.bf16.msra.mxu1 %v666_v25 }
  0x26   : > { %430 = vmatmul.mubr.bf16.vlgmr.msra.gmra.mrb[0].mxu0 %v663_v26 }
  0x27   : > { %626 = vmatmul.mubr.bf16.vlgmr.msra.gmra.mrb[0].mxu1 %v667_v27 }
  0xf9   : > { %v594_v28 = vpop.f32.mrb[0].mxu0 }
  0xfa   : > { %v595_v29 = vpop.f32.mrb[1].mxu0  ;;  %v472_v31 = vpop.f32.mrb[0].mxu1 }
  0xfb   : > { %v596_v32 = vadd.f32 %v595_v29, %v594_v28  ;;  %v597_v33 = vpop.f32.mrb[2].mxu0  ;;  %v627_v34 = vpop.f32.mrb[1].mxu1 }
  0xfc   : > { %v598_v35 = vpop.f32.mrb[3].mxu0  ;;  %v475_v36 = vpop.f32.mrb[2].mxu1 }
  0xfd   : > { %v432_v37 = vadd.f32 %v596_v32, %v548_v30  ;;  %v599_v38 = vadd.f32 %v598_v35, %v597_v33  ;;  %v628_v39 = vpop.f32.mrb[3].mxu1 }
  0xff   : > { %v473_v40 = vadd.f32 %v472_v31, %v432_v37  ;;  %v435_v41 = vadd.f32 %v599_v38, %v548_v30 }
 0x101   : > { %v479_v42 = vmax.f32 %v473_v40, 0.0  ;;  %v476_v43 = vadd.f32 %v475_v36, %v435_v41 }
 0x103   : > { %481 = vst [vmem:[%s175_s21] sm:$0xff] %v479_v42  ;;  %v480_v44 = vmax.f32 %v476_v43, 0.0 }
 0x105   : > { %482 = vst [vmem:[%s175_s21 + $0x8] sm:$0xff] %v480_v44 }
 0x106 PF: > { %s13_s12 = sadd.s32 1, %s674_s12  }
 0x107   : > { %p10_p4 = scmp.ge.s32.totalorder %s13_s12, 4  }
 0x109   :  { %12 = sbr.rel (!%p10_p4) target bundleno = 1 (0x1), region = 62 }

// kernel: vqvae_pixelcnn_forward.11
= control target key start
LH: loop header
LB: loop body
LE: loop exit
PB: predicated region body
PF: predicated region fallthrough
CT: control target
= control target key end

     0   :  { %s876_s12 = smov 0   ;;  %s996_s0 = inlined_call_operand.vmem [shape: bf16[128,384], index: 0, kind: input, shape index: {}]   ;;  %s997_s1 = inlined_call_operand.vmem [shape: bf16[384,128], index: 1, kind: input, shape index: {}]   ;;  %s998_s2 = inlined_call_operand.vmem [shape: f32[1,128], index: 2, kind: input, shape index: {}]   ;;  %s999_s3 = inlined_call_operand.vmem [shape: f32[128,128], index: 3, kind: output, shape index: {}]  }
   0x1 LB: > { %s659_s13 = sadd.s32 4294967295, %s854_s12   ;;  %p663_p0 = scmp.ge.s32.totalorder %s854_s12, 1  ;;  %s854_s12 = sphi %s876_s12, %s13_s12  }
   0x2   : > { %p139_p1 = scmp.lt.s32.totalorder %s854_s12, 3 }
   0x4   : > { %p140_p2 = pnand %p663_p0, %p139_p1 }
   0x5   : > { %v792_v0 = vld [vmem:[%s997_s1 + $0x40] sm:$0xff] (!%p140_p2)   ;;  %v794_v2 = vld [vmem:[%s997_s1 + $0x48] sm:$0xff] (!%p140_p2)   ;;  %v797_v5 = vld [vmem:[%s997_s1 + $0x50] sm:$0xff] (!%p140_p2)   ;;  %s664_s28 = sshll.u32 (!%p140_p2), %s659_s13, 3 }
   0x6   : > { %143 = sbr.rel (%p140_p2) target bundleno = 295 (0x127), region = 32  ;;  %v793_v1 = vld [vmem:[%s997_s1] sm:$0xff] (!%p140_p2)   ;;  %707 = vmatprep.subr.bf16.mxu0 (!%p140_p2), %v792_v0  ;;  %v796_v4 = vld [vmem:[%s997_s1 + $0x8] sm:$0xff] (!%p140_p2)   ;;  %v799_v7 = vld [vmem:[%s997_s1 + $0x10] sm:$0xff] (!%p140_p2)   ;;  %p165_p3 = scmp.lt.s32.totalorder (!%p140_p2), %s664_s28, 15 }
   0x7   : > { %708 = vmatpush3.bf16.msra.mxu0 (!%p140_p2), %v793_v1  ;;  %v795_v3 = vld [vmem:[%s997_s1 + $0x80] sm:$0xff] (!%p140_p2)   ;;  %v798_v6 = vld [vmem:[%s997_s1 + $0x88] sm:$0xff] (!%p140_p2)   ;;  %v800_v8 = vld [vmem:[%s997_s1 + $0x58] sm:$0xff] (!%p140_p2)  }
   0x8   : > { %709 = vmatprep.subr.bf16.mxu0 (!%p140_p2), %v794_v2  ;;  %759 = vmatprep.subr.bf16.mxu1 (!%p140_p2), %v795_v3  ;;  %v801_v9 = vld [vmem:[%s997_s1 + $0x90] sm:$0xff] (!%p140_p2)   ;;  %v802_v10 = vld [vmem:[%s997_s1 + $0x18] sm:$0xff] (!%p140_p2)   ;;  %v803_v11 = vld [vmem:[%s997_s1 + $0x60] sm:$0xff] (!%p140_p2)  }
   0x9   : > { %760 = vmatpush3.bf16.msra.mxu1 (!%p140_p2), %v795_v3  ;;  %v804_v12 = vld [vmem:[%s997_s1 + $0x98] sm:$0xff] (!%p140_p2)   ;;  %v805_v13 = vld [vmem:[%s997_s1 + $0x20] sm:$0xff] (!%p140_p2)   ;;  %v806_v15 = vld [vmem:[%s997_s1 + $0x68] sm:$0xff] (!%p140_p2)  }
   0xa   : > { %761 = vmatprep.subr.bf16.mxu1 (!%p140_p2), %v798_v6  ;;  %v807_v14 = vld [vmem:[%s997_s1 + $0xa0] sm:$0xff] (!%p140_p2)   ;;  %v808_v16 = vld [vmem:[%s997_s1 + $0x28] sm:$0xff] (!%p140_p2)   ;;  %v809_v18 = vld [vmem:[%s997_s1 + $0x70] sm:$0xff] (!%p140_p2)  }
   0xb   : > { %710 = vmatpush3.bf16.msra.mxu0 (!%p140_p2), %v796_v4  ;;  %v810_v17 = vld [vmem:[%s997_s1 + $0xa8] sm:$0xff] (!%p140_p2)   ;;  %v811_v19 = vld [vmem:[%s997_s1 + $0x30] sm:$0xff] (!%p140_p2)   ;;  %v812_v20 = vld [vmem:[%s997_s1 + $0x78] sm:$0xff] (!%p140_p2)  }
   0xc   : > { %711 = vmatprep.subr.bf16.mxu0 (!%p140_p2), %v797_v5  ;;  %v813_v21 = vld [vmem:[%s997_s1 + $0xb0] sm:$0xff] (!%p140_p2)   ;;  %v814_v23 = vld [vmem:[%s997_s1 + $0x38] sm:$0xff] (!%p140_p2)   ;;  %v668_v38 = vld [vmem:[%s998_s2] ss:$0 sm:$0xff] (!%p140_p2) }
   0xd   : > { %762 = vmatpush3.bf16.msra.mxu1 %v798_v6  ;;  %s1001_s28 = smov (!%p165_p3, %s664_s28), 15  ;;  %v818_v25 = vld [vmem:[%s997_s1 + $0xb8] sm:$0xff]  }
   0xe   : > { %763 = vmatprep.subr.bf16.mxu1 %v801_v9  ;;  %s783_s21 = smul.u32 12, %s1001_s28  ;;  %s667_s18 = sshll.u32 %s1001_s28, 3 }
   0xf   : > { %712 = vmatpush3.bf16.msra.mxu0 %v799_v7 }
  0x10   : > { %713 = vmatprep.subr.bf16.mxu0 %v800_v8  ;;  %s950_s6 = scalar_lea.vmem %s996_s0, %s783_s21  ;;  %s983_s21 = scalar_lea.vmem %s999_s3, %s667_s18 }
  0x11   : > { %764 = vmatpush3.bf16.msra.mxu1 %v801_v9  ;;  %v817_v22 = vld [vmem:[%s950_s6 + $0x4] ss:$12 sps:$4 sm:$0xff]   ;;  %v819_v24 = vld [vmem:[%s950_s6 + $0x8] ss:$12 sps:$4 sm:$0xff]   ;;  %v815_v26 = vld [vmem:[%s950_s6] ss:$12 sps:$4 sm:$0xff]  }
  0x12   : > { %765 = vmatprep.subr.bf16.mxu1 %v804_v12  ;;  %489 = vmatprep.mubr.bf16.mxu0 %v817_v22  ;;  %v821_v27 = vld [vmem:[%s950_s6 + $0x1c] ss:$12 sps:$4 sm:$0xff]   ;;  %v820_v28 = vld [vmem:[%s950_s6 + $0x20] ss:$12 sps:$4 sm:$0xff]   ;;  %v827_v29 = vld [vmem:[%s950_s6 + $0x38] ss:$12 sps:$4 sm:$0xff]  }
  0x13   : > { %714 = vmatpush3.bf16.msra.mxu0 %v802_v10  ;;  %775 = vmatprep.mubr.bf16.mxu1 %v819_v24  ;;  %v823_v30 = vld [vmem:[%s950_s6 + $0x18] ss:$12 sps:$4 sm:$0xff]   ;;  %v824_v31 = vld [vmem:[%s950_s6 + $0x34] ss:$12 sps:$4 sm:$0xff]   ;;  %v828_v32 = vld [vmem:[%s950_s6 + $0x50] ss:$12 sps:$4 sm:$0xff]  }
  0x14   : > { %715 = vmatprep.subr.bf16.mxu0 %v803_v11  ;;  %v826_v33 = vld [vmem:[%s950_s6 + $0x30] ss:$12 sps:$4 sm:$0xff]   ;;  %v829_v34 = vld [vmem:[%s950_s6 + $0x4c] ss:$12 sps:$4 sm:$0xff]   ;;  %v831_v35 = vld [vmem:[%s950_s6 + $0x48] ss:$12 sps:$4 sm:$0xff]  }
  0x15   : > { %766 = vmatpush3.bf16.msra.mxu1 %v804_v12 }
  0x16   : > { %767 = vmatprep.subr.bf16.mxu1 %v807_v14 }
  0x17   : > { %716 = vmatpush3.bf16.msra.mxu0 %v805_v13 }
  0x18   : > { %717 = vmatprep.subr.bf16.mxu0 %v806_v15 }
  0x19   : > { %768 = vmatpush3.bf16.msra.mxu1 %v807_v14 }
  0x1a   : > { %769 = vmatprep.subr.bf16.mxu1 %v810_v17 }
  0x1b   : > { %718 = vmatpush3.bf16.msra.mxu0 %v808_v16 }
  0x1c   : > { %719 = vmatprep.subr.bf16.mxu0 %v809_v18 }
  0x1d   : > { %770 = vmatpush3.bf16.msra.mxu1 %v810_v17 }
  0x1e   : > { %771 = vmatprep.subr.bf16.mxu1 %v813_v21 }
  0x1f   : > { %720 = vmatpush3.bf16.msra.mxu0 %v811_v19 }
  0x20   : > { %721 = vmatprep.subr.bf16.mxu0 %v812_v20 }
  0x21   : > { %772 = vmatpush3.bf16.msra.mxu1 %v813_v21 }
  0x22   : > { %773 = vmatprep.subr.bf16.mxu1 %v818_v25 }
  0x23   : > { %722 = vmatpush3.bf16.msra.mxu0 %v814_v23 }
  0x25   : > { %774 = vmatpush3.bf16.msra.mxu1 %v818_v25 }
  0x26   : > { %490 = vmatmul.mubr.bf16.vlgmr.msra.gmra.mrb[0].mxu0 %v815_v26 }
  0x27   : > { %497 = vmatprep.mubr.bf16.mxu0 %v821_v27 }
  0x28   : > { %776 = vmatmul.mubr.bf16.vlgmr.msra.gmra.mrb[0].mxu1 %v820_v28 }
  0x29   : > { %779 = vmatprep.mubr.bf16.mxu1 %v827_v29 }
  0x2e   : > { %498 = vmatmul.mubr.bf16.gmra.mrb[4].mxu0 %v823_v30 }
  0x2f   : > { %505 = vmatprep.mubr.bf16.mxu0 %v824_v31 }
  0x30   : > { %780 = vmatmul.mubr.bf16.gmra.mrb[4].mxu1 %v828_v32 }
  0x36   : > { %506 = vmatmul.mubr.bf16.gmra.mrb[8].mxu0 %v826_v33 }
  0x37   : > { %513 = vmatprep.mubr.bf16.mxu0 %v829_v34 }
  0x3e   : > { %514 = vmatmul.mubr.bf16.gmra.mrb[12].mxu0 %v831_v35 }
  0xf9   : > { %v723_v36 = vpop.f32.mrb[0].mxu0 }
  0xfa   : > { %v724_v37 = vpop.f32.mrb[1].mxu0 }
  0xfb   : > { %v725_v39 = vadd.f32 %v724_v37, %v723_v36  ;;  %v726_v40 = vpop.f32.mrb[2].mxu0  ;;  %v777_v42 = vpop.f32.mrb[0].mxu1 }
  0xfc   : > { %v727_v41 = vpop.f32.mrb[3].mxu0  ;;  %v556_v45 = vpop.f32.mrb[1].mxu1 }
  0xfd   : > { %v728_v43 = vadd.f32 %v727_v41, %v726_v40  ;;  %v492_v44 = vadd.f32 %v725_v39, %v668_v38  ;;  %v778_v46 = vpop.f32.mrb[2].mxu1 }
  0xfe   : > { %v559_v49 = vpop.f32.mrb[3].mxu1 }
  0xff   : > { %v557_v47 = vadd.f32 %v556_v45, %v492_v44  ;;  %v495_v48 = vadd.f32 %v728_v43, %v668_v38 }
 0x101   : > { %832 = vtanh.f32 %v557_v47  ;;  %v560_v50 = vadd.f32 %v559_v49, %v495_v48  ;;  %v729_v51 = vpop.f32.mrb[4].mxu0 }
 0x102   : > { %v730_v52 = vpop.f32.mrb[5].mxu0 }
 0x103   : > { %834 = vtanh.f32 %v560_v50  ;;  %v731_v53 = vadd.f32 %v730_v52, %v729_v51  ;;  %v732_v54 = vpop.f32.mrb[6].mxu0  ;;  %v781_v56 = vpop.f32.mrb[4].mxu1 }
 0x104   : > { %v733_v55 = vpop.f32.mrb[7].mxu0  ;;  %v572_v59 = vpop.f32.mrb[5].mxu1 }
 0x105   : > { %v500_v57 = vadd.f32 %v731_v53, %v668_v38  ;;  %v734_v58 = vadd.f32 %v733_v55, %v732_v54  ;;  %v782_v60 = vpop.f32.mrb[6].mxu1 }
 0x106   : > { %v575_v63 = vpop.f32.mrb[7].mxu1 }
 0x107   : > { %v565_v61 = vadd.f32 %v777_v42, %v500_v57  ;;  %v503_v62 = vadd.f32 %v734_v58, %v668_v38 }
 0x109   : > { %836 = vtanh.f32 %v565_v61  ;;  %v568_v0 = vadd.f32 %v778_v46, %v503_v62  ;;  %v735_v1 = vpop.f32.mrb[8].mxu0 }
 0x10a   : > { %v736_v2 = vpop.f32.mrb[9].mxu0 }
 0x10b   : > { %v833_v3 = vpop.eup %832  ;;  %838 = vtanh.f32 %v568_v0  ;;  %v737_v4 = vadd.f32 %v736_v2, %v735_v1  ;;  %v738_v5 = vpop.f32.mrb[10].mxu0 }
 0x10c   : > { %595 = vst [vmem:[%s983_s21] sm:$0xff] %v833_v3  ;;  %v739_v6 = vpop.f32.mrb[11].mxu0 }
 0x10d   : > { %v835_v7 = vpop.eup %834  ;;  %v740_v8 = vadd.f32 %v739_v6, %v738_v5  ;;  %v508_v9 = vadd.f32 %v737_v4, %v668_v38 }
 0x10e   : > { %596 = vst [vmem:[%s983_s21 + $0x8] sm:$0xff] %v835_v7 }
 0x10f   : > { %v573_v10 = vadd.f32 %v572_v59, %v508_v9  ;;  %v511_v11 = vadd.f32 %v740_v8, %v668_v38 }
 0x111   : > { %840 = vtanh.f32 %v573_v10  ;;  %v576_v12 = vadd.f32 %v575_v63, %v511_v11  ;;  %v741_v13 = vpop.f32.mrb[12].mxu0 }
 0x112   : > { %v742_v14 = vpop.f32.mrb[13].mxu0 }
 0x113   : > { %v837_v15 = vpop.eup %836  ;;  %842 = vtanh.f32 %v576_v12  ;;  %v743_v16 = vadd.f32 %v742_v14, %v741_v13  ;;  %v744_v17 = vpop.f32.mrb[14].mxu0 }
 0x114   : > { %597 = vst [vmem:[%s983_s21 + $0x10] sm:$0xff] %v837_v15  ;;  %v745_v18 = vpop.f32.mrb[15].mxu0 }
 0x115   : > { %v839_v19 = vpop.eup %838  ;;  %v516_v20 = vadd.f32 %v743_v16, %v668_v38  ;;  %v746_v21 = vadd.f32 %v745_v18, %v744_v17 }
 0x116   : > { %598 = vst [vmem:[%s983_s21 + $0x18] sm:$0xff] %v839_v19 }
 0x117   : > { %v581_v22 = vadd.f32 %v781_v56, %v516_v20  ;;  %v519_v23 = vadd.f32 %v746_v21, %v668_v38 }
 0x119   : > { %844 = vtanh.f32 %v581_v22  ;;  %v584_v24 = vadd.f32 %v782_v60, %v519_v23 }
 0x11b   : > { %v841_v25 = vpop.eup %840  ;;  %846 = vtanh.f32 %v584_v24 }
 0x11c   : > { %599 = vst [vmem:[%s983_s21 + $0x20] sm:$0xff] %v841_v25 }
 0x11d   : > { %v843_v26 = vpop.eup %842 }
 0x11e   : > { %600 = vst [vmem:[%s983_s21 + $0x28] sm:$0xff] %v843_v26 }
 0x123   : > { %v845_v27 = vpop.eup %844 }
 0x124   : > { %601 = vst [vmem:[%s983_s21 + $0x30] sm:$0xff] %v845_v27 }
 0x125   : > { %v847_v28 = vpop.eup %846 }
 0x126   : > { %602 = vst [vmem:[%s983_s21 + $0x38] sm:$0xff] %v847_v28 }
 0x127 PF: > { %s13_s12 = sadd.s32 1, %s854_s12  }
 0x128   : > { %p10_p4 = scmp.ge.s32.totalorder %s13_s12, 4  }
 0x12a   :  { %12 = sbr.rel (!%p10_p4) target bundleno = 1 (0x1), region = 62 }

// kernel: vqvae_pixelcnn_forward.9
= control target key start
LH: loop header
LB: loop body
LE: loop exit
PB: predicated region body
PF: predicated region fallthrough
CT: control target
= control target key end

     0   :  { %v5369_v1 = vmov 0   ;;  %s7150_s1 = inlined_call_operand.vmem [shape: bf16[128,512], index: 1, kind: input, shape index: {}]   ;;  %s7151_s3 = inlined_call_operand.vmem [shape: bf16[2,512,512], index: 3, kind: input, shape index: {}]   ;;  %s7152_s0 = inlined_call_operand.vmem [shape: bf16[2,128], index: 0, kind: input, shape index: {}]   ;;  %s7153_s2 = inlined_call_operand.vmem [shape: f32[1,512], index: 2, kind: input, shape index: {}]   ;;  %s7154_s4 = inlined_call_operand.vmem [shape: f32[2,1,512], index: 4, kind: input, shape index: {}]   ;;  %s7155_s5 = inlined_call_operand.vmem [shape: bf16[512,1024], index: 5, kind: input, shape index: {}]   ;;  %s7156_s6 = inlined_call_operand.vmem [shape: f32[1,1024], index: 6, kind: input, shape index: {}]   ;;  %s7157_s7 = inlined_call_operand.vmem [shape: f32[2,1024], index: 7, kind: output, shape index: {}]  }
   0x1   :  { %v4937_v0 = vld [vmem:[%s7150_s1 + $0x4] ss:$16 sps:$4 sm:$0xff]   ;;  %274 = vmatprep.mubr.bf16.mxu0 %v5369_v1  ;;  %315 = vmatprep.mubr.bf16.mxu1 %v5369_v1  ;;  %v4939_v2 = vld [vmem:[%s7150_s1] ss:$16 sps:$4 sm:$0xff]   ;;  %v4961_v10 = vld [vmem:[%s7150_s1 + $0xc] ss:$16 sps:$4 sm:$0xff]  }
   0x2   :  { %242 = vmatprep.subr.bf16.mxu0 %v4937_v0  ;;  %v4940_v3 = vld [vmem:[%s7150_s1 + $0x24] ss:$16 sps:$4 sm:$0xff]   ;;  %v4942_v4 = vld [vmem:[%s7150_s1 + $0x20] ss:$16 sps:$4 sm:$0xff]   ;;  %v4963_v11 = vld [vmem:[%s7150_s1 + $0x8] ss:$16 sps:$4 sm:$0xff]   ;;  %283 = vmatprep.subr.bf16.mxu1 %v4961_v10 }
   0x3   :  { %243 = vmatpush1.bf16.msra.mxu0 %v4939_v2  ;;  %v4943_v5 = vld [vmem:[%s7150_s1 + $0x44] ss:$16 sps:$4 sm:$0xff]   ;;  %v4945_v6 = vld [vmem:[%s7150_s1 + $0x40] ss:$16 sps:$4 sm:$0xff]   ;;  %v4964_v12 = vld [vmem:[%s7150_s1 + $0x2c] ss:$16 sps:$4 sm:$0xff]   ;;  %284 = vmatpush1.bf16.msra.mxu1 %v4963_v11 }
   0x4   :  { %244 = vmatprep.subr.bf16.mxu0 %v4940_v3  ;;  %v4946_v7 = vld [vmem:[%s7150_s1 + $0x64] ss:$16 sps:$4 sm:$0xff]   ;;  %v4948_v8 = vld [vmem:[%s7150_s1 + $0x60] ss:$16 sps:$4 sm:$0xff]   ;;  %v4966_v14 = vld [vmem:[%s7150_s1 + $0x28] ss:$16 sps:$4 sm:$0xff]   ;;  %285 = vmatprep.subr.bf16.mxu1 %v4964_v12 }
   0x5   :  { %v4949_v9 = vld [vmem:[%s7150_s1 + $0x84] ss:$16 sps:$4 sm:$0xff]   ;;  %v4951_v13 = vld [vmem:[%s7150_s1 + $0x80] ss:$16 sps:$4 sm:$0xff]   ;;  %v4967_v15 = vld [vmem:[%s7150_s1 + $0x4c] ss:$16 sps:$4 sm:$0xff]  }
   0x6   :  { %v4952_v16 = vld [vmem:[%s7150_s1 + $0xa4] ss:$16 sps:$4 sm:$0xff]   ;;  %v4954_v17 = vld [vmem:[%s7150_s1 + $0xa0] ss:$16 sps:$4 sm:$0xff]   ;;  %v4969_v18 = vld [vmem:[%s7150_s1 + $0x48] ss:$16 sps:$4 sm:$0xff]  }
   0x7   :  { %245 = vmatpush1.bf16.msra.mxu0 %v4942_v4  ;;  %286 = vmatpush1.bf16.msra.mxu1 %v4966_v14  ;;  %v4970_v19 = vld [vmem:[%s7150_s1 + $0x6c] ss:$16 sps:$4 sm:$0xff]   ;;  %v4955_v20 = vld [vmem:[%s7150_s1 + $0xc4] ss:$16 sps:$4 sm:$0xff]   ;;  %v4957_v21 = vld [vmem:[%s7150_s1 + $0xc0] ss:$16 sps:$4 sm:$0xff]  }
   0x8   :  { %246 = vmatprep.subr.bf16.mxu0 %v4943_v5  ;;  %287 = vmatprep.subr.bf16.mxu1 %v4967_v15  ;;  %v4972_v22 = vld [vmem:[%s7150_s1 + $0x68] ss:$16 sps:$4 sm:$0xff]   ;;  %v4973_v23 = vld [vmem:[%s7150_s1 + $0x8c] ss:$16 sps:$4 sm:$0xff]   ;;  %v4958_v24 = vld [vmem:[%s7150_s1 + $0xe4] ss:$16 sps:$4 sm:$0xff]  }
   0x9   :  { %v4960_v25 = vld [vmem:[%s7150_s1 + $0xe0] ss:$16 sps:$4 sm:$0xff]   ;;  %v4975_v26 = vld [vmem:[%s7150_s1 + $0x88] ss:$16 sps:$4 sm:$0xff]   ;;  %v4976_v27 = vld [vmem:[%s7150_s1 + $0xac] ss:$16 sps:$4 sm:$0xff]  }
   0xa   :  { %v4987_v28 = vld [vmem:[%s7151_s3 + $0x4] ss:$16 sps:$4 sm:$0xff]   ;;  %v27_v29 = vld [vmem:[%s7152_s0] sm:$0x1]  ;;  %v4978_v30 = vld [vmem:[%s7150_s1 + $0xa8] ss:$16 sps:$4 sm:$0xff]  }
   0xb   :  { %247 = vmatpush1.bf16.msra.mxu0 %v4945_v6  ;;  %288 = vmatpush1.bf16.msra.mxu1 %v4969_v18  ;;  %v4979_v31 = vld [vmem:[%s7150_s1 + $0xcc] ss:$16 sps:$4 sm:$0xff]   ;;  %v4985_v32 = vld [vmem:[%s7151_s3] ss:$16 sps:$4 sm:$0xff]   ;;  %v4993_v33 = vld [vmem:[%s7151_s3 + $0x24] ss:$16 sps:$4 sm:$0xff]  }
   0xc   :  { %248 = vmatprep.subr.bf16.mxu0 %v4946_v7  ;;  %289 = vmatprep.subr.bf16.mxu1 %v4970_v19  ;;  %v4981_v34 = vld [vmem:[%s7150_s1 + $0xc8] ss:$16 sps:$4 sm:$0xff]   ;;  %v4982_v35 = vld [vmem:[%s7150_s1 + $0xec] ss:$16 sps:$4 sm:$0xff]   ;;  %v4991_v36 = vld [vmem:[%s7151_s3 + $0x20] ss:$16 sps:$4 sm:$0xff]  }
   0xd   :  { %v4999_v37 = vld [vmem:[%s7151_s3 + $0x44] ss:$16 sps:$4 sm:$0xff]   ;;  %v4984_v38 = vld [vmem:[%s7150_s1 + $0xe8] ss:$16 sps:$4 sm:$0xff]   ;;  %v4990_v39 = vld [vmem:[%s7151_s3 + $0xc] ss:$16 sps:$4 sm:$0xff]  }
   0xe   :  { %v4997_v40 = vld [vmem:[%s7151_s3 + $0x40] ss:$16 sps:$4 sm:$0xff]   ;;  %v5005_v41 = vld [vmem:[%s7151_s3 + $0x64] ss:$16 sps:$4 sm:$0xff]   ;;  %v4988_v42 = vld [vmem:[%s7151_s3 + $0x8] ss:$16 sps:$4 sm:$0xff]  }
   0xf   :  { %249 = vmatpush1.bf16.msra.mxu0 %v4948_v8  ;;  %290 = vmatpush1.bf16.msra.mxu1 %v4972_v22  ;;  %v4996_v43 = vld [vmem:[%s7151_s3 + $0x2c] ss:$16 sps:$4 sm:$0xff]   ;;  %v5003_v44 = vld [vmem:[%s7151_s3 + $0x60] ss:$16 sps:$4 sm:$0xff]   ;;  %v5011_v45 = vld [vmem:[%s7151_s3 + $0x84] ss:$16 sps:$4 sm:$0xff]  }
  0x10   :  { %250 = vmatprep.subr.bf16.mxu0 %v4949_v9  ;;  %291 = vmatprep.subr.bf16.mxu1 %v4973_v23  ;;  %v4994_v46 = vld [vmem:[%s7151_s3 + $0x28] ss:$16 sps:$4 sm:$0xff]   ;;  %v5002_v47 = vld [vmem:[%s7151_s3 + $0x4c] ss:$16 sps:$4 sm:$0xff]   ;;  %v5009_v48 = vld [vmem:[%s7151_s3 + $0x80] ss:$16 sps:$4 sm:$0xff]  }
  0x11   :  { %v5017_v49 = vld [vmem:[%s7151_s3 + $0xa4] ss:$16 sps:$4 sm:$0xff]   ;;  %v5000_v50 = vld [vmem:[%s7151_s3 + $0x48] ss:$16 sps:$4 sm:$0xff]   ;;  %v5008_v51 = vld [vmem:[%s7151_s3 + $0x6c] ss:$16 sps:$4 sm:$0xff]  }
  0x12   :  { %v5015_v52 = vld [vmem:[%s7151_s3 + $0xa0] ss:$16 sps:$4 sm:$0xff]   ;;  %v5023_v53 = vld [vmem:[%s7151_s3 + $0xc4] ss:$16 sps:$4 sm:$0xff]   ;;  %v5006_v54 = vld [vmem:[%s7151_s3 + $0x68] ss:$16 sps:$4 sm:$0xff]  }
  0x13   :  { %251 = vmatpush1.bf16.msra.mxu0 %v4951_v13  ;;  %292 = vmatpush1.bf16.msra.mxu1 %v4975_v26  ;;  %v5014_v55 = vld [vmem:[%s7151_s3 + $0x8c] ss:$16 sps:$4 sm:$0xff]   ;;  %v5021_v56 = vld [vmem:[%s7151_s3 + $0xc0] ss:$16 sps:$4 sm:$0xff]   ;;  %v5029_v57 = vld [vmem:[%s7151_s3 + $0xe4] ss:$16 sps:$4 sm:$0xff]  }
  0x14   :  { %252 = vmatprep.subr.bf16.mxu0 %v4952_v16  ;;  %293 = vmatprep.subr.bf16.mxu1 %v4976_v27  ;;  %v5012_v58 = vld [vmem:[%s7151_s3 + $0x88] ss:$16 sps:$4 sm:$0xff]   ;;  %v5020_v59 = vld [vmem:[%s7151_s3 + $0xac] ss:$16 sps:$4 sm:$0xff]   ;;  %v5027_v60 = vld [vmem:[%s7151_s3 + $0xe0] ss:$16 sps:$4 sm:$0xff]  }
  0x15   :  { %v5035_v61 = vld [vmem:[%s7151_s3 + $0x104] ss:$16 sps:$4 sm:$0xff]   ;;  %v5018_v62 = vld [vmem:[%s7151_s3 + $0xa8] ss:$16 sps:$4 sm:$0xff]   ;;  %v5026_v63 = vld [vmem:[%s7151_s3 + $0xcc] ss:$16 sps:$4 sm:$0xff]  }
  0x16   :  { %v5033_v0 = vld [vmem:[%s7151_s3 + $0x100] ss:$16 sps:$4 sm:$0xff]   ;;  %v5041_v1 = vld [vmem:[%s7151_s3 + $0x124] ss:$16 sps:$4 sm:$0xff]   ;;  %v5024_v2 = vld [vmem:[%s7151_s3 + $0xc8] ss:$16 sps:$4 sm:$0xff]  }
  0x17   :  { %253 = vmatpush1.bf16.msra.mxu0 %v4954_v17  ;;  %294 = vmatpush1.bf16.msra.mxu1 %v4978_v30  ;;  %v5032_v3 = vld [vmem:[%s7151_s3 + $0xec] ss:$16 sps:$4 sm:$0xff]   ;;  %v5039_v4 = vld [vmem:[%s7151_s3 + $0x120] ss:$16 sps:$4 sm:$0xff]   ;;  %v5047_v5 = vld [vmem:[%s7151_s3 + $0x144] ss:$16 sps:$4 sm:$0xff]  }
  0x18   :  { %254 = vmatprep.subr.bf16.mxu0 %v4955_v20  ;;  %295 = vmatprep.subr.bf16.mxu1 %v4979_v31  ;;  %v5030_v6 = vld [vmem:[%s7151_s3 + $0xe8] ss:$16 sps:$4 sm:$0xff]   ;;  %v5038_v7 = vld [vmem:[%s7151_s3 + $0x10c] ss:$16 sps:$4 sm:$0xff]   ;;  %v5045_v8 = vld [vmem:[%s7151_s3 + $0x140] ss:$16 sps:$4 sm:$0xff]  }
  0x19   :  { %v5053_v9 = vld [vmem:[%s7151_s3 + $0x164] ss:$16 sps:$4 sm:$0xff]   ;;  %v5036_v10 = vld [vmem:[%s7151_s3 + $0x108] ss:$16 sps:$4 sm:$0xff]   ;;  %v5044_v11 = vld [vmem:[%s7151_s3 + $0x12c] ss:$16 sps:$4 sm:$0xff]  }
  0x1a   :  { %v5051_v12 = vld [vmem:[%s7151_s3 + $0x160] ss:$16 sps:$4 sm:$0xff]   ;;  %v5059_v13 = vld [vmem:[%s7151_s3 + $0x184] ss:$16 sps:$4 sm:$0xff]   ;;  %v5042_v14 = vld [vmem:[%s7151_s3 + $0x128] ss:$16 sps:$4 sm:$0xff]  }
  0x1b   :  { %255 = vmatpush1.bf16.msra.mxu0 %v4957_v21  ;;  %296 = vmatpush1.bf16.msra.mxu1 %v4981_v34  ;;  %v5050_v15 = vld [vmem:[%s7151_s3 + $0x14c] ss:$16 sps:$4 sm:$0xff]   ;;  %v5057_v16 = vld [vmem:[%s7151_s3 + $0x180] ss:$16 sps:$4 sm:$0xff]   ;;  %v5065_v17 = vld [vmem:[%s7151_s3 + $0x1a4] ss:$16 sps:$4 sm:$0xff]  }
  0x1c   :  { %256 = vmatprep.subr.bf16.mxu0 %v4958_v24  ;;  %297 = vmatprep.subr.bf16.mxu1 %v4982_v35  ;;  %v5048_v18 = vld [vmem:[%s7151_s3 + $0x148] ss:$16 sps:$4 sm:$0xff]   ;;  %v5056_v19 = vld [vmem:[%s7151_s3 + $0x16c] ss:$16 sps:$4 sm:$0xff]   ;;  %v5063_v20 = vld [vmem:[%s7151_s3 + $0x1a0] ss:$16 sps:$4 sm:$0xff]  }
  0x1d   :  { %v5054_v21 = vld [vmem:[%s7151_s3 + $0x168] ss:$16 sps:$4 sm:$0xff]   ;;  %v5062_v22 = vld [vmem:[%s7151_s3 + $0x18c] ss:$16 sps:$4 sm:$0xff]   ;;  %v5071_v26 = vld [vmem:[%s7151_s3 + $0x1c4] ss:$16 sps:$4 sm:$0xff]  }
  0x1e   :  { %v5060_v23 = vld [vmem:[%s7151_s3 + $0x188] ss:$16 sps:$4 sm:$0xff]   ;;  %v5068_v24 = vld [vmem:[%s7151_s3 + $0x1ac] ss:$16 sps:$4 sm:$0xff]   ;;  %v5077_v30 = vld [vmem:[%s7151_s3 + $0x1e4] ss:$16 sps:$4 sm:$0xff]  }
  0x1f   :  { %257 = vmatpush1.bf16.msra.mxu0 %v4960_v25  ;;  %298 = vmatpush1.bf16.msra.mxu1 %v4984_v38  ;;  %v5066_v25 = vld [vmem:[%s7151_s3 + $0x1a8] ss:$16 sps:$4 sm:$0xff]   ;;  %v5074_v27 = vld [vmem:[%s7151_s3 + $0x1cc] ss:$16 sps:$4 sm:$0xff]   ;;  %v5083_v34 = vld [vmem:[%s7151_s3 + $0x204] ss:$16 sps:$4 sm:$0xff]  }
  0x20   :  { %1122 = vmatprep.subr.bf16.mxu0 %v4987_v28  ;;  %1204 = vmatprep.subr.bf16.mxu1 %v4990_v39  ;;  %v5069_v28 = vld [vmem:[%s7151_s3 + $0x1c0] ss:$16 sps:$4 sm:$0xff]   ;;  %v5080_v31 = vld [vmem:[%s7151_s3 + $0x1ec] ss:$16 sps:$4 sm:$0xff]  }
  0x21   :  { %v5086_v35 = vld [vmem:[%s7151_s3 + $0x20c] ss:$16 sps:$4 sm:$0xff]   ;;  %v5716_v39 = vld [vmem:[%s7153_s2] sm:$0xf] }
  0x22   :  { %275 = vmatmul.mubr.bf16.vlgmr.msra.gmra.mrb[0].mxu0 %v27_v29  ;;  %316 = vmatmul.mubr.bf16.vlgmr.msra.gmra.mrb[0].mxu1 %v27_v29  ;;  %v5072_v29 = vld [vmem:[%s7151_s3 + $0x1c8] ss:$16 sps:$4 sm:$0xff]  }
  0x23   :  { %1123 = vmatpush1.bf16.msra.mxu0 %v4985_v32  ;;  %1205 = vmatpush1.bf16.msra.mxu1 %v4988_v42  ;;  %v5075_v32 = vld [vmem:[%s7151_s3 + $0x1e0] ss:$16 sps:$4 sm:$0xff]  }
  0x24   :  { %1124 = vmatprep.subr.bf16.mxu0 %v4993_v33  ;;  %1206 = vmatprep.subr.bf16.mxu1 %v4996_v43  ;;  %v5078_v33 = vld [vmem:[%s7151_s3 + $0x1e8] ss:$16 sps:$4 sm:$0xff]  }
  0x27   :  { %1125 = vmatpush1.bf16.msra.mxu0 %v4991_v36  ;;  %1207 = vmatpush1.bf16.msra.mxu1 %v4994_v46  ;;  %v62_v36 = vlaneseq }
  0x28   :  { %1126 = vmatprep.subr.bf16.mxu0 %v4999_v37  ;;  %1208 = vmatprep.subr.bf16.mxu1 %v5002_v47 }
  0x29   :  { %v5708_v37 = vshrl.u32 %v62_v36, 7  ;;  %v5143_v36 = vld [vmem:[%s7151_s3 + $0x344] ss:$16 sps:$4 sm:$0xff]  }
  0x2b   :  { %1127 = vmatpush1.bf16.msra.mxu0 %v4997_v40  ;;  %1209 = vmatpush1.bf16.msra.mxu1 %v5000_v50  ;;  %v5711_v38 = vsub.s32 0, %v5708_v37  ;;  %v5719_v40 = vsub.s32 1, %v5708_v37 }
  0x2c   :  { %1128 = vmatprep.subr.bf16.mxu0 %v5005_v41  ;;  %1210 = vmatprep.subr.bf16.mxu1 %v5008_v51  ;;  %v5726_v51 = vsub.s32 3, %v5708_v37 }
  0x2d   :  { %v65_v41 = vrot.slane %v5716_v39, %v5711_v38  ;;  %v69_v42 = vrot.slane %v5716_v39, %v5719_v40 }
  0x2f   :  { %1129 = vmatpush1.bf16.msra.mxu0 %v5003_v44  ;;  %1211 = vmatpush1.bf16.msra.mxu1 %v5006_v54  ;;  %v5084_v54 = vld [vmem:[%s7151_s3 + $0x208] ss:$16 sps:$4 sm:$0xff]  }
  0x30   :  { %1130 = vmatprep.subr.bf16.mxu0 %v5011_v45  ;;  %1212 = vmatprep.subr.bf16.mxu1 %v5014_v55 }
  0x33   :  { %1131 = vmatpush1.bf16.msra.mxu0 %v5009_v48  ;;  %1213 = vmatpush1.bf16.msra.mxu1 %v5012_v58  ;;  %v77_v58 = vrot.slane %v5716_v39, %v5726_v51 }
  0x34   :  { %1132 = vmatprep.subr.bf16.mxu0 %v5017_v49  ;;  %1214 = vmatprep.subr.bf16.mxu1 %v5020_v59  ;;  %v5087_v59 = vld [vmem:[%s7151_s3 + $0x220] ss:$16 sps:$4 sm:$0xff]  }
  0x37   :  { %1133 = vmatpush1.bf16.msra.mxu0 %v5015_v52  ;;  %1215 = vmatpush1.bf16.msra.mxu1 %v5018_v62  ;;  %v5098_v62 = vld [vmem:[%s7151_s3 + $0x24c] ss:$16 sps:$4 sm:$0xff]  }
  0x38   :  { %1134 = vmatprep.subr.bf16.mxu0 %v5023_v53  ;;  %1216 = vmatprep.subr.bf16.mxu1 %v5026_v63  ;;  %v5081_v53 = vld [vmem:[%s7151_s3 + $0x200] ss:$16 sps:$4 sm:$0xff]  }
  0x3b   :  { %1135 = vmatpush1.bf16.msra.mxu0 %v5021_v56  ;;  %1217 = vmatpush1.bf16.msra.mxu1 %v5024_v2  ;;  %v5089_v56 = vld [vmem:[%s7151_s3 + $0x224] ss:$16 sps:$4 sm:$0xff]  }
  0x3c   :  { %1136 = vmatprep.subr.bf16.mxu0 %v5029_v57  ;;  %1218 = vmatprep.subr.bf16.mxu1 %v5032_v3  ;;  %v5092_v57 = vld [vmem:[%s7151_s3 + $0x22c] ss:$16 sps:$4 sm:$0xff]   ;;  %v5093_v3 = vld [vmem:[%s7151_s3 + $0x240] ss:$16 sps:$4 sm:$0xff]  }
  0x3f   :  { %1137 = vmatpush1.bf16.msra.mxu0 %v5027_v60  ;;  %1219 = vmatpush1.bf16.msra.mxu1 %v5030_v6  ;;  %v5090_v60 = vld [vmem:[%s7151_s3 + $0x228] ss:$16 sps:$4 sm:$0xff]   ;;  %v5101_v6 = vld [vmem:[%s7151_s3 + $0x264] ss:$16 sps:$4 sm:$0xff]  }
  0x40   :  { %1138 = vmatprep.subr.bf16.mxu0 %v5035_v61  ;;  %1220 = vmatprep.subr.bf16.mxu1 %v5038_v7  ;;  %v5095_v61 = vld [vmem:[%s7151_s3 + $0x244] ss:$16 sps:$4 sm:$0xff]   ;;  %v5104_v7 = vld [vmem:[%s7151_s3 + $0x26c] ss:$16 sps:$4 sm:$0xff]  }
  0x43   :  { %1139 = vmatpush1.bf16.msra.mxu0 %v5033_v0  ;;  %1221 = vmatpush1.bf16.msra.mxu1 %v5036_v10  ;;  %v5099_v10 = vld [vmem:[%s7151_s3 + $0x260] ss:$16 sps:$4 sm:$0xff]  }
  0x44   :  { %1140 = vmatprep.subr.bf16.mxu0 %v5041_v1  ;;  %1222 = vmatprep.subr.bf16.mxu1 %v5044_v11  ;;  %v5102_v11 = vld [vmem:[%s7151_s3 + $0x268] ss:$16 sps:$4 sm:$0xff]  }
  0x47   :  { %1141 = vmatpush1.bf16.msra.mxu0 %v5039_v4  ;;  %1223 = vmatpush1.bf16.msra.mxu1 %v5042_v14  ;;  %v5096_v4 = vld [vmem:[%s7151_s3 + $0x248] ss:$16 sps:$4 sm:$0xff]   ;;  %v5105_v14 = vld [vmem:[%s7151_s3 + $0x280] ss:$16 sps:$4 sm:$0xff]  }
  0x48   :  { %1142 = vmatprep.subr.bf16.mxu0 %v5047_v5  ;;  %1224 = vmatprep.subr.bf16.mxu1 %v5050_v15  ;;  %v5108_v15 = vld [vmem:[%s7151_s3 + $0x288] ss:$16 sps:$4 sm:$0xff]  }
  0x4b   :  { %1143 = vmatpush1.bf16.msra.mxu0 %v5045_v8  ;;  %1225 = vmatpush1.bf16.msra.mxu1 %v5048_v18  ;;  %v5111_v18 = vld [vmem:[%s7151_s3 + $0x2a0] ss:$16 sps:$4 sm:$0xff]  }
  0x4c   :  { %1144 = vmatprep.subr.bf16.mxu0 %v5053_v9  ;;  %1226 = vmatprep.subr.bf16.mxu1 %v5056_v19  ;;  %v5114_v19 = vld [vmem:[%s7151_s3 + $0x2a8] ss:$16 sps:$4 sm:$0xff]  }
  0x4f   :  { %1145 = vmatpush1.bf16.msra.mxu0 %v5051_v12  ;;  %1227 = vmatpush1.bf16.msra.mxu1 %v5054_v21  ;;  %v5107_v12 = vld [vmem:[%s7151_s3 + $0x284] ss:$16 sps:$4 sm:$0xff]   ;;  %v5122_v21 = vld [vmem:[%s7151_s3 + $0x2cc] ss:$16 sps:$4 sm:$0xff]  }
  0x50   :  { %1146 = vmatprep.subr.bf16.mxu0 %v5059_v13  ;;  %1228 = vmatprep.subr.bf16.mxu1 %v5062_v22  ;;  %v5110_v13 = vld [vmem:[%s7151_s3 + $0x28c] ss:$16 sps:$4 sm:$0xff]   ;;  %v5117_v22 = vld [vmem:[%s7151_s3 + $0x2c0] ss:$16 sps:$4 sm:$0xff]  }
  0x53   :  { %1147 = vmatpush1.bf16.msra.mxu0 %v5057_v16  ;;  %1229 = vmatpush1.bf16.msra.mxu1 %v5060_v23  ;;  %v5113_v16 = vld [vmem:[%s7151_s3 + $0x2a4] ss:$16 sps:$4 sm:$0xff]   ;;  %v5120_v23 = vld [vmem:[%s7151_s3 + $0x2c8] ss:$16 sps:$4 sm:$0xff]  }
  0x54   :  { %1148 = vmatprep.subr.bf16.mxu0 %v5065_v17  ;;  %1230 = vmatprep.subr.bf16.mxu1 %v5068_v24  ;;  %v5116_v17 = vld [vmem:[%s7151_s3 + $0x2ac] ss:$16 sps:$4 sm:$0xff]   ;;  %v5125_v24 = vld [vmem:[%s7151_s3 + $0x2e4] ss:$16 sps:$4 sm:$0xff]  }
  0x57   :  { %1149 = vmatpush1.bf16.msra.mxu0 %v5063_v20  ;;  %1231 = vmatpush1.bf16.msra.mxu1 %v5066_v25  ;;  %v5119_v20 = vld [vmem:[%s7151_s3 + $0x2c4] ss:$16 sps:$4 sm:$0xff]   ;;  %v5128_v25 = vld [vmem:[%s7151_s3 + $0x2ec] ss:$16 sps:$4 sm:$0xff]  }
  0x58   :  { %1150 = vmatprep.subr.bf16.mxu0 %v5071_v26  ;;  %1232 = vmatprep.subr.bf16.mxu1 %v5074_v27  ;;  %v5123_v26 = vld [vmem:[%s7151_s3 + $0x2e0] ss:$16 sps:$4 sm:$0xff]   ;;  %v5126_v27 = vld [vmem:[%s7151_s3 + $0x2e8] ss:$16 sps:$4 sm:$0xff]  }
  0x5b   :  { %1151 = vmatpush1.bf16.msra.mxu0 %v5069_v28  ;;  %1233 = vmatpush1.bf16.msra.mxu1 %v5072_v29  ;;  %v5131_v28 = vld [vmem:[%s7151_s3 + $0x304] ss:$16 sps:$4 sm:$0xff]   ;;  %v5134_v29 = vld [vmem:[%s7151_s3 + $0x30c] ss:$16 sps:$4 sm:$0xff]  }
  0x5c   :  { %1152 = vmatprep.subr.bf16.mxu0 %v5077_v30  ;;  %1234 = vmatprep.subr.bf16.mxu1 %v5080_v31  ;;  %v5129_v30 = vld [vmem:[%s7151_s3 + $0x300] ss:$16 sps:$4 sm:$0xff]   ;;  %v5132_v31 = vld [vmem:[%s7151_s3 + $0x308] ss:$16 sps:$4 sm:$0xff]  }
  0x5f   :  { %1153 = vmatpush1.bf16.msra.mxu0 %v5075_v32  ;;  %1235 = vmatpush1.bf16.msra.mxu1 %v5078_v33  ;;  %v5137_v32 = vld [vmem:[%s7151_s3 + $0x324] ss:$16 sps:$4 sm:$0xff]   ;;  %v5140_v33 = vld [vmem:[%s7151_s3 + $0x32c] ss:$16 sps:$4 sm:$0xff]  }
  0x60   :  { %1163 = vmatprep.subr.bf16.mxu0 %v5083_v34  ;;  %1245 = vmatprep.subr.bf16.mxu1 %v5086_v35  ;;  %v5135_v34 = vld [vmem:[%s7151_s3 + $0x320] ss:$16 sps:$4 sm:$0xff]   ;;  %v5138_v35 = vld [vmem:[%s7151_s3 + $0x328] ss:$16 sps:$4 sm:$0xff]  }
  0xf5   :  { %v276_v43 = vpop.f32.mrb[0].mxu0  ;;  %v5754_v63 = vpop.f32.mrb[0].mxu1 }
  0xf6   :  { %v277_v44 = vadd.f32 %v276_v43, %v65_v41  ;;  %v278_v45 = vpop.f32.mrb[1].mxu0  ;;  %v319_v0 = vpop.f32.mrb[1].mxu1  ;;  %v5146_v41 = vld [vmem:[%s7151_s3 + $0x34c] ss:$16 sps:$4 sm:$0xff]   ;;  %v5144_v43 = vld [vmem:[%s7151_s3 + $0x348] ss:$16 sps:$4 sm:$0xff]  }
  0xf7   :  { %v279_v46 = vadd.f32 %v278_v45, %v69_v42  ;;  %v280_v47 = vpop.f32.mrb[2].mxu0  ;;  %v320_v1 = vadd.f32 %v319_v0, %v77_v58  ;;  %v321_v2 = vpop.f32.mrb[2].mxu1  ;;  %v5141_v42 = vld [vmem:[%s7151_s3 + $0x340] ss:$16 sps:$4 sm:$0xff]   ;;  %v5152_v45 = vld [vmem:[%s7151_s3 + $0x36c] ss:$16 sps:$4 sm:$0xff]  }
  0xf8   :  { %v324_v48 = vmax.f32 %v277_v44, 0.0  ;;  %v281_v49 = vpop.f32.mrb[3].mxu0  ;;  %v322_v5 = vpop.f32.mrb[3].mxu1  ;;  %v5149_v44 = vld [vmem:[%s7151_s3 + $0x364] ss:$16 sps:$4 sm:$0xff]  }
  0xf9   :  { %v325_v50 = vmax.f32 %v279_v46, 0.0  ;;  %v327_v8 = vmax.f32 %v320_v1, 0.0  ;;  %v5147_v46 = vld [vmem:[%s7151_s3 + $0x360] ss:$16 sps:$4 sm:$0xff]   ;;  %v5150_v47 = vld [vmem:[%s7151_s3 + $0x368] ss:$16 sps:$4 sm:$0xff]  }
  0xfa   :  { %v328_v55 = vpack.c.bf16 %v324_v48, %v324_v48  ;;  %v5155_v48 = vld [vmem:[%s7151_s3 + $0x384] ss:$16 sps:$4 sm:$0xff]   ;;  %v5158_v49 = vld [vmem:[%s7151_s3 + $0x38c] ss:$16 sps:$4 sm:$0xff]   ;;  %v5171_v2 = vld [vmem:[%s7151_s3 + $0x3e0] ss:$16 sps:$4 sm:$0xff]  }
  0xfb   :  { %v329_v52 = vpack.c.bf16 %v325_v50, %v325_v50  ;;  %v331_v9 = vpack.c.bf16 %v327_v8, %v327_v8  ;;  %v5153_v50 = vld [vmem:[%s7151_s3 + $0x380] ss:$16 sps:$4 sm:$0xff]   ;;  %v5173_v0 = vld [vmem:[%s7151_s3 + $0x3e4] ss:$16 sps:$4 sm:$0xff]   ;;  %v5176_v1 = vld [vmem:[%s7151_s3 + $0x3ec] ss:$16 sps:$4 sm:$0xff]  }
  0xfc   :  { %v5182_v5 = vld [vmem:[%s7151_s3 + $0x40c] ss:$16 sps:$4 sm:$0xff]  }
  0xfd   :  { %1154 = vmatprep.mubr.bf16.mxu0 %v329_v52  ;;  %1236 = vmatprep.mubr.bf16.mxu1 %v329_v52  ;;  %v5156_v52 = vld [vmem:[%s7151_s3 + $0x388] ss:$16 sps:$4 sm:$0xff]  }
  0xfe   :  { %1155 = vmatmul.mubr.bf16.vlgmr.msra.gmra.mrb[4].mxu0 %v328_v55  ;;  %1237 = vmatmul.mubr.bf16.vlgmr.msra.gmra.mrb[4].mxu1 %v328_v55  ;;  %v5164_v55 = vld [vmem:[%s7151_s3 + $0x3ac] ss:$16 sps:$4 sm:$0xff]  }
  0xff   :  { %1164 = vmatpush1.bf16.msra.mxu0 %v5081_v53  ;;  %1246 = vmatpush1.bf16.msra.mxu1 %v5084_v54  ;;  %v5883_v53 = vsub.s32 2, %v5708_v37  ;;  %v5161_v54 = vld [vmem:[%s7151_s3 + $0x3a4] ss:$16 sps:$4 sm:$0xff]  }
 0x100   :  { %1165 = vmatprep.subr.bf16.mxu0 %v5089_v56  ;;  %1247 = vmatprep.subr.bf16.mxu1 %v5092_v57  ;;  %v5159_v56 = vld [vmem:[%s7151_s3 + $0x3a0] ss:$16 sps:$4 sm:$0xff]   ;;  %v5162_v57 = vld [vmem:[%s7151_s3 + $0x3a8] ss:$16 sps:$4 sm:$0xff]  }
 0x101   :  { %1195 = vmatprep.mubr.bf16.mxu0 %v331_v9  ;;  %1277 = vmatprep.mubr.bf16.mxu1 %v331_v9  ;;  %v73_v58 = vrot.slane %v5716_v39, %v5883_v53  ;;  %v5168_v39 = vld [vmem:[%s7151_s3 + $0x3c8] ss:$16 sps:$4 sm:$0xff]   ;;  %v5185_v9 = vld [vmem:[%s7151_s3 + $0x424] ss:$16 sps:$4 sm:$0xff]  }
 0x103   :  { %1166 = vmatpush1.bf16.msra.mxu0 %v5087_v59  ;;  %1248 = vmatpush1.bf16.msra.mxu1 %v5090_v60  ;;  %v5167_v59 = vld [vmem:[%s7151_s3 + $0x3c4] ss:$16 sps:$4 sm:$0xff]   ;;  %v5170_v60 = vld [vmem:[%s7151_s3 + $0x3cc] ss:$16 sps:$4 sm:$0xff]  }
 0x104   :  { %1167 = vmatprep.subr.bf16.mxu0 %v5095_v61  ;;  %1249 = vmatprep.subr.bf16.mxu1 %v5098_v62  ;;  %v5165_v61 = vld [vmem:[%s7151_s3 + $0x3c0] ss:$16 sps:$4 sm:$0xff]   ;;  %v318_v62 = vadd.f32 %v5754_v63, %v73_v58  ;;  %v5174_v63 = vld [vmem:[%s7151_s3 + $0x3e8] ss:$16 sps:$4 sm:$0xff]  }
 0x105   :  { %v5246_v58 = vld [vmem:[%s7151_s3 + $0x568] ss:$16 sps:$4 sm:$0xff]  }
 0x107   :  { %1168 = vmatpush1.bf16.msra.mxu0 %v5093_v3  ;;  %1250 = vmatpush1.bf16.msra.mxu1 %v5096_v4  ;;  %v326_v3 = vmax.f32 %v318_v62, 0.0  ;;  %v5179_v4 = vld [vmem:[%s7151_s3 + $0x404] ss:$16 sps:$4 sm:$0xff]  }
 0x108   :  { %1169 = vmatprep.subr.bf16.mxu0 %v5101_v6  ;;  %1251 = vmatprep.subr.bf16.mxu1 %v5104_v7  ;;  %v5177_v6 = vld [vmem:[%s7151_s3 + $0x400] ss:$16 sps:$4 sm:$0xff]   ;;  %v5180_v7 = vld [vmem:[%s7151_s3 + $0x408] ss:$16 sps:$4 sm:$0xff]   ;;  %v5257_v62 = vld [vmem:[%s7151_s3 + $0x5a4] ss:$16 sps:$4 sm:$0xff]  }
 0x109   :  { %v330_v8 = vpack.c.bf16 %v326_v3, %v326_v3  ;;  %v5266_v3 = vld [vmem:[%s7151_s3 + $0x5cc] ss:$16 sps:$4 sm:$0xff]  }
 0x10b   :  { %1170 = vmatpush1.bf16.msra.mxu0 %v5099_v10  ;;  %1252 = vmatpush1.bf16.msra.mxu1 %v5102_v11  ;;  %v5188_v10 = vld [vmem:[%s7151_s3 + $0x42c] ss:$16 sps:$4 sm:$0xff]   ;;  %v5183_v11 = vld [vmem:[%s7151_s3 + $0x420] ss:$16 sps:$4 sm:$0xff]  }
 0x10c   :  { %1171 = vmatprep.subr.bf16.mxu0 %v5107_v12  ;;  %1253 = vmatprep.subr.bf16.mxu1 %v5110_v13  ;;  %v5186_v12 = vld [vmem:[%s7151_s3 + $0x428] ss:$16 sps:$4 sm:$0xff]   ;;  %v5191_v13 = vld [vmem:[%s7151_s3 + $0x444] ss:$16 sps:$4 sm:$0xff]  }
 0x10f   :  { %1172 = vmatpush1.bf16.msra.mxu0 %v5105_v14  ;;  %1254 = vmatpush1.bf16.msra.mxu1 %v5108_v15  ;;  %v5194_v14 = vld [vmem:[%s7151_s3 + $0x44c] ss:$16 sps:$4 sm:$0xff]   ;;  %v5189_v15 = vld [vmem:[%s7151_s3 + $0x440] ss:$16 sps:$4 sm:$0xff]  }
 0x110   :  { %1173 = vmatprep.subr.bf16.mxu0 %v5113_v16  ;;  %1255 = vmatprep.subr.bf16.mxu1 %v5116_v17  ;;  %v5192_v16 = vld [vmem:[%s7151_s3 + $0x448] ss:$16 sps:$4 sm:$0xff]   ;;  %v5197_v17 = vld [vmem:[%s7151_s3 + $0x464] ss:$16 sps:$4 sm:$0xff]  }
 0x113   :  { %1174 = vmatpush1.bf16.msra.mxu0 %v5111_v18  ;;  %1256 = vmatpush1.bf16.msra.mxu1 %v5114_v19  ;;  %v5200_v18 = vld [vmem:[%s7151_s3 + $0x46c] ss:$16 sps:$4 sm:$0xff]   ;;  %v5195_v19 = vld [vmem:[%s7151_s3 + $0x460] ss:$16 sps:$4 sm:$0xff]  }
 0x114   :  { %1175 = vmatprep.subr.bf16.mxu0 %v5119_v20  ;;  %1257 = vmatprep.subr.bf16.mxu1 %v5122_v21  ;;  %v5198_v20 = vld [vmem:[%s7151_s3 + $0x468] ss:$16 sps:$4 sm:$0xff]   ;;  %v5203_v21 = vld [vmem:[%s7151_s3 + $0x484] ss:$16 sps:$4 sm:$0xff]  }
 0x117   :  { %1176 = vmatpush1.bf16.msra.mxu0 %v5117_v22  ;;  %1258 = vmatpush1.bf16.msra.mxu1 %v5120_v23  ;;  %v5206_v22 = vld [vmem:[%s7151_s3 + $0x48c] ss:$16 sps:$4 sm:$0xff]   ;;  %v5201_v23 = vld [vmem:[%s7151_s3 + $0x480] ss:$16 sps:$4 sm:$0xff]  }
 0x118   :  { %1177 = vmatprep.subr.bf16.mxu0 %v5125_v24  ;;  %1259 = vmatprep.subr.bf16.mxu1 %v5128_v25  ;;  %v5204_v24 = vld [vmem:[%s7151_s3 + $0x488] ss:$16 sps:$4 sm:$0xff]   ;;  %v5209_v25 = vld [vmem:[%s7151_s3 + $0x4a4] ss:$16 sps:$4 sm:$0xff]  }
 0x11b   :  { %1178 = vmatpush1.bf16.msra.mxu0 %v5123_v26  ;;  %1260 = vmatpush1.bf16.msra.mxu1 %v5126_v27  ;;  %v5212_v26 = vld [vmem:[%s7151_s3 + $0x4ac] ss:$16 sps:$4 sm:$0xff]   ;;  %v5207_v27 = vld [vmem:[%s7151_s3 + $0x4a0] ss:$16 sps:$4 sm:$0xff]  }
 0x11c   :  { %1179 = vmatprep.subr.bf16.mxu0 %v5131_v28  ;;  %1261 = vmatprep.subr.bf16.mxu1 %v5134_v29  ;;  %v5210_v28 = vld [vmem:[%s7151_s3 + $0x4a8] ss:$16 sps:$4 sm:$0xff]   ;;  %v5215_v29 = vld [vmem:[%s7151_s3 + $0x4c4] ss:$16 sps:$4 sm:$0xff]  }
 0x11f   :  { %1180 = vmatpush1.bf16.msra.mxu0 %v5129_v30  ;;  %1262 = vmatpush1.bf16.msra.mxu1 %v5132_v31  ;;  %v5218_v30 = vld [vmem:[%s7151_s3 + $0x4cc] ss:$16 sps:$4 sm:$0xff]   ;;  %v5213_v31 = vld [vmem:[%s7151_s3 + $0x4c0] ss:$16 sps:$4 sm:$0xff]  }
 0x120   :  { %1181 = vmatprep.subr.bf16.mxu0 %v5137_v32  ;;  %1263 = vmatprep.subr.bf16.mxu1 %v5140_v33  ;;  %v5216_v32 = vld [vmem:[%s7151_s3 + $0x4c8] ss:$16 sps:$4 sm:$0xff]   ;;  %v5221_v33 = vld [vmem:[%s7151_s3 + $0x4e4] ss:$16 sps:$4 sm:$0xff]  }
 0x123   :  { %1182 = vmatpush1.bf16.msra.mxu0 %v5135_v34  ;;  %1264 = vmatpush1.bf16.msra.mxu1 %v5138_v35  ;;  %v5224_v34 = vld [vmem:[%s7151_s3 + $0x4ec] ss:$16 sps:$4 sm:$0xff]   ;;  %v5219_v35 = vld [vmem:[%s7151_s3 + $0x4e0] ss:$16 sps:$4 sm:$0xff]  }
 0x124   :  { %1183 = vmatprep.subr.bf16.mxu0 %v5143_v36  ;;  %1265 = vmatprep.subr.bf16.mxu1 %v5146_v41  ;;  %v5222_v36 = vld [vmem:[%s7151_s3 + $0x4e8] ss:$16 sps:$4 sm:$0xff]   ;;  %v5227_v41 = vld [vmem:[%s7151_s3 + $0x504] ss:$16 sps:$4 sm:$0xff]  }
 0x127   :  { %1184 = vmatpush1.bf16.msra.mxu0 %v5141_v42  ;;  %1266 = vmatpush1.bf16.msra.mxu1 %v5144_v43  ;;  %v5230_v42 = vld [vmem:[%s7151_s3 + $0x50c] ss:$16 sps:$4 sm:$0xff]   ;;  %v5225_v43 = vld [vmem:[%s7151_s3 + $0x500] ss:$16 sps:$4 sm:$0xff]  }
 0x128   :  { %1185 = vmatprep.subr.bf16.mxu0 %v5149_v44  ;;  %1267 = vmatprep.subr.bf16.mxu1 %v5152_v45  ;;  %v5228_v44 = vld [vmem:[%s7151_s3 + $0x508] ss:$16 sps:$4 sm:$0xff]   ;;  %v5233_v45 = vld [vmem:[%s7151_s3 + $0x524] ss:$16 sps:$4 sm:$0xff]  }
 0x12b   :  { %1186 = vmatpush1.bf16.msra.mxu0 %v5147_v46  ;;  %1268 = vmatpush1.bf16.msra.mxu1 %v5150_v47  ;;  %v5236_v46 = vld [vmem:[%s7151_s3 + $0x52c] ss:$16 sps:$4 sm:$0xff]   ;;  %v5231_v47 = vld [vmem:[%s7151_s3 + $0x520] ss:$16 sps:$4 sm:$0xff]  }
 0x12c   :  { %1187 = vmatprep.subr.bf16.mxu0 %v5155_v48  ;;  %1269 = vmatprep.subr.bf16.mxu1 %v5158_v49  ;;  %v5234_v48 = vld [vmem:[%s7151_s3 + $0x528] ss:$16 sps:$4 sm:$0xff]   ;;  %v5239_v49 = vld [vmem:[%s7151_s3 + $0x544] ss:$16 sps:$4 sm:$0xff]  }
 0x12f   :  { %1188 = vmatpush1.bf16.msra.mxu0 %v5153_v50  ;;  %1270 = vmatpush1.bf16.msra.mxu1 %v5156_v52  ;;  %v5242_v50 = vld [vmem:[%s7151_s3 + $0x54c] ss:$16 sps:$4 sm:$0xff]   ;;  %v5237_v52 = vld [vmem:[%s7151_s3 + $0x540] ss:$16 sps:$4 sm:$0xff]  }
 0x130   :  { %1189 = vmatprep.subr.bf16.mxu0 %v5161_v54  ;;  %1271 = vmatprep.subr.bf16.mxu1 %v5164_v55  ;;  %v5240_v54 = vld [vmem:[%s7151_s3 + $0x548] ss:$16 sps:$4 sm:$0xff]   ;;  %v5245_v55 = vld [vmem:[%s7151_s3 + $0x564] ss:$16 sps:$4 sm:$0xff]  }
 0x133   :  { %1190 = vmatpush1.bf16.msra.mxu0 %v5159_v56  ;;  %1272 = vmatpush1.bf16.msra.mxu1 %v5162_v57  ;;  %v5248_v56 = vld [vmem:[%s7151_s3 + $0x56c] ss:$16 sps:$4 sm:$0xff]   ;;  %v5243_v57 = vld [vmem:[%s7151_s3 + $0x560] ss:$16 sps:$4 sm:$0xff]  }
 0x134   :  { %1191 = vmatprep.subr.bf16.mxu0 %v5167_v59  ;;  %1273 = vmatprep.subr.bf16.mxu1 %v5170_v60  ;;  %v5251_v59 = vld [vmem:[%s7151_s3 + $0x584] ss:$16 sps:$4 sm:$0xff]   ;;  %v5254_v60 = vld [vmem:[%s7151_s3 + $0x58c] ss:$16 sps:$4 sm:$0xff]  }
 0x137   :  { %1192 = vmatpush1.bf16.msra.mxu0 %v5165_v61  ;;  %1274 = vmatpush1.bf16.msra.mxu1 %v5168_v39  ;;  %v5249_v61 = vld [vmem:[%s7151_s3 + $0x580] ss:$16 sps:$4 sm:$0xff]   ;;  %v5252_v39 = vld [vmem:[%s7151_s3 + $0x588] ss:$16 sps:$4 sm:$0xff]  }
 0x138   :  { %1193 = vmatprep.subr.bf16.mxu0 %v5173_v0  ;;  %1275 = vmatprep.subr.bf16.mxu1 %v5176_v1  ;;  %v5260_v0 = vld [vmem:[%s7151_s3 + $0x5ac] ss:$16 sps:$4 sm:$0xff]   ;;  %v5255_v1 = vld [vmem:[%s7151_s3 + $0x5a0] ss:$16 sps:$4 sm:$0xff]  }
 0x13b   :  { %1194 = vmatpush1.bf16.msra.mxu0 %v5171_v2  ;;  %1276 = vmatpush1.bf16.msra.mxu1 %v5174_v63  ;;  %v5258_v2 = vld [vmem:[%s7151_s3 + $0x5a8] ss:$16 sps:$4 sm:$0xff]   ;;  %v5263_v63 = vld [vmem:[%s7151_s3 + $0x5c4] ss:$16 sps:$4 sm:$0xff]  }
 0x13c   :  { %2086 = vmatprep.subr.bf16.mxu0 %v5179_v4  ;;  %2168 = vmatprep.subr.bf16.mxu1 %v5182_v5  ;;  %v5261_v4 = vld [vmem:[%s7151_s3 + $0x5c0] ss:$16 sps:$4 sm:$0xff]   ;;  %v5264_v5 = vld [vmem:[%s7151_s3 + $0x5c8] ss:$16 sps:$4 sm:$0xff]  }
 0x13e   :  { %1196 = vmatmul.mubr.bf16.vlgmr.msra.gmra.mrb[4].mxu0 %v330_v8  ;;  %1278 = vmatmul.mubr.bf16.vlgmr.msra.gmra.mrb[4].mxu1 %v330_v8  ;;  %v5267_v8 = vld [vmem:[%s7151_s3 + $0x5e0] ss:$16 sps:$4 sm:$0xff]  }
 0x13f   :  { %2087 = vmatpush1.bf16.msra.mxu0 %v5177_v6  ;;  %2169 = vmatpush1.bf16.msra.mxu1 %v5180_v7  ;;  %v5269_v6 = vld [vmem:[%s7151_s3 + $0x5e4] ss:$16 sps:$4 sm:$0xff]   ;;  %v5272_v7 = vld [vmem:[%s7151_s3 + $0x5ec] ss:$16 sps:$4 sm:$0xff]  }
 0x140   :  { %2088 = vmatprep.subr.bf16.mxu0 %v5185_v9  ;;  %2170 = vmatprep.subr.bf16.mxu1 %v5188_v10  ;;  %v5270_v9 = vld [vmem:[%s7151_s3 + $0x5e8] ss:$16 sps:$4 sm:$0xff]   ;;  %v5275_v10 = vld [vmem:[%s7151_s3 + $0x604] ss:$16 sps:$4 sm:$0xff]  }
 0x143   :  { %2089 = vmatpush1.bf16.msra.mxu0 %v5183_v11  ;;  %2171 = vmatpush1.bf16.msra.mxu1 %v5186_v12  ;;  %v5278_v11 = vld [vmem:[%s7151_s3 + $0x60c] ss:$16 sps:$4 sm:$0xff]   ;;  %v6125_v12 = vld [vmem:[%s7154_s4] sm:$0xf] }
 0x144   :  { %2090 = vmatprep.subr.bf16.mxu0 %v5191_v13  ;;  %2172 = vmatprep.subr.bf16.mxu1 %v5194_v14  ;;  %v465_v13 = vrot.slane %v6125_v12, %v5711_v38  ;;  %v469_v14 = vrot.slane %v6125_v12, %v5719_v40 }
 0x147   :  { %2091 = vmatpush1.bf16.msra.mxu0 %v5189_v15  ;;  %2173 = vmatpush1.bf16.msra.mxu1 %v5192_v16  ;;  %v477_v15 = vrot.slane %v6125_v12, %v5726_v51 }
 0x148   :  { %2092 = vmatprep.subr.bf16.mxu0 %v5197_v17  ;;  %2174 = vmatprep.subr.bf16.mxu1 %v5200_v18 }
 0x14b   :  { %2093 = vmatpush1.bf16.msra.mxu0 %v5195_v19  ;;  %2175 = vmatpush1.bf16.msra.mxu1 %v5198_v20 }
 0x14c   :  { %2094 = vmatprep.subr.bf16.mxu0 %v5203_v21  ;;  %2176 = vmatprep.subr.bf16.mxu1 %v5206_v22 }
 0x14f   :  { %2095 = vmatpush1.bf16.msra.mxu0 %v5201_v23  ;;  %2177 = vmatpush1.bf16.msra.mxu1 %v5204_v24 }
 0x150   :  { %2096 = vmatprep.subr.bf16.mxu0 %v5209_v25  ;;  %2178 = vmatprep.subr.bf16.mxu1 %v5212_v26 }
 0x153   :  { %2097 = vmatpush1.bf16.msra.mxu0 %v5207_v27  ;;  %2179 = vmatpush1.bf16.msra.mxu1 %v5210_v28 }
 0x154   :  { %2098 = vmatprep.subr.bf16.mxu0 %v5215_v29  ;;  %2180 = vmatprep.subr.bf16.mxu1 %v5218_v30 }
 0x157   :  { %2099 = vmatpush1.bf16.msra.mxu0 %v5213_v31  ;;  %2181 = vmatpush1.bf16.msra.mxu1 %v5216_v32  ;;  %v5273_v31 = vld [vmem:[%s7151_s3 + $0x600] ss:$16 sps:$4 sm:$0xff]   ;;  %v5276_v32 = vld [vmem:[%s7151_s3 + $0x608] ss:$16 sps:$4 sm:$0xff]  }
 0x158   :  { %2100 = vmatprep.subr.bf16.mxu0 %v5221_v33  ;;  %2182 = vmatprep.subr.bf16.mxu1 %v5224_v34  ;;  %v5281_v34 = vld [vmem:[%s7151_s3 + $0x624] ss:$16 sps:$4 sm:$0xff]  }
 0x15b   :  { %2101 = vmatpush1.bf16.msra.mxu0 %v5219_v35  ;;  %2183 = vmatpush1.bf16.msra.mxu1 %v5222_v36  ;;  %v5284_v35 = vld [vmem:[%s7151_s3 + $0x62c] ss:$16 sps:$4 sm:$0xff]  }
 0x15c   :  { %2102 = vmatprep.subr.bf16.mxu0 %v5227_v41  ;;  %2184 = vmatprep.subr.bf16.mxu1 %v5230_v42  ;;  %v5279_v41 = vld [vmem:[%s7151_s3 + $0x620] ss:$16 sps:$4 sm:$0xff]   ;;  %v5282_v42 = vld [vmem:[%s7151_s3 + $0x628] ss:$16 sps:$4 sm:$0xff]  }
 0x15f   :  { %2103 = vmatpush1.bf16.msra.mxu0 %v5225_v43  ;;  %2185 = vmatpush1.bf16.msra.mxu1 %v5228_v44  ;;  %v5287_v43 = vld [vmem:[%s7151_s3 + $0x644] ss:$16 sps:$4 sm:$0xff]   ;;  %v5290_v44 = vld [vmem:[%s7151_s3 + $0x64c] ss:$16 sps:$4 sm:$0xff]  }
 0x160   :  { %2104 = vmatprep.subr.bf16.mxu0 %v5233_v45  ;;  %2186 = vmatprep.subr.bf16.mxu1 %v5236_v46  ;;  %v5285_v45 = vld [vmem:[%s7151_s3 + $0x640] ss:$16 sps:$4 sm:$0xff]   ;;  %v5288_v46 = vld [vmem:[%s7151_s3 + $0x648] ss:$16 sps:$4 sm:$0xff]  }
 0x163   :  { %2105 = vmatpush1.bf16.msra.mxu0 %v5231_v47  ;;  %2187 = vmatpush1.bf16.msra.mxu1 %v5234_v48  ;;  %v5293_v47 = vld [vmem:[%s7151_s3 + $0x664] ss:$16 sps:$4 sm:$0xff]   ;;  %v5296_v48 = vld [vmem:[%s7151_s3 + $0x66c] ss:$16 sps:$4 sm:$0xff]  }
 0x164   :  { %2106 = vmatprep.subr.bf16.mxu0 %v5239_v49  ;;  %2188 = vmatprep.subr.bf16.mxu1 %v5242_v50  ;;  %v5291_v49 = vld [vmem:[%s7151_s3 + $0x660] ss:$16 sps:$4 sm:$0xff]   ;;  %v5294_v50 = vld [vmem:[%s7151_s3 + $0x668] ss:$16 sps:$4 sm:$0xff]  }
 0x167   :  { %2107 = vmatpush1.bf16.msra.mxu0 %v5237_v52  ;;  %2189 = vmatpush1.bf16.msra.mxu1 %v5240_v54  ;;  %v5299_v52 = vld [vmem:[%s7151_s3 + $0x684] ss:$16 sps:$4 sm:$0xff]   ;;  %v5302_v54 = vld [vmem:[%s7151_s3 + $0x68c] ss:$16 sps:$4 sm:$0xff]  }
 0x168   :  { %2108 = vmatprep.subr.bf16.mxu0 %v5245_v55  ;;  %2190 = vmatprep.subr.bf16.mxu1 %v5248_v56  ;;  %v5297_v55 = vld [vmem:[%s7151_s3 + $0x680] ss:$16 sps:$4 sm:$0xff]   ;;  %v5300_v56 = vld [vmem:[%s7151_s3 + $0x688] ss:$16 sps:$4 sm:$0xff]  }
 0x16b   :  { %2109 = vmatpush1.bf16.msra.mxu0 %v5243_v57  ;;  %2191 = vmatpush1.bf16.msra.mxu1 %v5246_v58  ;;  %v5305_v57 = vld [vmem:[%s7151_s3 + $0x6a4] ss:$16 sps:$4 sm:$0xff]   ;;  %v5308_v58 = vld [vmem:[%s7151_s3 + $0x6ac] ss:$16 sps:$4 sm:$0xff]  }
 0x16c   :  { %2110 = vmatprep.subr.bf16.mxu0 %v5251_v59  ;;  %2192 = vmatprep.subr.bf16.mxu1 %v5254_v60  ;;  %v5303_v59 = vld [vmem:[%s7151_s3 + $0x6a0] ss:$16 sps:$4 sm:$0xff]   ;;  %v5306_v60 = vld [vmem:[%s7151_s3 + $0x6a8] ss:$16 sps:$4 sm:$0xff]  }
 0x16f   :  { %2111 = vmatpush1.bf16.msra.mxu0 %v5249_v61  ;;  %2193 = vmatpush1.bf16.msra.mxu1 %v5252_v39  ;;  %v5311_v61 = vld [vmem:[%s7151_s3 + $0x6c4] ss:$16 sps:$4 sm:$0xff]   ;;  %v5314_v39 = vld [vmem:[%s7151_s3 + $0x6cc] ss:$16 sps:$4 sm:$0xff]  }
 0x170   :  { %2112 = vmatprep.subr.bf16.mxu0 %v5257_v62  ;;  %2194 = vmatprep.subr.bf16.mxu1 %v5260_v0  ;;  %v5309_v62 = vld [vmem:[%s7151_s3 + $0x6c0] ss:$16 sps:$4 sm:$0xff]   ;;  %v5312_v0 = vld [vmem:[%s7151_s3 + $0x6c8] ss:$16 sps:$4 sm:$0xff]  }
 0x173   :  { %2113 = vmatpush1.bf16.msra.mxu0 %v5255_v1  ;;  %2195 = vmatpush1.bf16.msra.mxu1 %v5258_v2  ;;  %v5317_v1 = vld [vmem:[%s7151_s3 + $0x6e4] ss:$16 sps:$4 sm:$0xff]   ;;  %v5320_v2 = vld [vmem:[%s7151_s3 + $0x6ec] ss:$16 sps:$4 sm:$0xff]  }
 0x174   :  { %2114 = vmatprep.subr.bf16.mxu0 %v5263_v63  ;;  %2196 = vmatprep.subr.bf16.mxu1 %v5266_v3  ;;  %v5315_v63 = vld [vmem:[%s7151_s3 + $0x6e0] ss:$16 sps:$4 sm:$0xff]   ;;  %v5318_v3 = vld [vmem:[%s7151_s3 + $0x6e8] ss:$16 sps:$4 sm:$0xff]  }
 0x177   :  { %2115 = vmatpush1.bf16.msra.mxu0 %v5261_v4  ;;  %2197 = vmatpush1.bf16.msra.mxu1 %v5264_v5  ;;  %v5323_v4 = vld [vmem:[%s7151_s3 + $0x704] ss:$16 sps:$4 sm:$0xff]   ;;  %v5326_v5 = vld [vmem:[%s7151_s3 + $0x70c] ss:$16 sps:$4 sm:$0xff]  }
 0x178   :  { %2116 = vmatprep.subr.bf16.mxu0 %v5269_v6  ;;  %2198 = vmatprep.subr.bf16.mxu1 %v5272_v7  ;;  %v5321_v6 = vld [vmem:[%s7151_s3 + $0x700] ss:$16 sps:$4 sm:$0xff]   ;;  %v5324_v7 = vld [vmem:[%s7151_s3 + $0x708] ss:$16 sps:$4 sm:$0xff]  }
 0x17b   :  { %2117 = vmatpush1.bf16.msra.mxu0 %v5267_v8  ;;  %2199 = vmatpush1.bf16.msra.mxu1 %v5270_v9  ;;  %v5329_v8 = vld [vmem:[%s7151_s3 + $0x724] ss:$16 sps:$4 sm:$0xff]   ;;  %v5332_v9 = vld [vmem:[%s7151_s3 + $0x72c] ss:$16 sps:$4 sm:$0xff]  }
 0x17c   :  { %2127 = vmatprep.subr.bf16.mxu0 %v5275_v10  ;;  %2209 = vmatprep.subr.bf16.mxu1 %v5278_v11  ;;  %v5327_v10 = vld [vmem:[%s7151_s3 + $0x720] ss:$16 sps:$4 sm:$0xff]   ;;  %v5330_v11 = vld [vmem:[%s7151_s3 + $0x728] ss:$16 sps:$4 sm:$0xff]  }
 0x211   :  { %v1197_v16 = vpop.f32.mrb[4].mxu0  ;;  %v6133_v17 = vpop.f32.mrb[4].mxu1 }
 0x212   :  { %v4887_v18 = vadd.f32 %v1197_v16, %v465_v13  ;;  %v1199_v19 = vpop.f32.mrb[5].mxu0  ;;  %v1281_v20 = vpop.f32.mrb[5].mxu1  ;;  %v5335_v13 = vld [vmem:[%s7151_s3 + $0x744] ss:$16 sps:$4 sm:$0xff]   ;;  %v5336_v16 = vld [vmem:[%s7151_s3 + $0x748] ss:$16 sps:$4 sm:$0xff]  }
 0x213   :  { %v4888_v21 = vadd.f32 %v1199_v19, %v469_v14  ;;  %v4890_v22 = vadd.f32 %v1281_v20, %v477_v15  ;;  %v1201_v23 = vpop.f32.mrb[6].mxu0  ;;  %v1283_v24 = vpop.f32.mrb[6].mxu1  ;;  %v5338_v14 = vld [vmem:[%s7151_s3 + $0x74c] ss:$16 sps:$4 sm:$0xff]   ;;  %v5333_v15 = vld [vmem:[%s7151_s3 + $0x740] ss:$16 sps:$4 sm:$0xff]  }
 0x214   :  { %v1286_v25 = vmax.f32 %v4887_v18, 0.0  ;;  %v1202_v26 = vpop.f32.mrb[7].mxu0  ;;  %v1284_v27 = vpop.f32.mrb[7].mxu1  ;;  %v5341_v18 = vld [vmem:[%s7151_s3 + $0x764] ss:$16 sps:$4 sm:$0xff]  }
 0x215   :  { %v1287_v28 = vmax.f32 %v4888_v21, 0.0  ;;  %v1289_v29 = vmax.f32 %v4890_v22, 0.0  ;;  %v5344_v19 = vld [vmem:[%s7151_s3 + $0x76c] ss:$16 sps:$4 sm:$0xff]   ;;  %v5339_v20 = vld [vmem:[%s7151_s3 + $0x760] ss:$16 sps:$4 sm:$0xff]  }
 0x216   :  { %v1290_v33 = vpack.c.bf16 %v1286_v25, %v1286_v25  ;;  %v5342_v21 = vld [vmem:[%s7151_s3 + $0x768] ss:$16 sps:$4 sm:$0xff]   ;;  %v5347_v22 = vld [vmem:[%s7151_s3 + $0x784] ss:$16 sps:$4 sm:$0xff]   ;;  %v5350_v23 = vld [vmem:[%s7151_s3 + $0x78c] ss:$16 sps:$4 sm:$0xff]  }
 0x217   :  { %v1291_v30 = vpack.c.bf16 %v1287_v28, %v1287_v28  ;;  %v1293_v36 = vpack.c.bf16 %v1289_v29, %v1289_v29  ;;  %v5345_v24 = vld [vmem:[%s7151_s3 + $0x780] ss:$16 sps:$4 sm:$0xff]   ;;  %v5348_v25 = vld [vmem:[%s7151_s3 + $0x788] ss:$16 sps:$4 sm:$0xff]   ;;  %v5353_v26 = vld [vmem:[%s7151_s3 + $0x7a4] ss:$16 sps:$4 sm:$0xff]  }
 0x218   :  { %v5356_v27 = vld [vmem:[%s7151_s3 + $0x7ac] ss:$16 sps:$4 sm:$0xff]   ;;  %v5351_v28 = vld [vmem:[%s7151_s3 + $0x7a0] ss:$16 sps:$4 sm:$0xff]   ;;  %v5354_v29 = vld [vmem:[%s7151_s3 + $0x7a8] ss:$16 sps:$4 sm:$0xff]  }
 0x219   :  { %2118 = vmatprep.mubr.bf16.mxu0 %v1291_v30  ;;  %2200 = vmatprep.mubr.bf16.mxu1 %v1291_v30  ;;  %v473_v30 = vrot.slane %v6125_v12, %v5883_v53  ;;  %v5360_v12 = vld [vmem:[%s7151_s3 + $0x7c8] ss:$16 sps:$4 sm:$0xff]  }
 0x21a   :  { %2119 = vmatmul.mubr.bf16.vlgmr.msra.gmra.mrb[8].mxu0 %v1290_v33  ;;  %2201 = vmatmul.mubr.bf16.vlgmr.msra.gmra.mrb[8].mxu1 %v1290_v33  ;;  %v5357_v33 = vld [vmem:[%s7151_s3 + $0x7c0] ss:$16 sps:$4 sm:$0xff]  }
 0x21b   :  { %2128 = vmatpush1.bf16.msra.mxu0 %v5273_v31  ;;  %2210 = vmatpush1.bf16.msra.mxu1 %v5276_v32  ;;  %v5359_v31 = vld [vmem:[%s7151_s3 + $0x7c4] ss:$16 sps:$4 sm:$0xff]   ;;  %v5362_v32 = vld [vmem:[%s7151_s3 + $0x7cc] ss:$16 sps:$4 sm:$0xff]  }
 0x21c   :  { %2159 = vmatprep.mubr.bf16.mxu0 %v1293_v36  ;;  %2241 = vmatprep.mubr.bf16.mxu1 %v1293_v36  ;;  %v5368_v36 = vld [vmem:[%s7151_s3 + $0x7ec] ss:$16 sps:$4 sm:$0xff]  }
 0x21d   :  { %2129 = vmatprep.subr.bf16.mxu0 %v5281_v34  ;;  %2211 = vmatprep.subr.bf16.mxu1 %v5284_v35  ;;  %v4889_v34 = vadd.f32 %v6133_v17, %v473_v30  ;;  %v5365_v35 = vld [vmem:[%s7151_s3 + $0x7e4] ss:$16 sps:$4 sm:$0xff]   ;;  %v2259_v17 = vld [vmem:[%s7155_s5 + $0x8] sm:$0xff] }
 0x21e   :  { %v2310_v30 = vld [vmem:[%s7155_s5 + $0x1a0] sm:$0xff] }
 0x21f   :  { %2130 = vmatpush1.bf16.msra.mxu0 %v5279_v41  ;;  %2212 = vmatpush1.bf16.msra.mxu1 %v5282_v42  ;;  %v2258_v41 = vld [vmem:[%s7155_s5] sm:$0xff] }
 0x220   :  { %2131 = vmatprep.subr.bf16.mxu0 %v5287_v43  ;;  %2213 = vmatprep.subr.bf16.mxu1 %v5290_v44  ;;  %v2262_v42 = vld [vmem:[%s7155_s5 + $0x20] sm:$0xff]  ;;  %v2263_v43 = vld [vmem:[%s7155_s5 + $0x28] sm:$0xff] }
 0x221   :  { %v5363_v44 = vld [vmem:[%s7151_s3 + $0x7e0] ss:$16 sps:$4 sm:$0xff]  }
 0x223   :  { %2132 = vmatpush1.bf16.msra.mxu0 %v5285_v45  ;;  %2214 = vmatpush1.bf16.msra.mxu1 %v5288_v46  ;;  %v5366_v45 = vld [vmem:[%s7151_s3 + $0x7e8] ss:$16 sps:$4 sm:$0xff]   ;;  %v1288_v46 = vmax.f32 %v4889_v34, 0.0 }
 0x224   :  { %2133 = vmatprep.subr.bf16.mxu0 %v5293_v47  ;;  %2215 = vmatprep.subr.bf16.mxu1 %v5296_v48  ;;  %v4632_v47 = vcombine.high %v2258_v41, %v2262_v42  ;;  %v4634_v48 = vcombine.high %v2259_v17, %v2263_v43 }
 0x227   :  { %2134 = vmatpush1.bf16.msra.mxu0 %v5291_v49  ;;  %2216 = vmatpush1.bf16.msra.mxu1 %v5294_v50  ;;  %v2266_v49 = vld [vmem:[%s7155_s5 + $0x40] sm:$0xff] }
 0x228   :  { %2135 = vmatprep.subr.bf16.mxu0 %v5299_v52  ;;  %2217 = vmatprep.subr.bf16.mxu1 %v5302_v54  ;;  %v2270_v50 = vld [vmem:[%s7155_s5 + $0x60] sm:$0xff]  ;;  %v2267_v52 = vld [vmem:[%s7155_s5 + $0x48] sm:$0xff] }
 0x229   :  { %v2271_v54 = vld [vmem:[%s7155_s5 + $0x68] sm:$0xff] }
 0x22b   :  { %2136 = vmatpush1.bf16.msra.mxu0 %v5297_v55  ;;  %2218 = vmatpush1.bf16.msra.mxu1 %v5300_v56  ;;  %v4631_v55 = vcombine.low %v2258_v41, %v2262_v42  ;;  %v4633_v56 = vcombine.low %v2259_v17, %v2263_v43  ;;  %v2318_v41 = vld [vmem:[%s7155_s5 + $0x1e0] sm:$0xff]  ;;  %v2315_v42 = vld [vmem:[%s7155_s5 + $0x1c8] sm:$0xff] }
 0x22c   :  { %2137 = vmatprep.subr.bf16.mxu0 %v5305_v57  ;;  %2219 = vmatprep.subr.bf16.mxu1 %v5308_v58  ;;  %v1292_v57 = vpack.c.bf16 %v1288_v46, %v1288_v46  ;;  %v4640_v58 = vcombine.high %v2266_v49, %v2270_v50  ;;  %v2319_v17 = vld [vmem:[%s7155_s5 + $0x1e8] sm:$0xff] }
 0x22d   :  { %v4690_v46 = vcombine.high %v2315_v42, %v2319_v17 }
 0x22f   :  { %2138 = vmatpush1.bf16.msra.mxu0 %v5303_v59  ;;  %2220 = vmatpush1.bf16.msra.mxu1 %v5306_v60  ;;  %v4642_v59 = vcombine.high %v2267_v52, %v2271_v54  ;;  %v2274_v60 = vld [vmem:[%s7155_s5 + $0x80] sm:$0xff] }
 0x230   :  { %2139 = vmatprep.subr.bf16.mxu0 %v5311_v61  ;;  %2221 = vmatprep.subr.bf16.mxu1 %v5314_v39  ;;  %v2278_v61 = vld [vmem:[%s7155_s5 + $0xa0] sm:$0xff]  ;;  %v2275_v39 = vld [vmem:[%s7155_s5 + $0x88] sm:$0xff] }
 0x233   :  { %2140 = vmatpush1.bf16.msra.mxu0 %v5309_v62  ;;  %2222 = vmatpush1.bf16.msra.mxu1 %v5312_v0  ;;  %v2279_v62 = vld [vmem:[%s7155_s5 + $0xa8] sm:$0xff]  ;;  %v4639_v0 = vcombine.low %v2266_v49, %v2270_v50 }
 0x234   :  { %2141 = vmatprep.subr.bf16.mxu0 %v5317_v1  ;;  %2223 = vmatprep.subr.bf16.mxu1 %v5320_v2  ;;  %v4641_v1 = vcombine.low %v2267_v52, %v2271_v54  ;;  %v4648_v2 = vcombine.high %v2274_v60, %v2278_v61  ;;  %v2323_v49 = vld [vmem:[%s7155_s5 + $0x208] sm:$0xff]  ;;  %v4689_v54 = vcombine.low %v2315_v42, %v2319_v17 }
 0x235   :  { %v2327_v50 = vld [vmem:[%s7155_s5 + $0x228] sm:$0xff] }
 0x236   :  { %v2375_v17 = vld [vmem:[%s7155_s5 + $0x3a8] sm:$0xff] }
 0x237   :  { %2142 = vmatpush1.bf16.msra.mxu0 %v5315_v63  ;;  %2224 = vmatpush1.bf16.msra.mxu1 %v5318_v3  ;;  %v4650_v63 = vcombine.high %v2275_v39, %v2279_v62  ;;  %v2282_v3 = vld [vmem:[%s7155_s5 + $0xc0] sm:$0xff] }
 0x238   :  { %2143 = vmatprep.subr.bf16.mxu0 %v5323_v4  ;;  %2225 = vmatprep.subr.bf16.mxu1 %v5326_v5  ;;  %v2286_v4 = vld [vmem:[%s7155_s5 + $0xe0] sm:$0xff]  ;;  %v2283_v5 = vld [vmem:[%s7155_s5 + $0xc8] sm:$0xff] }
 0x23b   :  { %2144 = vmatpush1.bf16.msra.mxu0 %v5321_v6  ;;  %2226 = vmatpush1.bf16.msra.mxu1 %v5324_v7  ;;  %v2287_v6 = vld [vmem:[%s7155_s5 + $0xe8] sm:$0xff]  ;;  %v4647_v7 = vcombine.low %v2274_v60, %v2278_v61 }
 0x23c   :  { %2145 = vmatprep.subr.bf16.mxu0 %v5329_v8  ;;  %2227 = vmatprep.subr.bf16.mxu1 %v5332_v9  ;;  %v4649_v8 = vcombine.low %v2275_v39, %v2279_v62  ;;  %v4656_v9 = vcombine.high %v2282_v3, %v2286_v4  ;;  %v2335_v60 = vld [vmem:[%s7155_s5 + $0x268] sm:$0xff]  ;;  %v4697_v39 = vcombine.low %v2323_v49, %v2327_v50 }
 0x23f   :  { %2146 = vmatpush1.bf16.msra.mxu0 %v5327_v10  ;;  %2228 = vmatpush1.bf16.msra.mxu1 %v5330_v11  ;;  %v4658_v10 = vcombine.high %v2283_v5, %v2287_v6  ;;  %v2290_v11 = vld [vmem:[%s7155_s5 + $0x100] sm:$0xff] }
 0x240   :  { %2147 = vmatprep.subr.bf16.mxu0 %v5335_v13  ;;  %2229 = vmatprep.subr.bf16.mxu1 %v5338_v14  ;;  %v2294_v13 = vld [vmem:[%s7155_s5 + $0x120] sm:$0xff]  ;;  %v2291_v14 = vld [vmem:[%s7155_s5 + $0x108] sm:$0xff] }
 0x243   :  { %2148 = vmatpush1.bf16.msra.mxu0 %v5333_v15  ;;  %2230 = vmatpush1.bf16.msra.mxu1 %v5336_v16  ;;  %v2295_v15 = vld [vmem:[%s7155_s5 + $0x128] sm:$0xff]  ;;  %v4655_v16 = vcombine.low %v2282_v3, %v2286_v4 }
 0x244   :  { %2149 = vmatprep.subr.bf16.mxu0 %v5341_v18  ;;  %2231 = vmatprep.subr.bf16.mxu1 %v5344_v19  ;;  %v4657_v18 = vcombine.low %v2283_v5, %v2287_v6  ;;  %v4664_v19 = vcombine.high %v2290_v11, %v2294_v13  ;;  %v2343_v3 = vld [vmem:[%s7155_s5 + $0x2a8] sm:$0xff] }
 0x247   :  { %2150 = vmatpush1.bf16.msra.mxu0 %v5339_v20  ;;  %2232 = vmatpush1.bf16.msra.mxu1 %v5342_v21  ;;  %v4666_v20 = vcombine.high %v2291_v14, %v2295_v15  ;;  %v2298_v21 = vld [vmem:[%s7155_s5 + $0x140] sm:$0xff] }
 0x248   :  { %2151 = vmatprep.subr.bf16.mxu0 %v5347_v22  ;;  %2233 = vmatprep.subr.bf16.mxu1 %v5350_v23  ;;  %v2302_v22 = vld [vmem:[%s7155_s5 + $0x160] sm:$0xff]  ;;  %v2299_v23 = vld [vmem:[%s7155_s5 + $0x148] sm:$0xff] }
 0x24b   :  { %2152 = vmatpush1.bf16.msra.mxu0 %v5345_v24  ;;  %2234 = vmatpush1.bf16.msra.mxu1 %v5348_v25  ;;  %v2303_v24 = vld [vmem:[%s7155_s5 + $0x168] sm:$0xff]  ;;  %v4663_v25 = vcombine.low %v2290_v11, %v2294_v13 }
 0x24c   :  { %2153 = vmatprep.subr.bf16.mxu0 %v5353_v26  ;;  %2235 = vmatprep.subr.bf16.mxu1 %v5356_v27  ;;  %v4665_v26 = vcombine.low %v2291_v14, %v2295_v15  ;;  %v4672_v27 = vcombine.high %v2298_v21, %v2302_v22  ;;  %v2351_v11 = vld [vmem:[%s7155_s5 + $0x2e8] sm:$0xff] }
 0x24f   :  { %2154 = vmatpush1.bf16.msra.mxu0 %v5351_v28  ;;  %2236 = vmatpush1.bf16.msra.mxu1 %v5354_v29  ;;  %v4674_v28 = vcombine.high %v2299_v23, %v2303_v24  ;;  %v2306_v29 = vld [vmem:[%s7155_s5 + $0x180] sm:$0xff] }
 0x250   :  { %2155 = vmatprep.subr.bf16.mxu0 %v5359_v31  ;;  %2237 = vmatprep.subr.bf16.mxu1 %v5362_v32  ;;  %v2307_v31 = vld [vmem:[%s7155_s5 + $0x188] sm:$0xff]  ;;  %v4680_v34 = vcombine.high %v2306_v29, %v2310_v30  ;;  %v4679_v43 = vcombine.low %v2306_v29, %v2310_v30 }
 0x251   :  { %v2311_v32 = vld [vmem:[%s7155_s5 + $0x1a8] sm:$0xff] }
 0x252   :  { %v2367_v29 = vld [vmem:[%s7155_s5 + $0x368] sm:$0xff] }
 0x253   :  { %2156 = vmatpush1.bf16.msra.mxu0 %v5357_v33  ;;  %2238 = vmatpush1.bf16.msra.mxu1 %v5360_v12  ;;  %v4671_v33 = vcombine.low %v2298_v21, %v2302_v22  ;;  %v4673_v12 = vcombine.low %v2299_v23, %v2303_v24  ;;  %v2359_v21 = vld [vmem:[%s7155_s5 + $0x328] sm:$0xff] }
 0x254   :  { %2157 = vmatprep.subr.bf16.mxu0 %v5365_v35  ;;  %2239 = vmatprep.subr.bf16.mxu1 %v5368_v36  ;;  %v4682_v35 = vcombine.high %v2307_v31, %v2311_v32  ;;  %v2314_v36 = vld [vmem:[%s7155_s5 + $0x1c0] sm:$0xff] }
 0x255   :  { %v4687_v52 = vcombine.low %v2314_v36, %v2318_v41 }
 0x257   :  { %2158 = vmatpush1.bf16.msra.mxu0 %v5363_v44  ;;  %2240 = vmatpush1.bf16.msra.mxu1 %v5366_v45  ;;  %v4681_v44 = vcombine.low %v2307_v31, %v2311_v32  ;;  %v4688_v45 = vcombine.high %v2314_v36, %v2318_v41  ;;  %v2374_v36 = vld [vmem:[%s7155_s5 + $0x3a0] sm:$0xff]  ;;  %v2371_v41 = vld [vmem:[%s7155_s5 + $0x388] sm:$0xff] }
 0x258   :  { %3836 = vmatprep.subr.bf16.mxu0 %v4632_v47  ;;  %3918 = vmatprep.subr.bf16.mxu1 %v4634_v48  ;;  %v2322_v47 = vld [vmem:[%s7155_s5 + $0x200] sm:$0xff] }
 0x259   :  { %v2326_v48 = vld [vmem:[%s7155_s5 + $0x220] sm:$0xff] }
 0x25a   :  { %2160 = vmatmul.mubr.bf16.vlgmr.msra.gmra.mrb[8].mxu0 %v1292_v57  ;;  %2242 = vmatmul.mubr.bf16.vlgmr.msra.gmra.mrb[8].mxu1 %v1292_v57  ;;  %v2330_v57 = vld [vmem:[%s7155_s5 + $0x240] sm:$0xff]  ;;  %v4695_v61 = vcombine.low %v2322_v47, %v2326_v48 }
 0x25b   :  { %3837 = vmatpush1.bf16.msra.mxu0 %v4631_v55  ;;  %3919 = vmatpush1.bf16.msra.mxu1 %v4633_v56  ;;  %v4696_v55 = vcombine.high %v2322_v47, %v2326_v48  ;;  %v4698_v56 = vcombine.high %v2323_v49, %v2327_v50  ;;  %v2382_v47 = vld [vmem:[%s7155_s5 + $0x3e0] sm:$0xff]  ;;  %v2379_v48 = vld [vmem:[%s7155_s5 + $0x3c8] sm:$0xff] }
 0x25c   :  { %3838 = vmatprep.subr.bf16.mxu0 %v4640_v58  ;;  %3920 = vmatprep.subr.bf16.mxu1 %v4642_v59  ;;  %v2334_v58 = vld [vmem:[%s7155_s5 + $0x260] sm:$0xff]  ;;  %v2331_v59 = vld [vmem:[%s7155_s5 + $0x248] sm:$0xff] }
 0x25d   :  { %v4704_v62 = vcombine.high %v2330_v57, %v2334_v58  ;;  %v4703_v4 = vcombine.low %v2330_v57, %v2334_v58  ;;  %v4705_v5 = vcombine.low %v2331_v59, %v2335_v60  ;;  %v2383_v50 = vld [vmem:[%s7155_s5 + $0x3e8] sm:$0xff]  ;;  %v2390_v57 = vld [vmem:[%s7155_s5 + $0x420] sm:$0xff] }
 0x25e   :  { %v2387_v58 = vld [vmem:[%s7155_s5 + $0x408] sm:$0xff] }
 0x25f   :  { %3839 = vmatpush1.bf16.msra.mxu0 %v4639_v0  ;;  %3921 = vmatpush1.bf16.msra.mxu1 %v4641_v1  ;;  %v4706_v0 = vcombine.high %v2331_v59, %v2335_v60  ;;  %v2338_v1 = vld [vmem:[%s7155_s5 + $0x280] sm:$0xff]  ;;  %v2391_v60 = vld [vmem:[%s7155_s5 + $0x428] sm:$0xff] }
 0x260   :  { %3840 = vmatprep.subr.bf16.mxu0 %v4648_v2  ;;  %3922 = vmatprep.subr.bf16.mxu1 %v4650_v63  ;;  %v2342_v2 = vld [vmem:[%s7155_s5 + $0x2a0] sm:$0xff]  ;;  %v2339_v63 = vld [vmem:[%s7155_s5 + $0x288] sm:$0xff] }
 0x261   :  { %v4712_v6 = vcombine.high %v2338_v1, %v2342_v2  ;;  %v4711_v13 = vcombine.low %v2338_v1, %v2342_v2  ;;  %v4713_v14 = vcombine.low %v2339_v63, %v2343_v3 }
 0x263   :  { %3841 = vmatpush1.bf16.msra.mxu0 %v4647_v7  ;;  %3923 = vmatpush1.bf16.msra.mxu1 %v4649_v8  ;;  %v4714_v7 = vcombine.high %v2339_v63, %v2343_v3  ;;  %v2346_v8 = vld [vmem:[%s7155_s5 + $0x2c0] sm:$0xff] }
 0x264   :  { %3842 = vmatprep.subr.bf16.mxu0 %v4656_v9  ;;  %3924 = vmatprep.subr.bf16.mxu1 %v4658_v10  ;;  %v2350_v9 = vld [vmem:[%s7155_s5 + $0x2e0] sm:$0xff]  ;;  %v2347_v10 = vld [vmem:[%s7155_s5 + $0x2c8] sm:$0xff] }
 0x265   :  { %v4720_v15 = vcombine.high %v2346_v8, %v2350_v9  ;;  %v4719_v22 = vcombine.low %v2346_v8, %v2350_v9  ;;  %v4721_v23 = vcombine.low %v2347_v10, %v2351_v11 }
 0x267   :  { %3843 = vmatpush1.bf16.msra.mxu0 %v4655_v16  ;;  %3925 = vmatpush1.bf16.msra.mxu1 %v4657_v18  ;;  %v4722_v16 = vcombine.high %v2347_v10, %v2351_v11  ;;  %v2354_v18 = vld [vmem:[%s7155_s5 + $0x300] sm:$0xff] }
 0x268   :  { %3844 = vmatprep.subr.bf16.mxu0 %v4664_v19  ;;  %3926 = vmatprep.subr.bf16.mxu1 %v4666_v20  ;;  %v2358_v19 = vld [vmem:[%s7155_s5 + $0x320] sm:$0xff]  ;;  %v2355_v20 = vld [vmem:[%s7155_s5 + $0x308] sm:$0xff] }
 0x269   :  { %v4728_v24 = vcombine.high %v2354_v18, %v2358_v19  ;;  %v4727_v30 = vcombine.low %v2354_v18, %v2358_v19  ;;  %v4729_v31 = vcombine.low %v2355_v20, %v2359_v21  ;;  %v2394_v18 = vld [vmem:[%s7155_s5 + $0x440] sm:$0xff] }
 0x26b   :  { %3845 = vmatpush1.bf16.msra.mxu0 %v4663_v25  ;;  %3927 = vmatpush1.bf16.msra.mxu1 %v4665_v26  ;;  %v4730_v25 = vcombine.high %v2355_v20, %v2359_v21  ;;  %v2362_v26 = vld [vmem:[%s7155_s5 + $0x340] sm:$0xff]  ;;  %v2395_v21 = vld [vmem:[%s7155_s5 + $0x448] sm:$0xff] }
 0x26c   :  { %3846 = vmatprep.subr.bf16.mxu0 %v4672_v27  ;;  %3928 = vmatprep.subr.bf16.mxu1 %v4674_v28  ;;  %v2366_v27 = vld [vmem:[%s7155_s5 + $0x360] sm:$0xff]  ;;  %v2363_v28 = vld [vmem:[%s7155_s5 + $0x348] sm:$0xff] }
 0x26d   :  { %v4736_v32 = vcombine.high %v2362_v26, %v2366_v27  ;;  %v2398_v20 = vld [vmem:[%s7155_s5 + $0x460] sm:$0xff] }
 0x26f   :  { %3847 = vmatpush1.bf16.msra.mxu0 %v4671_v33  ;;  %3929 = vmatpush1.bf16.msra.mxu1 %v4673_v12  ;;  %v4738_v33 = vcombine.high %v2363_v28, %v2367_v29  ;;  %v4735_v12 = vcombine.low %v2362_v26, %v2366_v27  ;;  %v4768_v26 = vcombine.high %v2394_v18, %v2398_v20 }
 0x270   :  { %3848 = vmatprep.subr.bf16.mxu0 %v4680_v34  ;;  %3930 = vmatprep.subr.bf16.mxu1 %v4682_v35  ;;  %v4737_v34 = vcombine.low %v2363_v28, %v2367_v29  ;;  %v2370_v35 = vld [vmem:[%s7155_s5 + $0x380] sm:$0xff]  ;;  %v2403_v29 = vld [vmem:[%s7155_s5 + $0x488] sm:$0xff] }
 0x271   :  { %v4744_v42 = vcombine.high %v2370_v35, %v2374_v36  ;;  %v2406_v28 = vld [vmem:[%s7155_s5 + $0x4a0] sm:$0xff] }
 0x273   :  { %3849 = vmatpush1.bf16.msra.mxu0 %v4679_v43  ;;  %3931 = vmatpush1.bf16.msra.mxu1 %v4681_v44  ;;  %v4743_v43 = vcombine.low %v2370_v35, %v2374_v36  ;;  %v4745_v44 = vcombine.low %v2371_v41, %v2375_v17  ;;  %v2410_v35 = vld [vmem:[%s7155_s5 + $0x4c0] sm:$0xff] }
 0x274   :  { %3850 = vmatprep.subr.bf16.mxu0 %v4688_v45  ;;  %3932 = vmatprep.subr.bf16.mxu1 %v4690_v46  ;;  %v4746_v45 = vcombine.high %v2371_v41, %v2375_v17  ;;  %v2378_v46 = vld [vmem:[%s7155_s5 + $0x3c0] sm:$0xff]  ;;  %v2411_v41 = vld [vmem:[%s7155_s5 + $0x4c8] sm:$0xff] }
 0x275   :  { %v4752_v49 = vcombine.high %v2378_v46, %v2382_v47  ;;  %v2414_v36 = vld [vmem:[%s7155_s5 + $0x4e0] sm:$0xff] }
 0x277   :  { %3851 = vmatpush1.bf16.msra.mxu0 %v4687_v52  ;;  %3933 = vmatpush1.bf16.msra.mxu1 %v4689_v54  ;;  %v4751_v52 = vcombine.low %v2378_v46, %v2382_v47  ;;  %v4753_v54 = vcombine.low %v2379_v48, %v2383_v50  ;;  %v2418_v46 = vld [vmem:[%s7155_s5 + $0x500] sm:$0xff] }
 0x278   :  { %3852 = vmatprep.subr.bf16.mxu0 %v4696_v55  ;;  %3934 = vmatprep.subr.bf16.mxu1 %v4698_v56  ;;  %v4754_v55 = vcombine.high %v2379_v48, %v2383_v50  ;;  %v2386_v56 = vld [vmem:[%s7155_s5 + $0x400] sm:$0xff]  ;;  %v2419_v48 = vld [vmem:[%s7155_s5 + $0x508] sm:$0xff]  ;;  %v4783_v50 = vcombine.low %v2410_v35, %v2414_v36 }
 0x279   :  { %v4760_v59 = vcombine.high %v2386_v56, %v2390_v57  ;;  %v2422_v47 = vld [vmem:[%s7155_s5 + $0x520] sm:$0xff] }
 0x27b   :  { %3853 = vmatpush1.bf16.msra.mxu0 %v4695_v61  ;;  %3935 = vmatpush1.bf16.msra.mxu1 %v4697_v39  ;;  %v4759_v61 = vcombine.low %v2386_v56, %v2390_v57  ;;  %v4761_v39 = vcombine.low %v2387_v58, %v2391_v60  ;;  %v2426_v56 = vld [vmem:[%s7155_s5 + $0x540] sm:$0xff] }
 0x27c   :  { %3854 = vmatprep.subr.bf16.mxu0 %v4704_v62  ;;  %3936 = vmatprep.subr.bf16.mxu1 %v4706_v0  ;;  %v4762_v62 = vcombine.high %v2387_v58, %v2391_v60  ;;  %v6531_v0 = vld [vmem:[%s7154_s4 + $0x4] sm:$0xf]  ;;  %v2427_v58 = vld [vmem:[%s7155_s5 + $0x548] sm:$0xff]  ;;  %v4791_v60 = vcombine.low %v2418_v46, %v2422_v47 }
 0x27d   :  { %v1429_v1 = vrot.slane %v6531_v0, %v5711_v38  ;;  %v1433_v2 = vrot.slane %v6531_v0, %v5719_v40  ;;  %v1441_v63 = vrot.slane %v6531_v0, %v5726_v51  ;;  %v2430_v57 = vld [vmem:[%s7155_s5 + $0x560] sm:$0xff] }
 0x27f   :  { %3855 = vmatpush1.bf16.msra.mxu0 %v4703_v4  ;;  %3937 = vmatpush1.bf16.msra.mxu1 %v4705_v5 }
 0x280   :  { %3856 = vmatprep.subr.bf16.mxu0 %v4712_v6  ;;  %3938 = vmatprep.subr.bf16.mxu1 %v4714_v7 }
 0x283   :  { %3857 = vmatpush1.bf16.msra.mxu0 %v4711_v13  ;;  %3939 = vmatpush1.bf16.msra.mxu1 %v4713_v14 }
 0x284   :  { %3858 = vmatprep.subr.bf16.mxu0 %v4720_v15  ;;  %3940 = vmatprep.subr.bf16.mxu1 %v4722_v16 }
 0x287   :  { %3859 = vmatpush1.bf16.msra.mxu0 %v4719_v22  ;;  %3941 = vmatpush1.bf16.msra.mxu1 %v4721_v23  ;;  %v2399_v22 = vld [vmem:[%s7155_s5 + $0x468] sm:$0xff] }
 0x288   :  { %3860 = vmatprep.subr.bf16.mxu0 %v4728_v24  ;;  %3942 = vmatprep.subr.bf16.mxu1 %v4730_v25  ;;  %v2402_v25 = vld [vmem:[%s7155_s5 + $0x480] sm:$0xff]  ;;  %v4770_v27 = vcombine.high %v2395_v21, %v2399_v22 }
 0x289   :  { %v4775_v17 = vcombine.low %v2402_v25, %v2406_v28 }
 0x28b   :  { %3861 = vmatpush1.bf16.msra.mxu0 %v4727_v30  ;;  %3943 = vmatpush1.bf16.msra.mxu1 %v4729_v31  ;;  %v2407_v30 = vld [vmem:[%s7155_s5 + $0x4a8] sm:$0xff] }
 0x28c   :  { %3862 = vmatprep.subr.bf16.mxu0 %v4736_v32  ;;  %3944 = vmatprep.subr.bf16.mxu1 %v4738_v33  ;;  %v4767_v32 = vcombine.low %v2394_v18, %v2398_v20  ;;  %v4769_v33 = vcombine.low %v2395_v21, %v2399_v22  ;;  %v2454_v20 = vld [vmem:[%s7155_s5 + $0x620] sm:$0xff]  ;;  %v2451_v21 = vld [vmem:[%s7155_s5 + $0x608] sm:$0xff] }
 0x28d   :  { %v2455_v22 = vld [vmem:[%s7155_s5 + $0x628] sm:$0xff] }
 0x28f   :  { %3863 = vmatpush1.bf16.msra.mxu0 %v4735_v12  ;;  %3945 = vmatpush1.bf16.msra.mxu1 %v4737_v34  ;;  %v4776_v12 = vcombine.high %v2402_v25, %v2406_v28  ;;  %v4778_v34 = vcombine.high %v2403_v29, %v2407_v30  ;;  %v4826_v28 = vcombine.high %v2451_v21, %v2455_v22 }
 0x290   :  { %3864 = vmatprep.subr.bf16.mxu0 %v4744_v42  ;;  %3946 = vmatprep.subr.bf16.mxu1 %v4746_v45  ;;  %v2415_v42 = vld [vmem:[%s7155_s5 + $0x4e8] sm:$0xff] }
 0x291   :  { %v4786_v45 = vcombine.high %v2411_v41, %v2415_v42 }
 0x293   :  { %3865 = vmatpush1.bf16.msra.mxu0 %v4743_v43  ;;  %3947 = vmatpush1.bf16.msra.mxu1 %v4745_v44  ;;  %v4777_v43 = vcombine.low %v2403_v29, %v2407_v30  ;;  %v4784_v44 = vcombine.high %v2410_v35, %v2414_v36  ;;  %v2458_v29 = vld [vmem:[%s7155_s5 + $0x640] sm:$0xff] }
 0x294   :  { %3866 = vmatprep.subr.bf16.mxu0 %v4752_v49  ;;  %3948 = vmatprep.subr.bf16.mxu1 %v4754_v55  ;;  %v2423_v49 = vld [vmem:[%s7155_s5 + $0x528] sm:$0xff]  ;;  %v2462_v30 = vld [vmem:[%s7155_s5 + $0x660] sm:$0xff] }
 0x295   :  { %v4794_v55 = vcombine.high %v2419_v48, %v2423_v49  ;;  %v4832_v35 = vcombine.high %v2458_v29, %v2462_v30 }
 0x297   :  { %3867 = vmatpush1.bf16.msra.mxu0 %v4751_v52  ;;  %3949 = vmatpush1.bf16.msra.mxu1 %v4753_v54  ;;  %v4785_v52 = vcombine.low %v2411_v41, %v2415_v42  ;;  %v4792_v54 = vcombine.high %v2418_v46, %v2422_v47  ;;  %v2466_v41 = vld [vmem:[%s7155_s5 + $0x680] sm:$0xff] }
 0x298   :  { %3877 = vmatprep.subr.bf16.mxu0 %v4760_v59  ;;  %3959 = vmatprep.subr.bf16.mxu1 %v4762_v62  ;;  %v2431_v59 = vld [vmem:[%s7155_s5 + $0x568] sm:$0xff]  ;;  %v2470_v42 = vld [vmem:[%s7155_s5 + $0x6a0] sm:$0xff] }
 0x299   :  { %v4802_v62 = vcombine.high %v2427_v58, %v2431_v59  ;;  %v4840_v46 = vcombine.high %v2466_v41, %v2470_v42 }
 0x32d   :  { %v2161_v3 = vpop.f32.mrb[8].mxu0  ;;  %v6539_v4 = vpop.f32.mrb[8].mxu1 }
 0x32e   :  { %v4891_v5 = vadd.f32 %v2161_v3, %v1429_v1  ;;  %v2163_v6 = vpop.f32.mrb[9].mxu0  ;;  %v2245_v7 = vpop.f32.mrb[9].mxu1  ;;  %v2434_v1 = vld [vmem:[%s7155_s5 + $0x580] sm:$0xff]  ;;  %v2439_v3 = vld [vmem:[%s7155_s5 + $0x5a8] sm:$0xff] }
 0x32f   :  { %v4892_v8 = vadd.f32 %v2163_v6, %v1433_v2  ;;  %v4894_v9 = vadd.f32 %v2245_v7, %v1441_v63  ;;  %v2165_v10 = vpop.f32.mrb[10].mxu0  ;;  %v2247_v11 = vpop.f32.mrb[10].mxu1  ;;  %v2438_v2 = vld [vmem:[%s7155_s5 + $0x5a0] sm:$0xff]  ;;  %v2435_v63 = vld [vmem:[%s7155_s5 + $0x588] sm:$0xff]  ;;  %v4801_v6 = vcombine.low %v2427_v58, %v2431_v59 }
 0x330   :  { %v2250_v13 = vmax.f32 %v4891_v5, 0.0  ;;  %v2166_v14 = vpop.f32.mrb[11].mxu0  ;;  %v2248_v15 = vpop.f32.mrb[11].mxu1  ;;  %v4799_v5 = vcombine.low %v2426_v56, %v2430_v57  ;;  %v4808_v7 = vcombine.high %v2434_v1, %v2438_v2  ;;  %v2446_v10 = vld [vmem:[%s7155_s5 + $0x5e0] sm:$0xff]  ;;  %v2443_v11 = vld [vmem:[%s7155_s5 + $0x5c8] sm:$0xff] }
 0x331   :  { %v2251_v16 = vmax.f32 %v4892_v8, 0.0  ;;  %v2253_v19 = vmax.f32 %v4894_v9, 0.0  ;;  %v4810_v8 = vcombine.high %v2435_v63, %v2439_v3  ;;  %v2442_v9 = vld [vmem:[%s7155_s5 + $0x5c0] sm:$0xff]  ;;  %v4807_v14 = vcombine.low %v2434_v1, %v2438_v2 }
 0x332   :  { %v6555_v24 = vpack.c.bf16 %v2250_v13, %v2250_v13  ;;  %v2447_v13 = vld [vmem:[%s7155_s5 + $0x5e8] sm:$0xff]  ;;  %v4809_v15 = vcombine.low %v2435_v63, %v2439_v3  ;;  %v4815_v25 = vcombine.low %v2442_v9, %v2446_v10  ;;  %v2482_v58 = vld [vmem:[%s7155_s5 + $0x700] sm:$0xff] }
 0x333   :  { %v6553_v23 = vpack.c.bf16 %v2251_v16, %v2251_v16  ;;  %v6571_v31 = vpack.c.bf16 %v2253_v19, %v2253_v19  ;;  %v4816_v16 = vcombine.high %v2442_v9, %v2446_v10  ;;  %v4818_v18 = vcombine.high %v2443_v11, %v2447_v13  ;;  %v2450_v19 = vld [vmem:[%s7155_s5 + $0x600] sm:$0xff] }
 0x334   :  { %v2486_v59 = vld [vmem:[%s7155_s5 + $0x720] sm:$0xff] }
 0x335   :  { %3868 = vmatprep.mubr.bf16.mxu0 %v6553_v23  ;;  %3950 = vmatprep.mubr.bf16.mxu1 %v6553_v23  ;;  %v4856_v1 = vcombine.high %v2482_v58, %v2486_v59  ;;  %v2490_v63 = vld [vmem:[%s7155_s5 + $0x740] sm:$0xff] }
 0x336   :  { %3869 = vmatmul.mubr.bf16.vlgmr.msra.gmra.mrb[12].mxu0 %v6555_v24  ;;  %3951 = vmatmul.mubr.bf16.vlgmr.msra.gmra.mrb[12].mxu1 %v6555_v24  ;;  %v2494_v3 = vld [vmem:[%s7155_s5 + $0x760] sm:$0xff] }
 0x337   :  { %3878 = vmatpush1.bf16.msra.mxu0 %v4759_v61  ;;  %3960 = vmatpush1.bf16.msra.mxu1 %v4761_v39  ;;  %v4793_v61 = vcombine.low %v2419_v48, %v2423_v49  ;;  %v4800_v39 = vcombine.high %v2426_v56, %v2430_v57  ;;  %v2474_v48 = vld [vmem:[%s7155_s5 + $0x6c0] sm:$0xff]  ;;  %v4864_v9 = vcombine.high %v2490_v63, %v2494_v3 }
 0x338   :  { %3909 = vmatprep.mubr.bf16.mxu0 %v6571_v31  ;;  %3991 = vmatprep.mubr.bf16.mxu1 %v6571_v31  ;;  %v2478_v49 = vld [vmem:[%s7155_s5 + $0x6e0] sm:$0xff] }
 0x339   :  { %3879 = vmatprep.subr.bf16.mxu0 %v4768_v26  ;;  %3961 = vmatprep.subr.bf16.mxu1 %v4770_v27  ;;  %v4817_v26 = vcombine.low %v2443_v11, %v2447_v13  ;;  %v4824_v27 = vcombine.high %v2450_v19, %v2454_v20  ;;  %v4848_v56 = vcombine.high %v2474_v48, %v2478_v49  ;;  %v2498_v11 = vld [vmem:[%s7155_s5 + $0x780] sm:$0xff] }
 0x33a   :  { %v2502_v13 = vld [vmem:[%s7155_s5 + $0x7a0] sm:$0xff] }
 0x33b   :  { %3880 = vmatpush1.bf16.msra.mxu0 %v4767_v32  ;;  %3962 = vmatpush1.bf16.msra.mxu1 %v4769_v33  ;;  %v2459_v32 = vld [vmem:[%s7155_s5 + $0x648] sm:$0xff] }
 0x33c   :  { %3881 = vmatprep.subr.bf16.mxu0 %v4776_v12  ;;  %3963 = vmatprep.subr.bf16.mxu1 %v4778_v34  ;;  %v2463_v33 = vld [vmem:[%s7155_s5 + $0x668] sm:$0xff]  ;;  %v4823_v12 = vcombine.low %v2450_v19, %v2454_v20  ;;  %v4825_v34 = vcombine.low %v2451_v21, %v2455_v22  ;;  %v1437_v19 = vrot.slane %v6531_v0, %v5883_v53  ;;  %v2506_v22 = vld [vmem:[%s7155_s5 + $0x7c0] sm:$0xff] }
 0x33d   :  { %v4834_v36 = vcombine.high %v2459_v32, %v2463_v33  ;;  %v4872_v20 = vcombine.high %v2498_v11, %v2502_v13  ;;  %v2511_v0 = vld [vmem:[%s7155_s5 + $0x7e8] sm:$0xff] }
 0x33f   :  { %3882 = vmatpush1.bf16.msra.mxu0 %v4775_v17  ;;  %3964 = vmatpush1.bf16.msra.mxu1 %v4777_v43  ;;  %v2467_v17 = vld [vmem:[%s7155_s5 + $0x688] sm:$0xff] }
 0x340   :  { %3883 = vmatprep.subr.bf16.mxu0 %v4784_v44  ;;  %3965 = vmatprep.subr.bf16.mxu1 %v4786_v45  ;;  %v2471_v43 = vld [vmem:[%s7155_s5 + $0x6a8] sm:$0xff]  ;;  %v4831_v44 = vcombine.low %v2458_v29, %v2462_v30  ;;  %v4833_v45 = vcombine.low %v2459_v32, %v2463_v33  ;;  %v4893_v29 = vadd.f32 %v6539_v4, %v1437_v19  ;;  %v2260_v33 = vld [vmem:[%s7155_s5 + $0x10] sm:$0xff]  ;;  %v2265_v4 = vld [vmem:[%s7155_s5 + $0x38] sm:$0xff] }
 0x341   :  { %v4842_v47 = vcombine.high %v2467_v17, %v2471_v43  ;;  %v2305_v19 = vld [vmem:[%s7155_s5 + $0x178] sm:$0xff] }
 0x343   :  { %3884 = vmatpush1.bf16.msra.mxu0 %v4783_v50  ;;  %3966 = vmatpush1.bf16.msra.mxu1 %v4785_v52  ;;  %v2475_v50 = vld [vmem:[%s7155_s5 + $0x6c8] sm:$0xff] }
 0x344   :  { %3885 = vmatprep.subr.bf16.mxu0 %v4792_v54  ;;  %3967 = vmatprep.subr.bf16.mxu1 %v4794_v55  ;;  %v2479_v52 = vld [vmem:[%s7155_s5 + $0x6e8] sm:$0xff]  ;;  %v4839_v54 = vcombine.low %v2466_v41, %v2470_v42  ;;  %v4841_v55 = vcombine.low %v2467_v17, %v2471_v43  ;;  %v2252_v41 = vmax.f32 %v4893_v29, 0.0  ;;  %v2268_v43 = vld [vmem:[%s7155_s5 + $0x50] sm:$0xff] }
 0x345   :  { %v4850_v57 = vcombine.high %v2475_v50, %v2479_v52 }
 0x347   :  { %3886 = vmatpush1.bf16.msra.mxu0 %v4791_v60  ;;  %3968 = vmatpush1.bf16.msra.mxu1 %v4793_v61  ;;  %v2483_v60 = vld [vmem:[%s7155_s5 + $0x708] sm:$0xff] }
 0x348   :  { %3887 = vmatprep.subr.bf16.mxu0 %v4800_v39  ;;  %3969 = vmatprep.subr.bf16.mxu1 %v4802_v62  ;;  %v2487_v61 = vld [vmem:[%s7155_s5 + $0x728] sm:$0xff]  ;;  %v4847_v39 = vcombine.low %v2474_v48, %v2478_v49  ;;  %v4849_v62 = vcombine.low %v2475_v50, %v2479_v52  ;;  %v6760_v48 = vpack.c.bf16 %v2252_v41, %v2252_v41 }
 0x349   :  { %v4858_v2 = vcombine.high %v2483_v60, %v2487_v61 }
 0x34b   :  { %3888 = vmatpush1.bf16.msra.mxu0 %v4799_v5  ;;  %3970 = vmatpush1.bf16.msra.mxu1 %v4801_v6  ;;  %v2491_v5 = vld [vmem:[%s7155_s5 + $0x748] sm:$0xff] }
 0x34c   :  { %3889 = vmatprep.subr.bf16.mxu0 %v4808_v7  ;;  %3971 = vmatprep.subr.bf16.mxu1 %v4810_v8  ;;  %v2495_v6 = vld [vmem:[%s7155_s5 + $0x768] sm:$0xff]  ;;  %v4855_v7 = vcombine.low %v2482_v58, %v2486_v59  ;;  %v4857_v8 = vcombine.low %v2483_v60, %v2487_v61 }
 0x34d   :  { %v4866_v10 = vcombine.high %v2491_v5, %v2495_v6 }
 0x34f   :  { %3890 = vmatpush1.bf16.msra.mxu0 %v4807_v14  ;;  %3972 = vmatpush1.bf16.msra.mxu1 %v4809_v15  ;;  %v2499_v14 = vld [vmem:[%s7155_s5 + $0x788] sm:$0xff] }
 0x350   :  { %3891 = vmatprep.subr.bf16.mxu0 %v4816_v16  ;;  %3973 = vmatprep.subr.bf16.mxu1 %v4818_v18  ;;  %v2503_v15 = vld [vmem:[%s7155_s5 + $0x7a8] sm:$0xff]  ;;  %v4863_v16 = vcombine.low %v2490_v63, %v2494_v3  ;;  %v4865_v18 = vcombine.low %v2491_v5, %v2495_v6  ;;  %v2292_v6 = vld [vmem:[%s7155_s5 + $0x110] sm:$0xff] }
 0x351   :  { %v4874_v21 = vcombine.high %v2499_v14, %v2503_v15 }
 0x353   :  { %3892 = vmatpush1.bf16.msra.mxu0 %v4815_v25  ;;  %3974 = vmatpush1.bf16.msra.mxu1 %v4817_v26  ;;  %v2510_v25 = vld [vmem:[%s7155_s5 + $0x7e0] sm:$0xff]  ;;  %v2507_v26 = vld [vmem:[%s7155_s5 + $0x7c8] sm:$0xff] }
 0x354   :  { %3893 = vmatprep.subr.bf16.mxu0 %v4824_v27  ;;  %3975 = vmatprep.subr.bf16.mxu1 %v4826_v28  ;;  %v4871_v27 = vcombine.low %v2498_v11, %v2502_v13  ;;  %v4873_v28 = vcombine.low %v2499_v14, %v2503_v15  ;;  %v4880_v30 = vcombine.high %v2506_v22, %v2510_v25  ;;  %v2300_v15 = vld [vmem:[%s7155_s5 + $0x150] sm:$0xff] }
 0x355   :  { %v4882_v32 = vcombine.high %v2507_v26, %v2511_v0 }
 0x357   :  { %3894 = vmatpush1.bf16.msra.mxu0 %v4823_v12  ;;  %3976 = vmatpush1.bf16.msra.mxu1 %v4825_v34  ;;  %v2264_v12 = vld [vmem:[%s7155_s5 + $0x30] sm:$0xff]  ;;  %v2261_v34 = vld [vmem:[%s7155_s5 + $0x18] sm:$0xff] }
 0x358   :  { %3895 = vmatprep.subr.bf16.mxu0 %v4832_v35  ;;  %3977 = vmatprep.subr.bf16.mxu1 %v4834_v36  ;;  %v4879_v35 = vcombine.low %v2506_v22, %v2510_v25  ;;  %v4881_v36 = vcombine.low %v2507_v26, %v2511_v0  ;;  %v4636_v42 = vcombine.high %v2260_v33, %v2264_v12  ;;  %v2308_v26 = vld [vmem:[%s7155_s5 + $0x190] sm:$0xff] }
 0x359   :  { %v4638_v17 = vcombine.high %v2261_v34, %v2265_v4  ;;  %v4637_v49 = vcombine.low %v2261_v34, %v2265_v4  ;;  %v2312_v0 = vld [vmem:[%s7155_s5 + $0x1b0] sm:$0xff]  ;;  %v2317_v4 = vld [vmem:[%s7155_s5 + $0x1d8] sm:$0xff] }
 0x35a   :  { %v2320_v34 = vld [vmem:[%s7155_s5 + $0x1f0] sm:$0xff] }
 0x35b   :  { %3896 = vmatpush1.bf16.msra.mxu0 %v4831_v44  ;;  %3978 = vmatpush1.bf16.msra.mxu1 %v4833_v45  ;;  %v2272_v44 = vld [vmem:[%s7155_s5 + $0x70] sm:$0xff]  ;;  %v2269_v45 = vld [vmem:[%s7155_s5 + $0x58] sm:$0xff] }
 0x35c   :  { %3897 = vmatprep.subr.bf16.mxu0 %v4840_v46  ;;  %3979 = vmatprep.subr.bf16.mxu1 %v4842_v47  ;;  %v2273_v46 = vld [vmem:[%s7155_s5 + $0x78] sm:$0xff]  ;;  %v4635_v47 = vcombine.low %v2260_v33, %v2264_v12  ;;  %v4644_v50 = vcombine.high %v2268_v43, %v2272_v44  ;;  %v4643_v58 = vcombine.low %v2268_v43, %v2272_v44  ;;  %v2316_v12 = vld [vmem:[%s7155_s5 + $0x1d0] sm:$0xff] }
 0x35d   :  { %v4646_v52 = vcombine.high %v2269_v45, %v2273_v46  ;;  %v4645_v59 = vcombine.low %v2269_v45, %v2273_v46  ;;  %v2324_v43 = vld [vmem:[%s7155_s5 + $0x210] sm:$0xff]  ;;  %v2325_v45 = vld [vmem:[%s7155_s5 + $0x218] sm:$0xff] }
 0x35e   :  { %v2328_v44 = vld [vmem:[%s7155_s5 + $0x230] sm:$0xff]  ;;  %v2329_v46 = vld [vmem:[%s7155_s5 + $0x238] sm:$0xff] }
 0x35f   :  { %3898 = vmatpush1.bf16.msra.mxu0 %v4839_v54  ;;  %3980 = vmatpush1.bf16.msra.mxu1 %v4841_v55  ;;  %v2276_v54 = vld [vmem:[%s7155_s5 + $0x90] sm:$0xff] }
 0x360   :  { %3899 = vmatprep.subr.bf16.mxu0 %v4848_v56  ;;  %3981 = vmatprep.subr.bf16.mxu1 %v4850_v57  ;;  %v2280_v55 = vld [vmem:[%s7155_s5 + $0xb0] sm:$0xff]  ;;  %v2277_v56 = vld [vmem:[%s7155_s5 + $0x98] sm:$0xff] }
 0x361   :  { %v2281_v57 = vld [vmem:[%s7155_s5 + $0xb8] sm:$0xff]  ;;  %v4652_v60 = vcombine.high %v2276_v54, %v2280_v55 }
 0x362   :  { %v4654_v61 = vcombine.high %v2277_v56, %v2281_v57  ;;  %v4653_v63 = vcombine.low %v2277_v56, %v2281_v57  ;;  %v2333_v56 = vld [vmem:[%s7155_s5 + $0x258] sm:$0xff] }
 0x363   :  { %3900 = vmatpush1.bf16.msra.mxu0 %v4847_v39  ;;  %3982 = vmatpush1.bf16.msra.mxu1 %v4849_v62  ;;  %v2284_v39 = vld [vmem:[%s7155_s5 + $0xd0] sm:$0xff]  ;;  %v2337_v57 = vld [vmem:[%s7155_s5 + $0x278] sm:$0xff] }
 0x364   :  { %3901 = vmatprep.subr.bf16.mxu0 %v4856_v1  ;;  %3983 = vmatprep.subr.bf16.mxu1 %v4858_v2  ;;  %v2288_v62 = vld [vmem:[%s7155_s5 + $0xf0] sm:$0xff]  ;;  %v2285_v1 = vld [vmem:[%s7155_s5 + $0xd8] sm:$0xff]  ;;  %v4651_v2 = vcombine.low %v2276_v54, %v2280_v55 }
 0x365   :  { %v4660_v3 = vcombine.high %v2284_v39, %v2288_v62  ;;  %v2332_v54 = vld [vmem:[%s7155_s5 + $0x250] sm:$0xff] }
 0x366   :  { %v2336_v55 = vld [vmem:[%s7155_s5 + $0x270] sm:$0xff] }
 0x367   :  { %3902 = vmatpush1.bf16.msra.mxu0 %v4855_v7  ;;  %3984 = vmatpush1.bf16.msra.mxu1 %v4857_v8  ;;  %v2296_v7 = vld [vmem:[%s7155_s5 + $0x130] sm:$0xff]  ;;  %v2293_v8 = vld [vmem:[%s7155_s5 + $0x118] sm:$0xff] }
 0x368   :  { %3903 = vmatprep.subr.bf16.mxu0 %v4864_v9  ;;  %3985 = vmatprep.subr.bf16.mxu1 %v4866_v10  ;;  %v2297_v9 = vld [vmem:[%s7155_s5 + $0x138] sm:$0xff]  ;;  %v4659_v10 = vcombine.low %v2284_v39, %v2288_v62  ;;  %v4668_v13 = vcombine.high %v2292_v6, %v2296_v7  ;;  %v2340_v39 = vld [vmem:[%s7155_s5 + $0x290] sm:$0xff] }
 0x369   :  { %v4670_v14 = vcombine.high %v2293_v8, %v2297_v9  ;;  %v2344_v62 = vld [vmem:[%s7155_s5 + $0x2b0] sm:$0xff] }
 0x36b   :  { %3904 = vmatpush1.bf16.msra.mxu0 %v4863_v16  ;;  %3986 = vmatpush1.bf16.msra.mxu1 %v4865_v18  ;;  %v2304_v16 = vld [vmem:[%s7155_s5 + $0x170] sm:$0xff]  ;;  %v2301_v18 = vld [vmem:[%s7155_s5 + $0x158] sm:$0xff] }
 0x36c   :  { %3905 = vmatprep.subr.bf16.mxu0 %v4872_v20  ;;  %3987 = vmatprep.subr.bf16.mxu1 %v4874_v21  ;;  %v4667_v20 = vcombine.low %v2292_v6, %v2296_v7  ;;  %v4669_v21 = vcombine.low %v2293_v8, %v2297_v9  ;;  %v4676_v22 = vcombine.high %v2300_v15, %v2304_v16  ;;  %v2348_v6 = vld [vmem:[%s7155_s5 + $0x2d0] sm:$0xff]  ;;  %v2349_v8 = vld [vmem:[%s7155_s5 + $0x2d8] sm:$0xff] }
 0x36d   :  { %v4678_v25 = vcombine.high %v2301_v18, %v2305_v19  ;;  %v4675_v29 = vcombine.low %v2300_v15, %v2304_v16  ;;  %v2352_v7 = vld [vmem:[%s7155_s5 + $0x2f0] sm:$0xff]  ;;  %v2353_v9 = vld [vmem:[%s7155_s5 + $0x2f8] sm:$0xff] }
 0x36e   :  { %v2356_v15 = vld [vmem:[%s7155_s5 + $0x310] sm:$0xff] }
 0x36f   :  { %3906 = vmatpush1.bf16.msra.mxu0 %v4871_v27  ;;  %3988 = vmatpush1.bf16.msra.mxu1 %v4873_v28  ;;  %v2309_v27 = vld [vmem:[%s7155_s5 + $0x198] sm:$0xff]  ;;  %v2360_v16 = vld [vmem:[%s7155_s5 + $0x330] sm:$0xff] }
 0x370   :  { %3907 = vmatprep.subr.bf16.mxu0 %v4880_v30  ;;  %3989 = vmatprep.subr.bf16.mxu1 %v4882_v32  ;;  %v2313_v28 = vld [vmem:[%s7155_s5 + $0x1b8] sm:$0xff]  ;;  %v4677_v30 = vcombine.low %v2301_v18, %v2305_v19  ;;  %v4684_v32 = vcombine.high %v2308_v26, %v2312_v0 }
 0x371   :  { %v4686_v33 = vcombine.high %v2309_v27, %v2313_v28  ;;  %v4685_v41 = vcombine.low %v2309_v27, %v2313_v28  ;;  %v2357_v18 = vld [vmem:[%s7155_s5 + $0x318] sm:$0xff] }
 0x372   :  { %v2361_v19 = vld [vmem:[%s7155_s5 + $0x338] sm:$0xff] }
 0x373   :  { %3908 = vmatpush1.bf16.msra.mxu0 %v4879_v35  ;;  %3990 = vmatpush1.bf16.msra.mxu1 %v4881_v36  ;;  %v2321_v35 = vld [vmem:[%s7155_s5 + $0x1f8] sm:$0xff]  ;;  %v4683_v36 = vcombine.low %v2308_v26, %v2312_v0  ;;  %v2364_v26 = vld [vmem:[%s7155_s5 + $0x350] sm:$0xff] }
 0x374   :  { %4000 = vmatprep.subr.bf16.mxu0 %v4636_v42  ;;  %4082 = vmatprep.subr.bf16.mxu1 %v4638_v17  ;;  %v4692_v42 = vcombine.high %v2316_v12, %v2320_v34  ;;  %v4694_v17 = vcombine.high %v2317_v4, %v2321_v35  ;;  %v2368_v0 = vld [vmem:[%s7155_s5 + $0x370] sm:$0xff]  ;;  %v2365_v27 = vld [vmem:[%s7155_s5 + $0x358] sm:$0xff] }
 0x375   :  { %v2369_v28 = vld [vmem:[%s7155_s5 + $0x378] sm:$0xff] }
 0x376   :  { %3910 = vmatmul.mubr.bf16.vlgmr.msra.gmra.mrb[12].mxu0 %v6760_v48  ;;  %3992 = vmatmul.mubr.bf16.vlgmr.msra.gmra.mrb[12].mxu1 %v6760_v48 }
 0x377   :  { %4001 = vmatpush1.bf16.msra.mxu0 %v4635_v47  ;;  %4032 = vmatprep.mubr.bf16.mxu0 %v6553_v23  ;;  %v4691_v47 = vcombine.low %v2316_v12, %v2320_v34  ;;  %v2372_v12 = vld [vmem:[%s7155_s5 + $0x390] sm:$0xff] }
 0x378   :  { %4083 = vmatpush1.bf16.msra.mxu1 %v4637_v49  ;;  %4114 = vmatprep.mubr.bf16.mxu1 %v6553_v23  ;;  %v2289_v23 = vld [vmem:[%s7155_s5 + $0xf8] sm:$0xff]  ;;  %v4693_v49 = vcombine.low %v2317_v4, %v2321_v35  ;;  %v2376_v34 = vld [vmem:[%s7155_s5 + $0x3b0] sm:$0xff] }
 0x379   :  { %4002 = vmatprep.subr.bf16.mxu0 %v4644_v50  ;;  %4084 = vmatprep.subr.bf16.mxu1 %v4646_v52  ;;  %v4662_v5 = vcombine.high %v2285_v1, %v2289_v23  ;;  %v4661_v11 = vcombine.low %v2285_v1, %v2289_v23  ;;  %v4700_v50 = vcombine.high %v2324_v43, %v2328_v44  ;;  %v2341_v1 = vld [vmem:[%s7155_s5 + $0x298] sm:$0xff] }
 0x37a   :  { %v4702_v52 = vcombine.high %v2325_v45, %v2329_v46  ;;  %v2345_v23 = vld [vmem:[%s7155_s5 + $0x2b8] sm:$0xff] }
 0x37b   :  { %4003 = vmatpush1.bf16.msra.mxu0 %v4643_v58  ;;  %v4699_v58 = vcombine.low %v2324_v43, %v2328_v44  ;;  %v2373_v4 = vld [vmem:[%s7155_s5 + $0x398] sm:$0xff]  ;;  %v2380_v43 = vld [vmem:[%s7155_s5 + $0x3d0] sm:$0xff] }
 0x37c   :  { %4085 = vmatpush1.bf16.msra.mxu1 %v4645_v59  ;;  %4004 = vmatprep.subr.bf16.mxu0 %v4652_v60  ;;  %v4701_v59 = vcombine.low %v2325_v45, %v2329_v46  ;;  %v4708_v60 = vcombine.high %v2332_v54, %v2336_v55  ;;  %v2377_v35 = vld [vmem:[%s7155_s5 + $0x3b8] sm:$0xff]  ;;  %v2384_v44 = vld [vmem:[%s7155_s5 + $0x3f0] sm:$0xff] }
 0x37d   :  { %4086 = vmatprep.subr.bf16.mxu1 %v4654_v61  ;;  %v4710_v61 = vcombine.high %v2333_v56, %v2337_v57  ;;  %v2381_v45 = vld [vmem:[%s7155_s5 + $0x3d8] sm:$0xff] }
 0x37e   :  { %v2385_v46 = vld [vmem:[%s7155_s5 + $0x3f8] sm:$0xff] }
 0x37f   :  { %4005 = vmatpush1.bf16.msra.mxu0 %v4651_v2  ;;  %v4707_v2 = vcombine.low %v2332_v54, %v2336_v55  ;;  %v2388_v54 = vld [vmem:[%s7155_s5 + $0x410] sm:$0xff] }
 0x380   :  { %4087 = vmatpush1.bf16.msra.mxu1 %v4653_v63  ;;  %4006 = vmatprep.subr.bf16.mxu0 %v4660_v3  ;;  %v4709_v63 = vcombine.low %v2333_v56, %v2337_v57  ;;  %v4716_v3 = vcombine.high %v2340_v39, %v2344_v62  ;;  %v2392_v55 = vld [vmem:[%s7155_s5 + $0x430] sm:$0xff]  ;;  %v2389_v56 = vld [vmem:[%s7155_s5 + $0x418] sm:$0xff] }
 0x381   :  { %4088 = vmatprep.subr.bf16.mxu1 %v4662_v5  ;;  %v4718_v5 = vcombine.high %v2341_v1, %v2345_v23  ;;  %v2393_v57 = vld [vmem:[%s7155_s5 + $0x438] sm:$0xff] }
 0x383   :  { %4007 = vmatpush1.bf16.msra.mxu0 %v4659_v10  ;;  %v4715_v10 = vcombine.low %v2340_v39, %v2344_v62  ;;  %v2396_v39 = vld [vmem:[%s7155_s5 + $0x450] sm:$0xff] }
 0x384   :  { %4089 = vmatpush1.bf16.msra.mxu1 %v4661_v11  ;;  %4008 = vmatprep.subr.bf16.mxu0 %v4668_v13  ;;  %v4717_v11 = vcombine.low %v2341_v1, %v2345_v23  ;;  %v4724_v13 = vcombine.high %v2348_v6, %v2352_v7  ;;  %v2400_v62 = vld [vmem:[%s7155_s5 + $0x470] sm:$0xff]  ;;  %v4763_v1 = vcombine.low %v2388_v54, %v2392_v55  ;;  %v2397_v23 = vld [vmem:[%s7155_s5 + $0x458] sm:$0xff] }
 0x385   :  { %4090 = vmatprep.subr.bf16.mxu1 %v4670_v14  ;;  %v4726_v14 = vcombine.high %v2349_v8, %v2353_v9 }
 0x387   :  { %4009 = vmatpush1.bf16.msra.mxu0 %v4667_v20  ;;  %v4723_v20 = vcombine.low %v2348_v6, %v2352_v7  ;;  %v2408_v6 = vld [vmem:[%s7155_s5 + $0x4b0] sm:$0xff] }
 0x388   :  { %4091 = vmatpush1.bf16.msra.mxu1 %v4669_v21  ;;  %4010 = vmatprep.subr.bf16.mxu0 %v4676_v22  ;;  %v4725_v21 = vcombine.low %v2349_v8, %v2353_v9  ;;  %v4732_v22 = vcombine.high %v2356_v15, %v2360_v16  ;;  %v2405_v8 = vld [vmem:[%s7155_s5 + $0x498] sm:$0xff] }
 0x389   :  { %4092 = vmatprep.subr.bf16.mxu1 %v4678_v25  ;;  %v4734_v25 = vcombine.high %v2357_v18, %v2361_v19  ;;  %v2409_v9 = vld [vmem:[%s7155_s5 + $0x4b8] sm:$0xff] }
 0x38b   :  { %4011 = vmatpush1.bf16.msra.mxu0 %v4675_v29  ;;  %v4731_v29 = vcombine.low %v2356_v15, %v2360_v16  ;;  %v2412_v15 = vld [vmem:[%s7155_s5 + $0x4d0] sm:$0xff] }
 0x38c   :  { %4093 = vmatpush1.bf16.msra.mxu1 %v4677_v30  ;;  %4012 = vmatprep.subr.bf16.mxu0 %v4684_v32  ;;  %v4733_v30 = vcombine.low %v2357_v18, %v2361_v19  ;;  %v4740_v32 = vcombine.high %v2364_v26, %v2368_v0  ;;  %v2416_v16 = vld [vmem:[%s7155_s5 + $0x4f0] sm:$0xff]  ;;  %v2417_v18 = vld [vmem:[%s7155_s5 + $0x4f8] sm:$0xff]  ;;  %v4781_v19 = vcombine.low %v2405_v8, %v2409_v9 }
 0x38d   :  { %4094 = vmatprep.subr.bf16.mxu1 %v4686_v33  ;;  %v4742_v33 = vcombine.high %v2365_v27, %v2369_v28 }
 0x38f   :  { %4013 = vmatpush1.bf16.msra.mxu0 %v4683_v36  ;;  %v4739_v36 = vcombine.low %v2364_v26, %v2368_v0  ;;  %v2421_v26 = vld [vmem:[%s7155_s5 + $0x518] sm:$0xff] }
 0x390   :  { %4095 = vmatpush1.bf16.msra.mxu1 %v4685_v41  ;;  %4014 = vmatprep.subr.bf16.mxu0 %v4692_v42  ;;  %v4741_v41 = vcombine.low %v2365_v27, %v2369_v28  ;;  %v4748_v42 = vcombine.high %v2372_v12, %v2376_v34  ;;  %v2425_v0 = vld [vmem:[%s7155_s5 + $0x538] sm:$0xff]  ;;  %v4787_v27 = vcombine.low %v2412_v15, %v2416_v16 }
 0x391   :  { %4096 = vmatprep.subr.bf16.mxu1 %v4694_v17  ;;  %v4750_v17 = vcombine.high %v2373_v4, %v2377_v35 }
 0x393   :  { %4015 = vmatpush1.bf16.msra.mxu0 %v4691_v47  ;;  %v4747_v47 = vcombine.low %v2372_v12, %v2376_v34  ;;  %v2429_v12 = vld [vmem:[%s7155_s5 + $0x558] sm:$0xff] }
 0x394   :  { %4097 = vmatpush1.bf16.msra.mxu1 %v4693_v49  ;;  %4016 = vmatprep.subr.bf16.mxu0 %v4700_v50  ;;  %v4749_v49 = vcombine.low %v2373_v4, %v2377_v35  ;;  %v4756_v50 = vcombine.high %v2380_v43, %v2384_v44  ;;  %v2433_v34 = vld [vmem:[%s7155_s5 + $0x578] sm:$0xff]  ;;  %v4797_v35 = vcombine.low %v2421_v26, %v2425_v0 }
 0x395   :  { %4098 = vmatprep.subr.bf16.mxu1 %v4702_v52  ;;  %v4758_v52 = vcombine.high %v2381_v45, %v2385_v46 }
 0x397   :  { %4017 = vmatpush1.bf16.msra.mxu0 %v4699_v58  ;;  %v4755_v58 = vcombine.low %v2380_v43, %v2384_v44  ;;  %v2437_v43 = vld [vmem:[%s7155_s5 + $0x598] sm:$0xff] }
 0x398   :  { %4099 = vmatpush1.bf16.msra.mxu1 %v4701_v59  ;;  %4018 = vmatprep.subr.bf16.mxu0 %v4708_v60  ;;  %v4757_v59 = vcombine.low %v2381_v45, %v2385_v46  ;;  %v4764_v60 = vcombine.high %v2388_v54, %v2392_v55  ;;  %v2441_v44 = vld [vmem:[%s7155_s5 + $0x5b8] sm:$0xff]  ;;  %v4805_v46 = vcombine.low %v2429_v12, %v2433_v34 }
 0x399   :  { %4100 = vmatprep.subr.bf16.mxu1 %v4710_v61  ;;  %v4766_v61 = vcombine.high %v2389_v56, %v2393_v57  ;;  %v2445_v54 = vld [vmem:[%s7155_s5 + $0x5d8] sm:$0xff] }
 0x39a   :  { %v2449_v55 = vld [vmem:[%s7155_s5 + $0x5f8] sm:$0xff] }
 0x39b   :  { %4019 = vmatpush1.bf16.msra.mxu0 %v4707_v2  ;;  %v2401_v2 = vld [vmem:[%s7155_s5 + $0x478] sm:$0xff] }
 0x39c   :  { %4101 = vmatpush1.bf16.msra.mxu1 %v4709_v63  ;;  %4020 = vmatprep.subr.bf16.mxu0 %v4716_v3  ;;  %v4765_v63 = vcombine.low %v2389_v56, %v2393_v57  ;;  %v4772_v3 = vcombine.high %v2396_v39, %v2400_v62  ;;  %v4774_v7 = vcombine.high %v2397_v23, %v2401_v2 }
 0x39d   :  { %4102 = vmatprep.subr.bf16.mxu1 %v4718_v5  ;;  %v2404_v5 = vld [vmem:[%s7155_s5 + $0x490] sm:$0xff]  ;;  %v4813_v57 = vcombine.low %v2437_v43, %v2441_v44 }
 0x39f   :  { %4021 = vmatpush1.bf16.msra.mxu0 %v4715_v10  ;;  %v4771_v10 = vcombine.low %v2396_v39, %v2400_v62  ;;  %v2453_v39 = vld [vmem:[%s7155_s5 + $0x618] sm:$0xff] }
 0x3a0   :  { %4103 = vmatpush1.bf16.msra.mxu1 %v4717_v11  ;;  %4022 = vmatprep.subr.bf16.mxu0 %v4724_v13  ;;  %v4773_v11 = vcombine.low %v2397_v23, %v2401_v2  ;;  %v4780_v13 = vcombine.high %v2404_v5, %v2408_v6  ;;  %v2457_v62 = vld [vmem:[%s7155_s5 + $0x638] sm:$0xff]  ;;  %v4821_v23 = vcombine.low %v2445_v54, %v2449_v55 }
 0x3a1   :  { %4104 = vmatprep.subr.bf16.mxu1 %v4726_v14  ;;  %v4782_v14 = vcombine.high %v2405_v8, %v2409_v9  ;;  %v4829_v9 = vcombine.low %v2453_v39, %v2457_v62 }
 0x3a3   :  { %4023 = vmatpush1.bf16.msra.mxu0 %v4723_v20  ;;  %v4788_v20 = vcombine.high %v2412_v15, %v2416_v16  ;;  %v2469_v15 = vld [vmem:[%s7155_s5 + $0x698] sm:$0xff] }
 0x3a4   :  { %4105 = vmatpush1.bf16.msra.mxu1 %v4725_v21  ;;  %4024 = vmatprep.subr.bf16.mxu0 %v4732_v22  ;;  %v2420_v22 = vld [vmem:[%s7155_s5 + $0x510] sm:$0xff]  ;;  %v2473_v16 = vld [vmem:[%s7155_s5 + $0x6b8] sm:$0xff] }
 0x3a5   :  { %4106 = vmatprep.subr.bf16.mxu1 %v4734_v25  ;;  %v2424_v25 = vld [vmem:[%s7155_s5 + $0x530] sm:$0xff] }
 0x3a6   :  { %v4795_v4 = vcombine.low %v2420_v22, %v2424_v25 }
 0x3a7   :  { %4025 = vmatpush1.bf16.msra.mxu0 %v4731_v29  ;;  %v4796_v29 = vcombine.high %v2420_v22, %v2424_v25  ;;  %v2477_v22 = vld [vmem:[%s7155_s5 + $0x6d8] sm:$0xff] }
 0x3a8   :  { %4107 = vmatpush1.bf16.msra.mxu1 %v4733_v30  ;;  %4026 = vmatprep.subr.bf16.mxu0 %v4740_v32  ;;  %v4798_v30 = vcombine.high %v2421_v26, %v2425_v0  ;;  %v2428_v32 = vld [vmem:[%s7155_s5 + $0x550] sm:$0xff]  ;;  %v2481_v25 = vld [vmem:[%s7155_s5 + $0x6f8] sm:$0xff]  ;;  %v4845_v0 = vcombine.low %v2469_v15, %v2473_v16 }
 0x3a9   :  { %4108 = vmatprep.subr.bf16.mxu1 %v4742_v33  ;;  %v2432_v33 = vld [vmem:[%s7155_s5 + $0x570] sm:$0xff] }
 0x3aa   :  { %v4803_v45 = vcombine.low %v2428_v32, %v2432_v33 }
 0x3ab   :  { %4027 = vmatpush1.bf16.msra.mxu0 %v4739_v36  ;;  %v4804_v36 = vcombine.high %v2428_v32, %v2432_v33  ;;  %v2485_v32 = vld [vmem:[%s7155_s5 + $0x718] sm:$0xff] }
 0x3ac   :  { %4109 = vmatpush1.bf16.msra.mxu1 %v4741_v41  ;;  %4028 = vmatprep.subr.bf16.mxu0 %v4748_v42  ;;  %v4806_v41 = vcombine.high %v2429_v12, %v2433_v34  ;;  %v2436_v42 = vld [vmem:[%s7155_s5 + $0x590] sm:$0xff]  ;;  %v2489_v33 = vld [vmem:[%s7155_s5 + $0x738] sm:$0xff]  ;;  %v4853_v34 = vcombine.low %v2477_v22, %v2481_v25 }
 0x3ad   :  { %4110 = vmatprep.subr.bf16.mxu1 %v4750_v17  ;;  %v2440_v17 = vld [vmem:[%s7155_s5 + $0x5b0] sm:$0xff] }
 0x3ae   :  { %v4811_v56 = vcombine.low %v2436_v42, %v2440_v17 }
 0x3af   :  { %4029 = vmatpush1.bf16.msra.mxu0 %v4747_v47  ;;  %v4812_v47 = vcombine.high %v2436_v42, %v2440_v17  ;;  %v2493_v42 = vld [vmem:[%s7155_s5 + $0x758] sm:$0xff] }
 0x3b0   :  { %4111 = vmatpush1.bf16.msra.mxu1 %v4749_v49  ;;  %4030 = vmatprep.subr.bf16.mxu0 %v4756_v50  ;;  %v4814_v49 = vcombine.high %v2437_v43, %v2441_v44  ;;  %v2444_v50 = vld [vmem:[%s7155_s5 + $0x5d0] sm:$0xff]  ;;  %v2497_v17 = vld [vmem:[%s7155_s5 + $0x778] sm:$0xff]  ;;  %v4861_v44 = vcombine.low %v2485_v32, %v2489_v33 }
 0x3b1   :  { %4112 = vmatprep.subr.bf16.mxu1 %v4758_v52  ;;  %v2448_v52 = vld [vmem:[%s7155_s5 + $0x5f0] sm:$0xff] }
 0x3b3   :  { %4031 = vmatpush1.bf16.msra.mxu0 %v4755_v58  ;;  %v4820_v58 = vcombine.high %v2444_v50, %v2448_v52 }
 0x3b4   :  { %4113 = vmatpush1.bf16.msra.mxu1 %v4757_v59  ;;  %4041 = vmatprep.subr.bf16.mxu0 %v4764_v60  ;;  %v4822_v59 = vcombine.high %v2445_v54, %v2449_v55  ;;  %v2452_v60 = vld [vmem:[%s7155_s5 + $0x610] sm:$0xff]  ;;  %v4869_v55 = vcombine.low %v2493_v42, %v2497_v17 }
 0x3b5   :  { %4123 = vmatprep.subr.bf16.mxu1 %v4766_v61  ;;  %v2456_v61 = vld [vmem:[%s7155_s5 + $0x630] sm:$0xff] }
 0x3b6   :  { %4033 = vmatmul.mubr.bf16.vlgmr.msra.gmra.mrb[16].mxu0 %v6555_v24  ;;  %v4828_v2 = vcombine.high %v2452_v60, %v2456_v61  ;;  %v4827_v8 = vcombine.low %v2452_v60, %v2456_v61  ;;  %v2509_v60 = vld [vmem:[%s7155_s5 + $0x7d8] sm:$0xff] }
 0x3b7   :  { %4115 = vmatmul.mubr.bf16.vlgmr.msra.gmra.mrb[16].mxu1 %v6555_v24  ;;  %4042 = vmatpush1.bf16.msra.mxu0 %v4763_v1  ;;  %v2413_v24 = vld [vmem:[%s7155_s5 + $0x4d8] sm:$0xff]  ;;  %v4819_v1 = vcombine.low %v2444_v50, %v2448_v52 }
 0x3b8   :  { %4073 = vmatprep.mubr.bf16.mxu0 %v6571_v31  ;;  %4124 = vmatpush1.bf16.msra.mxu1 %v4765_v63  ;;  %v4790_v21 = vcombine.high %v2413_v24, %v2417_v18  ;;  %v4789_v28 = vcombine.low %v2413_v24, %v2417_v18  ;;  %v4830_v63 = vcombine.high %v2453_v39, %v2457_v62  ;;  %v2501_v50 = vld [vmem:[%s7155_s5 + $0x798] sm:$0xff] }
 0x3b9   :  { %4155 = vmatprep.mubr.bf16.mxu1 %v6571_v31  ;;  %4043 = vmatprep.subr.bf16.mxu0 %v4772_v3  ;;  %v4779_v31 = vcombine.low %v2404_v5, %v2408_v6  ;;  %v2460_v3 = vld [vmem:[%s7155_s5 + $0x650] sm:$0xff]  ;;  %v2461_v6 = vld [vmem:[%s7155_s5 + $0x658] sm:$0xff] }
 0x3ba   :  { %4125 = vmatprep.subr.bf16.mxu1 %v4774_v7  ;;  %v2464_v5 = vld [vmem:[%s7155_s5 + $0x670] sm:$0xff]  ;;  %v2465_v7 = vld [vmem:[%s7155_s5 + $0x678] sm:$0xff] }
 0x3bb   :  { %4044 = vmatpush1.bf16.msra.mxu0 %v4771_v10  ;;  %v4836_v10 = vcombine.high %v2460_v3, %v2464_v5  ;;  %v4835_v24 = vcombine.low %v2460_v3, %v2464_v5  ;;  %v4837_v18 = vcombine.low %v2461_v6, %v2465_v7  ;;  %v2505_v52 = vld [vmem:[%s7155_s5 + $0x7b8] sm:$0xff]  ;;  %v2514_v3 = vld [vmem:[%s7156_s6] sm:$0xff]  ;;  %v5370_v5 = vmov 1983009808  }
 0x3bc   :  { %4126 = vmatpush1.bf16.msra.mxu1 %v4773_v11  ;;  %4045 = vmatprep.subr.bf16.mxu0 %v4780_v13  ;;  %v4838_v11 = vcombine.high %v2461_v6, %v2465_v7  ;;  %v2468_v13 = vld [vmem:[%s7155_s5 + $0x690] sm:$0xff]  ;;  %v2513_v61 = vld [vmem:[%s7155_s5 + $0x7f8] sm:$0xff]  ;;  %v4877_v62 = vcombine.low %v2501_v50, %v2505_v52  ;;  %v4175_v6 = vunpack.c.l.s4 %v5370_v5  ;;  %v2519_v7 = vrot.slane %v2514_v3, %v5711_v38 }
 0x3bd   :  { %4127 = vmatprep.subr.bf16.mxu1 %v4782_v14  ;;  %v2472_v14 = vld [vmem:[%s7155_s5 + $0x6b0] sm:$0xff] }
 0x3be   :  { %v4843_v26 = vcombine.low %v2468_v13, %v2472_v14 }
 0x3bf   :  { %4046 = vmatpush1.bf16.msra.mxu0 %v4779_v31  ;;  %v4844_v31 = vcombine.high %v2468_v13, %v2472_v14 }
 0x3c0   :  { %4128 = vmatpush1.bf16.msra.mxu1 %v4781_v19  ;;  %4047 = vmatprep.subr.bf16.mxu0 %v4788_v20  ;;  %v4846_v19 = vcombine.high %v2469_v15, %v2473_v16  ;;  %v2476_v20 = vld [vmem:[%s7155_s5 + $0x6d0] sm:$0xff] }
 0x3c1   :  { %4129 = vmatprep.subr.bf16.mxu1 %v4790_v21  ;;  %v2480_v21 = vld [vmem:[%s7155_s5 + $0x6f0] sm:$0xff] }
 0x3c2   :  { %v4851_v12 = vcombine.low %v2476_v20, %v2480_v21 }
 0x3c3   :  { %4048 = vmatpush1.bf16.msra.mxu0 %v4787_v27  ;;  %v4852_v27 = vcombine.high %v2476_v20, %v2480_v21 }
 0x3c4   :  { %4130 = vmatpush1.bf16.msra.mxu1 %v4789_v28  ;;  %4049 = vmatprep.subr.bf16.mxu0 %v4796_v29  ;;  %v4854_v28 = vcombine.high %v2477_v22, %v2481_v25  ;;  %v2484_v29 = vld [vmem:[%s7155_s5 + $0x710] sm:$0xff] }
 0x3c5   :  { %4131 = vmatprep.subr.bf16.mxu1 %v4798_v30  ;;  %v2488_v30 = vld [vmem:[%s7155_s5 + $0x730] sm:$0xff] }
 0x3c6   :  { %v4859_v43 = vcombine.low %v2484_v29, %v2488_v30 }
 0x3c7   :  { %4050 = vmatpush1.bf16.msra.mxu0 %v4795_v4  ;;  %v4860_v4 = vcombine.high %v2484_v29, %v2488_v30  ;;  %v2546_v29 = vsub.s32 7, %v5708_v37 }
 0x3c8   :  { %4132 = vmatpush1.bf16.msra.mxu1 %v4797_v35  ;;  %4051 = vmatprep.subr.bf16.mxu0 %v4804_v36  ;;  %v4862_v35 = vcombine.high %v2485_v32, %v2489_v33  ;;  %v2492_v36 = vld [vmem:[%s7155_s5 + $0x750] sm:$0xff] }
 0x3c9   :  { %4133 = vmatprep.subr.bf16.mxu1 %v4806_v41  ;;  %v2496_v41 = vld [vmem:[%s7155_s5 + $0x770] sm:$0xff] }
 0x3ca   :  { %v4867_v54 = vcombine.low %v2492_v36, %v2496_v41 }
 0x3cb   :  { %4052 = vmatpush1.bf16.msra.mxu0 %v4803_v45  ;;  %v4868_v45 = vcombine.high %v2492_v36, %v2496_v41 }
 0x3cc   :  { %4134 = vmatpush1.bf16.msra.mxu1 %v4805_v46  ;;  %4053 = vmatprep.subr.bf16.mxu0 %v4812_v47  ;;  %v4870_v46 = vcombine.high %v2493_v42, %v2497_v17  ;;  %v2500_v47 = vld [vmem:[%s7155_s5 + $0x790] sm:$0xff] }
 0x3cd   :  { %4135 = vmatprep.subr.bf16.mxu1 %v4814_v49  ;;  %v2504_v49 = vld [vmem:[%s7155_s5 + $0x7b0] sm:$0xff] }
 0x3ce   :  { %v4875_v39 = vcombine.low %v2500_v47, %v2504_v49 }
 0x3cf   :  { %4054 = vmatpush1.bf16.msra.mxu0 %v4811_v56  ;;  %v4876_v56 = vcombine.high %v2500_v47, %v2504_v49 }
 0x3d0   :  { %4136 = vmatpush1.bf16.msra.mxu1 %v4813_v57  ;;  %4055 = vmatprep.subr.bf16.mxu0 %v4820_v58  ;;  %v4878_v57 = vcombine.high %v2501_v50, %v2505_v52  ;;  %v2508_v58 = vld [vmem:[%s7155_s5 + $0x7d0] sm:$0xff] }
 0x3d1   :  { %4137 = vmatprep.subr.bf16.mxu1 %v4822_v59  ;;  %v2512_v59 = vld [vmem:[%s7155_s5 + $0x7f0] sm:$0xff] }
 0x3d3   :  { %4056 = vmatpush1.bf16.msra.mxu0 %v4819_v1  ;;  %v4884_v1 = vcombine.high %v2508_v58, %v2512_v59 }
 0x3d4   :  { %4138 = vmatpush1.bf16.msra.mxu1 %v4821_v23  ;;  %4057 = vmatprep.subr.bf16.mxu0 %v4828_v2  ;;  %v4886_v23 = vcombine.high %v2509_v60, %v2513_v61  ;;  %v4883_v2 = vcombine.low %v2508_v58, %v2512_v59 }
 0x3d5   :  { %4139 = vmatprep.subr.bf16.mxu1 %v4830_v63  ;;  %v4885_v63 = vcombine.low %v2509_v60, %v2513_v61 }
 0x3d7   :  { %4058 = vmatpush1.bf16.msra.mxu0 %v4827_v8  ;;  %v2527_v8 = vrot.slane %v2514_v3, %v5883_v53 }
 0x3d8   :  { %4140 = vmatpush1.bf16.msra.mxu1 %v4829_v9  ;;  %4059 = vmatprep.subr.bf16.mxu0 %v4836_v10  ;;  %v2523_v9 = vrot.slane %v2514_v3, %v5719_v40  ;;  %v4176_v10 = vunpack.c.0.s8 %v4175_v6 }
 0x3d9   :  { %4141 = vmatprep.subr.bf16.mxu1 %v4838_v11  ;;  %v2531_v11 = vrot.slane %v2514_v3, %v5726_v51  ;;  %v2534_v51 = vsub.s32 4, %v5708_v37 }
 0x3db   :  { %4060 = vmatpush1.bf16.msra.mxu0 %v4835_v24  ;;  %v2535_v30 = vrot.slane %v2514_v3, %v2534_v51 }
 0x3dc   :  { %4142 = vmatpush1.bf16.msra.mxu1 %v4837_v18  ;;  %4061 = vmatprep.subr.bf16.mxu0 %v4844_v31  ;;  %v4179_v31 = vsub.s32 %v4176_v10, %v5708_v37 }
 0x3dd   :  { %4143 = vmatprep.subr.bf16.mxu1 %v4846_v19 }
 0x3df   :  { %4062 = vmatpush1.bf16.msra.mxu0 %v4843_v26 }
 0x3e0   :  { %4144 = vmatpush1.bf16.msra.mxu1 %v4845_v0  ;;  %4063 = vmatprep.subr.bf16.mxu0 %v4852_v27  ;;  %v2542_v27 = vsub.s32 6, %v5708_v37 }
 0x3e1   :  { %4145 = vmatprep.subr.bf16.mxu1 %v4854_v28  ;;  %v2538_v28 = vsub.s32 5, %v5708_v37 }
 0x3e2   :  { %v2543_v32 = vrot.slane %v2514_v3, %v2542_v27 }
 0x3e3   :  { %4064 = vmatpush1.bf16.msra.mxu0 %v4851_v12  ;;  %v2539_v33 = vrot.slane %v2514_v3, %v2538_v28  ;;  %v2547_v12 = vrot.slane %v2514_v3, %v2546_v29 }
 0x3e4   :  { %4146 = vmatpush1.bf16.msra.mxu1 %v4853_v34  ;;  %4065 = vmatprep.subr.bf16.mxu0 %v4860_v4 }
 0x3e5   :  { %4147 = vmatprep.subr.bf16.mxu1 %v4862_v35 }
 0x3e7   :  { %4066 = vmatpush1.bf16.msra.mxu0 %v4859_v43 }
 0x3e8   :  { %4148 = vmatpush1.bf16.msra.mxu1 %v4861_v44  ;;  %4067 = vmatprep.subr.bf16.mxu0 %v4868_v45 }
 0x3e9   :  { %4149 = vmatprep.subr.bf16.mxu1 %v4870_v46 }
 0x3eb   :  { %4068 = vmatpush1.bf16.msra.mxu0 %v4867_v54 }
 0x3ec   :  { %4150 = vmatpush1.bf16.msra.mxu1 %v4869_v55  ;;  %4069 = vmatprep.subr.bf16.mxu0 %v4876_v56 }
 0x3ed   :  { %4151 = vmatprep.subr.bf16.mxu1 %v4878_v57 }
 0x3ef   :  { %4070 = vmatpush1.bf16.msra.mxu0 %v4875_v39 }
 0x3f0   :  { %4152 = vmatpush1.bf16.msra.mxu1 %v4877_v62  ;;  %4071 = vmatprep.subr.bf16.mxu0 %v4884_v1 }
 0x3f1   :  { %4153 = vmatprep.subr.bf16.mxu1 %v4886_v23 }
 0x3f3   :  { %4072 = vmatpush1.bf16.msra.mxu0 %v4883_v2 }
 0x3f4   :  { %4154 = vmatpush1.bf16.msra.mxu1 %v4885_v63 }
 0x3f6   :  { %4074 = vmatmul.mubr.bf16.vlgmr.msra.gmra.mrb[16].mxu0 %v6760_v48 }
 0x3f7   :  { %4156 = vmatmul.mubr.bf16.vlgmr.msra.gmra.mrb[16].mxu1 %v6760_v48 }
 0x449   :  { %v3911_v13 = vpop.f32.mrb[12].mxu0  ;;  %v3993_v14 = vpop.f32.mrb[12].mxu1 }
 0x44a   :  { %v4895_v15 = vadd.f32 %v3911_v13, %v2519_v7  ;;  %v4897_v16 = vadd.f32 %v3993_v14, %v2527_v8  ;;  %v3913_v48 = vpop.f32.mrb[13].mxu0  ;;  %v3995_v24 = vpop.f32.mrb[13].mxu1 }
 0x44b   :  { %v4896_v18 = vadd.f32 %v3913_v48, %v2523_v9  ;;  %v4898_v19 = vadd.f32 %v3995_v24, %v2531_v11  ;;  %v3915_v20 = vpop.f32.mrb[14].mxu0  ;;  %v3997_v21 = vpop.f32.mrb[14].mxu1 }
 0x44c   :  { %v3916_v38 = vpop.f32.mrb[15].mxu0  ;;  %v3998_v22 = vpop.f32.mrb[15].mxu1 }
 0x44d   :  { %v4172_v53 = vcombine.low %v4895_v15, %v4896_v18  ;;  %v4173_v25 = vcombine.low %v4897_v16, %v4898_v19 }
 0x44f   :  { %v4180_v40 = vrot.slane %v4172_v53, %v4179_v31  ;;  %v4187_v26 = vrot.slane %v4173_v25, %v4179_v31 }
 0x451   :  { %v4188_v0 = vcombine.low %v4180_v40, %v4187_v26 }
 0x453   :  { %4208 = vst [vmem:[%s7157_s7] sm:$0xff] %v4188_v0 }
 0x4c9   :  { %v4075_v34 = vpop.f32.mrb[16].mxu0 }
 0x4ca   :  { %v4899_v4 = vadd.f32 %v4075_v34, %v2535_v30  ;;  %v4157_v35 = vpop.f32.mrb[16].mxu1  ;;  %v4077_v36 = vpop.f32.mrb[17].mxu0 }
 0x4cb   :  { %v4901_v41 = vadd.f32 %v4157_v35, %v2543_v32  ;;  %v4900_v42 = vadd.f32 %v4077_v36, %v2539_v33  ;;  %v4159_v17 = vpop.f32.mrb[17].mxu1  ;;  %v4079_v43 = vpop.f32.mrb[18].mxu0 }
 0x4cc   :  { %v4902_v44 = vadd.f32 %v4159_v17, %v2547_v12  ;;  %v4161_v45 = vpop.f32.mrb[18].mxu1  ;;  %v4080_v46 = vpop.f32.mrb[19].mxu0 }
 0x4cd   :  { %v4189_v47 = vcombine.low %v4899_v4, %v4900_v42  ;;  %v4162_v49 = vpop.f32.mrb[19].mxu1 }
 0x4ce   :  { %v4190_v50 = vcombine.low %v4901_v41, %v4902_v44 }
 0x4cf   :  { %v4197_v52 = vrot.slane %v4189_v47, %v4179_v31 }
 0x4d0   :  { %v4204_v37 = vrot.slane %v4190_v50, %v4179_v31 }
 0x4d2   :  { %v4205_v54 = vcombine.low %v4197_v52, %v4204_v37 }
 0x4d4   :  { %4209 = vst [vmem:[%s7157_s7 + $0x8] sm:$0xff] %v4205_v54 }

</bundles_post_ra>
